<compile_context>
chip_gen: v7x
topology: tpu7x:2x2x1
jax: 0.10.0
libtpu: 0.0.40
codegen_flags: <defaults>
</compile_context>

<pallas_src>
import functools

import jax
import jax.numpy as jnp
from jax import lax
from jax.experimental import pallas as pl
from jax.experimental.pallas import tpu as pltpu

# ---- module hyper-parameters (from the PyTorch source) ----------------------
N_EMBD = 384
BLOCK_SIZE = 32
N_HEAD = 4                      # Block(...) is built with n_head=4
HEAD_SIZE = N_EMBD // N_HEAD    # 96
N_LAYERS = 3
VOCAB_SIZE = 65                 # `len(chars)` is data-dependent; fixed here
VOCAB_PAD = 128                 # lane-aligned logits (sliced back to 65 outside)
FF_HIDDEN = 4 * N_EMBD

NEG_INF = -1e30                 # finite mask value (avoids -inf foot-gun)


# =============================================================================
# Fused Pallas kernel: 3 transformer blocks + lm_head, one launch.
# grid = (N_LAYERS,); layer axis is sequential ("arbitrary"); the residual
# stream lives in a VMEM scratch across grid steps.
# =============================================================================
def fused_forward_kernel(x_in_ref, wqkv_ref, wproj_ref, bproj_ref,
                         w1_ref, b1_ref, w2_ref, b2_ref,
                         lm_w_ref, lm_b_ref, o_ref, x_ref,
                         *, batch, seq_len):
    l = pl.program_id(0)
    last = pl.num_programs(0) - 1
    B, T, C = batch, seq_len, N_EMBD
    scale = C ** (-0.5)          # NOTE: reference scales by n_embd**-0.5 (not head_size)

    # Load the embedding output into the resident residual stream (layer 0 only).
    @pl.when(l == 0)
    def _():
        x_ref[...] = x_in_ref[...].astype(jnp.float32)

    x = x_ref[...]                                    # (B*T, C) f32
    xb = x.astype(jnp.bfloat16)

    # ---- fused QKV projection (bias-free, as in the reference Head linears) --
    qkv = jnp.dot(xb, wqkv_ref[0],
                  preferred_element_type=jnp.float32)  # (B*T, 3C) f32
    q = qkv[:, 0 * C:1 * C].astype(jnp.bfloat16)
    k = qkv[:, 1 * C:2 * C].astype(jnp.bfloat16)
    v = qkv[:, 2 * C:3 * C].astype(jnp.bfloat16)

    # causal additive mask (finite)
    row = lax.broadcasted_iota(jnp.int32, (T, T), 0)
    col = lax.broadcasted_iota(jnp.int32, (T, T), 1)
    mask = jnp.where(col <= row, 0.0, NEG_INF).astype(jnp.float32)   # (T, T)

    wproj = wproj_ref[0]                              # (C, C) bf16
    sa = jnp.zeros((B * T, C), jnp.float32)
    for h in range(N_HEAD):                           # static unroll, 4 heads
        lo = h * HEAD_SIZE
        hi = lo + HEAD_SIZE
        qh = q[:, lo:hi].reshape(B, T, HEAD_SIZE)
        kh = k[:, lo:hi].reshape(B, T, HEAD_SIZE)
        vh = v[:, lo:hi].reshape(B, T, HEAD_SIZE)
        # scores: contract over the head dim, no explicit transpose of kh
        wei = lax.dot_general(qh, kh, (((2,), (2,)), ((0,), (0,))),
                              preferred_element_type=jnp.float32) * scale   # (B,T,T)
        wei = wei + mask[None, :, :]
        wei = jax.nn.softmax(wei, axis=-1)
        out_h = lax.dot_general(wei.astype(jnp.bfloat16), vh,
                                (((2,), (1,)), ((0,), (0,))),
                                preferred_element_type=jnp.float32)          # (B,T,hd)
        # fold the head concat into the output projection
        sa = sa + jnp.dot(out_h.reshape(B * T, HEAD_SIZE).astype(jnp.bfloat16),
                          wproj[lo:hi, :],
                          preferred_element_type=jnp.float32)
    sa = sa + bproj_ref[0]                            # (1, C) bias
    x1 = x + sa                                       # residual 1 (f32)

    # ---- FeedForward: Linear -> ReLU -> Linear -------------------------------
    h1 = jnp.dot(x1.astype(jnp.bfloat16), w1_ref[0],
                 preferred_element_type=jnp.float32) + b1_ref[0]
    h1 = jnp.maximum(h1, 0.0)
    ff = jnp.dot(h1.astype(jnp.bfloat16), w2_ref[0],
                 preferred_element_type=jnp.float32) + b2_ref[0]
    x2 = x1 + ff                                      # residual 2
    x_ref[...] = x2                                   # keep resident for next layer

    # ---- final lm_head on the last layer step --------------------------------
    @pl.when(l == last)
    def _():
        o_ref[...] = (jnp.dot(x2.astype(jnp.bfloat16), lm_w_ref[...],
                              preferred_element_type=jnp.float32)
                      + lm_b_ref[...])


# =============================================================================
# Wrapper (pallas_call plumbing)
# =============================================================================
def fused_forward(x2d, params, B, T):
    """x2d: (B*T, C) f32 embedding output -> (B*T, VOCAB_PAD) f32 logits."""
    BT, C = x2d.shape
    kernel = functools.partial(fused_forward_kernel, batch=B, seq_len=T)
    return pl.pallas_call(
        kernel,
        out_shape=jax.ShapeDtypeStruct((BT, VOCAB_PAD), jnp.float32),
        grid_spec=pltpu.PrefetchScalarGridSpec(
            num_scalar_prefetch=0,
            grid=(N_LAYERS,),
            in_specs=[
                pl.BlockSpec((BT, C), lambda l: (0, 0)),                # x (fetched once)
                pl.BlockSpec((1, C, 3 * C), lambda l: (l, 0, 0)),       # Wqkv[l]
                pl.BlockSpec((1, C, C), lambda l: (l, 0, 0)),           # Wproj[l]
                pl.BlockSpec((1, 1, C), lambda l: (l, 0, 0)),           # bproj[l]
                pl.BlockSpec((1, C, FF_HIDDEN), lambda l: (l, 0, 0)),   # W1[l]
                pl.BlockSpec((1, 1, FF_HIDDEN), lambda l: (l, 0, 0)),   # b1[l]
                pl.BlockSpec((1, FF_HIDDEN, C), lambda l: (l, 0, 0)),   # W2[l]
                pl.BlockSpec((1, 1, C), lambda l: (l, 0, 0)),           # b2[l]
                pl.BlockSpec((C, VOCAB_PAD), lambda l: (0, 0)),         # lm_w
                pl.BlockSpec((1, VOCAB_PAD), lambda l: (0, 0)),         # lm_b
            ],
            out_specs=pl.BlockSpec((BT, VOCAB_PAD), lambda l: (0, 0)),
            scratch_shapes=[pltpu.VMEM((BT, C), jnp.float32)],          # residual stream
        ),
        compiler_params=pltpu.CompilerParams(
            dimension_semantics=("arbitrary",),     # sequential layer loop w/ resident acc
            vmem_limit_bytes=32 << 20,              # ~7 MiB actually used; headroom on v7x
        ),
    )(x2d, params["wqkv"], params["wproj"], params["bproj"],
      params["w1"], params["b1"], params["w2"], params["b2"],
      params["lm_w"], params["lm_b"])


# =============================================================================
# Parameter init (deterministic, synthetic).  Per-layer weights are stacked on
# a leading (N_LAYERS,) axis so one kernel can stream them by layer index.
# Matmul weights are bf16; biases / embeddings stay f32.
# =============================================================================
def init_params(key):
    def normal(k, shape, std=0.02, dtype=jnp.float32):
        return (std * jax.random.normal(k, shape, dtype=jnp.float32)).astype(dtype)

    n_keys = 4 + N_LAYERS * 7
    keys = jax.random.split(key, n_keys)
    ki = iter(range(n_keys))

    params = {
        "tok_emb": normal(keys[next(ki)], (VOCAB_SIZE, N_EMBD)),
        "pos_emb": normal(keys[next(ki)], (BLOCK_SIZE, N_EMBD)),
        "lm_b": normal(keys[next(ki)], (1, VOCAB_PAD)).at[:, VOCAB_SIZE:].set(0.0),
    }
    lm_w = normal(keys[next(ki)], (N_EMBD, VOCAB_PAD))
    params["lm_w"] = lm_w.at[:, VOCAB_SIZE:].set(0.0).astype(jnp.bfloat16)

    wqkv, wproj, bproj, w1, b1, w2, b2 = [], [], [], [], [], [], []
    for _ in range(N_LAYERS):
        # per-head K/Q/V Linears (bias=False) concatenated -> (C, C) each,
        # then fused along the output dim as [Wq | Wk | Wv] -> (C, 3C)
        wqkv.append(normal(keys[next(ki)], (N_EMBD, 3 * N_EMBD), dtype=jnp.bfloat16))
        wproj.append(normal(keys[next(ki)], (N_EMBD, N_EMBD), dtype=jnp.bfloat16))
        bproj.append(normal(keys[next(ki)], (1, N_EMBD)))
        w1.append(normal(keys[next(ki)], (N_EMBD, FF_HIDDEN), dtype=jnp.bfloat16))
        b1.append(normal(keys[next(ki)], (1, FF_HIDDEN)))
        w2.append(normal(keys[next(ki)], (FF_HIDDEN, N_EMBD), dtype=jnp.bfloat16))
        b2.append(normal(keys[next(ki)], (1, N_EMBD)))

    params["wqkv"] = jnp.stack(wqkv)      # (L, C, 3C)  bf16
    params["wproj"] = jnp.stack(wproj)    # (L, C, C)   bf16
    params["bproj"] = jnp.stack(bproj)    # (L, 1, C)   f32
    params["w1"] = jnp.stack(w1)          # (L, C, 4C)  bf16
    params["b1"] = jnp.stack(b1)          # (L, 1, 4C)  f32
    params["w2"] = jnp.stack(w2)          # (L, 4C, C)  bf16
    params["b2"] = jnp.stack(b2)          # (L, 1, C)   f32
    return params


# =============================================================================
# Forward pass  (mirrors BigramLanguageModel.forward)
# =============================================================================
@functools.partial(jax.jit, static_argnames=("has_targets",))
def bigram_lm_forward(params, idx, targets=None, has_targets=False):
    B, T = idx.shape
    # Embedding gathers are glue (data-dependent lookup) in plain JAX.
    tok_embd = params["tok_emb"][idx]                    # (B, T, C)
    pos_embd = params["pos_emb"][:T]                     # (T, C)
    x = (tok_embd + pos_embd[None, :, :]).astype(jnp.float32)

    x2d = x.reshape(B * T, N_EMBD)                       # fold batch into GEMM M dim
    logits_pad = fused_forward(x2d, params, B, T)        # (B*T, VOCAB_PAD)
    logits = logits_pad[:, :VOCAB_SIZE].reshape(B, T, VOCAB_SIZE)

    if not has_targets:
        return logits, None
    # TODO(synk): loss path kept in plain JAX (scalar cross-entropy, not a hot kernel).
    lg = logits.reshape(B * T, VOCAB_SIZE)
    tg = targets.reshape(B * T)
    logp = jax.nn.log_softmax(lg, axis=-1)
    loss = -jnp.mean(jnp.take_along_axis(logp, tg[:, None], axis=-1))
    return logits, loss


# =============================================================================
if __name__ == "__main__":
    key = jax.random.PRNGKey(0)
    pkey, dkey = jax.random.split(key)
    params = init_params(pkey)

    B, T = 2, 8                                          # T <= block_size (32)
    idx = jax.random.randint(dkey, (B, T), 0, VOCAB_SIZE, dtype=jnp.int32)

    logits, loss = bigram_lm_forward(params, idx)
    logits = jax.block_until_ready(logits)

    assert logits.shape == (B, T, VOCAB_SIZE), logits.shape
    assert logits.dtype == jnp.float32
    assert bool(jnp.all(jnp.isfinite(logits)))
    print("KERNEL_OK")
</pallas_src>

<mosaic_0001>
module attributes {stable_mosaic.version = 11 : i64} {
  func.func @fused_forward_kernel(%arg0: i32, %arg1: memref<16x384xf32, #tpu.memory_space<vmem>>, %arg2: memref<1x384x1152xbf16, #tpu.memory_space<vmem>>, %arg3: memref<1x384x384xbf16, #tpu.memory_space<vmem>>, %arg4: memref<1x1x384xf32, #tpu.memory_space<vmem>>, %arg5: memref<1x384x1536xbf16, #tpu.memory_space<vmem>>, %arg6: memref<1x1x1536xf32, #tpu.memory_space<vmem>>, %arg7: memref<1x1536x384xbf16, #tpu.memory_space<vmem>>, %arg8: memref<1x1x384xf32, #tpu.memory_space<vmem>>, %arg9: memref<384x128xbf16, #tpu.memory_space<vmem>>, %arg10: memref<1x128xf32, #tpu.memory_space<vmem>>, %arg11: memref<16x128xf32, #tpu.memory_space<vmem>>, %arg12: memref<16x384xf32, #tpu.memory_space<vmem>>) attributes {dimension_semantics = [#tpu.dimension_semantics<arbitrary>], iteration_bounds = array<i64: 3>, scalar_prefetch = 0 : i64, scratch_operands = 1 : i64, tpu.core_type = #tpu.core_type<tc>, window_params = [{pipeline_mode = #tpu.pipeline_mode<synchronous>, transform_indices = @transform_0, window_bounds = array<i64: 16, 384>}, {transform_indices = @transform_1, window_bounds = array<i64: 1, 384, 1152>}, {transform_indices = @transform_2, window_bounds = array<i64: 1, 384, 384>}, {transform_indices = @transform_3, window_bounds = array<i64: 1, 1, 384>}, {transform_indices = @transform_4, window_bounds = array<i64: 1, 384, 1536>}, {transform_indices = @transform_5, window_bounds = array<i64: 1, 1, 1536>}, {transform_indices = @transform_6, window_bounds = array<i64: 1, 1536, 384>}, {transform_indices = @transform_7, window_bounds = array<i64: 1, 1, 384>}, {pipeline_mode = #tpu.pipeline_mode<synchronous>, transform_indices = @transform_8, window_bounds = array<i64: 384, 128>}, {pipeline_mode = #tpu.pipeline_mode<synchronous>, transform_indices = @transform_9, window_bounds = array<i64: 1, 128>}, {pipeline_mode = #tpu.pipeline_mode<synchronous>, transform_indices = @transform_10, window_bounds = array<i64: 16, 128>}]} {
    %c0_i32 = arith.constant 0 : i32
    %0 = arith.cmpi eq, %arg0, %c0_i32 : i32
    %1 = arith.extui %0 : i1 to i32
    %c0_i32_0 = arith.constant 0 : i32
    %2 = arith.cmpi ne, %1, %c0_i32_0 : i32
    scf.if %2 {
      %c0_60 = arith.constant 0 : index
      %c0_61 = arith.constant 0 : index
      %171 = vector.load %arg1[%c0_60, %c0_61] : memref<16x384xf32, #tpu.memory_space<vmem>>, vector<16x384xf32>
      %c0_62 = arith.constant 0 : index
      %c0_63 = arith.constant 0 : index
      %172 = vector.load %arg12[%c0_62, %c0_63] : memref<16x384xf32, #tpu.memory_space<vmem>>, vector<16x384xf32>
      tpu.vector_store %arg12[%c0_62, %c0_63], %171 {strides = array<i32>} : memref<16x384xf32, #tpu.memory_space<vmem>>, vector<16x384xf32>,
    } else {
    }
    %c0 = arith.constant 0 : index
    %c0_1 = arith.constant 0 : index
    %3 = vector.load %arg12[%c0, %c0_1] : memref<16x384xf32, #tpu.memory_space<vmem>>, vector<16x384xf32>
    %4 = arith.truncf %3 : vector<16x384xf32> to vector<16x384xbf16>
    %c0_2 = arith.constant 0 : index
    %c0_3 = arith.constant 0 : index
    %c0_4 = arith.constant 0 : index
    %5 = vector.load %arg2[%c0_2, %c0_3, %c0_4] : memref<1x384x1152xbf16, #tpu.memory_space<vmem>>, vector<1x384x1152xbf16>
    %6 = vector.shape_cast %5 : vector<1x384x1152xbf16> to vector<384x1152xbf16>
    %cst = arith.constant dense<0.000000e+00> : vector<16x1152xf32>
    %7 = tpu.matmul %4, %6, %cst {dimension_numbers = #tpu.dot_dimension_numbers<[1], [0], [0], [1], [0, 0, 1, 1], [], []>} : vector<16x384xbf16>, vector<384x1152xbf16>, vector<16x1152xf32> -> vector<16x1152xf32>
    %8 = vector.extract_strided_slice %7 {offsets = [0, 0], sizes = [16, 384], strides = [1, 1]} : vector<16x1152xf32> to vector<16x384xf32>
    %9 = arith.truncf %8 : vector<16x384xf32> to vector<16x384xbf16>
    %10 = vector.extract_strided_slice %7 {offsets = [0, 384], sizes = [16, 384], strides = [1, 1]} : vector<16x1152xf32> to vector<16x384xf32>
    %11 = arith.truncf %10 : vector<16x384xf32> to vector<16x384xbf16>
    %12 = vector.extract_strided_slice %7 {offsets = [0, 768], sizes = [16, 384], strides = [1, 1]} : vector<16x1152xf32> to vector<16x384xf32>
    %13 = arith.truncf %12 : vector<16x384xf32> to vector<16x384xbf16>
    %14 = tpu.iota {dimensions = array<i32: 0>} : vector<8x8xi32>
    %15 = tpu.iota {dimensions = array<i32: 1>} : vector<8x8xi32>
    %16 = arith.cmpi sle, %15, %14 : vector<8x8xi32>
    %cst_5 = arith.constant 0.000000e+00 : f32
    %cst_6 = arith.constant -1.000000e+30 : f32
    %17 = vector.broadcast %cst_5 : f32 to vector<8x8xf32>
    %18 = vector.broadcast %cst_6 : f32 to vector<8x8xf32>
    %19 = arith.select %16, %17, %18 : vector<8x8xi1>, vector<8x8xf32>
    %c0_7 = arith.constant 0 : index
    %c0_8 = arith.constant 0 : index
    %c0_9 = arith.constant 0 : index
    %20 = vector.load %arg3[%c0_7, %c0_8, %c0_9] : memref<1x384x384xbf16, #tpu.memory_space<vmem>>, vector<1x384x384xbf16>
    %21 = vector.shape_cast %20 : vector<1x384x384xbf16> to vector<384x384xbf16>
    %cst_10 = arith.constant 0.000000e+00 : f32
    %22 = vector.broadcast %cst_10 : f32 to vector<16x384xf32>
    %23 = vector.extract_strided_slice %9 {offsets = [0, 0], sizes = [16, 96], strides = [1, 1]} : vector<16x384xbf16> to vector<16x96xbf16>
    %24 = vector.shape_cast %23 : vector<16x96xbf16> to vector<2x8x96xbf16>
    %25 = vector.extract_strided_slice %11 {offsets = [0, 0], sizes = [16, 96], strides = [1, 1]} : vector<16x384xbf16> to vector<16x96xbf16>
    %26 = vector.shape_cast %25 : vector<16x96xbf16> to vector<2x8x96xbf16>
    %27 = vector.extract_strided_slice %13 {offsets = [0, 0], sizes = [16, 96], strides = [1, 1]} : vector<16x384xbf16> to vector<16x96xbf16>
    %28 = vector.shape_cast %27 : vector<16x96xbf16> to vector<2x8x96xbf16>
    %cst_11 = arith.constant dense<0.000000e+00> : vector<2x8x8xf32>
    %29 = tpu.matmul %24, %26, %cst_11 {dimension_numbers = #tpu.dot_dimension_numbers<[2], [2], [1], [1], [0, 0, 0, 1, 1, 1], [0], [0]>} : vector<2x8x96xbf16>, vector<2x8x96xbf16>, vector<2x8x8xf32> -> vector<2x8x8xf32>
    %cst_12 = arith.constant 0.0510310382 : f32
    %30 = vector.broadcast %cst_12 : f32 to vector<2x8x8xf32>
    %31 = arith.mulf %29, %30 : vector<2x8x8xf32>
    %32 = vector.shape_cast %19 : vector<8x8xf32> to vector<1x8x8xf32>
    %33 = vector.broadcast %32 : vector<1x8x8xf32> to vector<2x8x8xf32>
    %34 = arith.addf %31, %33 : vector<2x8x8xf32>
    %cst_13 = arith.constant dense<0xFF800000> : vector<2x8xf32>
    %35 = vector.multi_reduction <maximumf>, %34, %cst_13 [2] : vector<2x8x8xf32> to vector<2x8xf32>
    %cst_14 = arith.constant 0xFF800000 : f32
    %36 = vector.broadcast %cst_14 : f32 to vector<2x8xf32>
    %37 = arith.maximumf %36, %35 : vector<2x8xf32>
    %38 = vector.shape_cast %37 : vector<2x8xf32> to vector<2x8x1xf32>
    %39 = vector.broadcast %38 : vector<2x8x1xf32> to vector<2x8x8xf32>
    %40 = arith.subf %34, %39 : vector<2x8x8xf32>
    %41 = math.exp %40 : vector<2x8x8xf32>
    %cst_15 = arith.constant dense<0.000000e+00> : vector<2x8xf32>
    %42 = vector.multi_reduction <add>, %41, %cst_15 [2] : vector<2x8x8xf32> to vector<2x8xf32>
    %43 = vector.shape_cast %42 : vector<2x8xf32> to vector<2x8x1xf32>
    %44 = vector.broadcast %43 : vector<2x8x1xf32> to vector<2x8x8xf32>
    %45 = arith.divf %41, %44 : vector<2x8x8xf32>
    %46 = arith.truncf %45 : vector<2x8x8xf32> to vector<2x8x8xbf16>
    %cst_16 = arith.constant dense<0.000000e+00> : vector<2x8x96xf32>
    %47 = tpu.matmul %46, %28, %cst_16 {dimension_numbers = #tpu.dot_dimension_numbers<[2], [1], [1], [2], [0, 0, 0, 1, 1, 2], [0], [0]>} : vector<2x8x8xbf16>, vector<2x8x96xbf16>, vector<2x8x96xf32> -> vector<2x8x96xf32>
    %48 = vector.shape_cast %47 : vector<2x8x96xf32> to vector<16x96xf32>
    %49 = arith.truncf %48 : vector<16x96xf32> to vector<16x96xbf16>
    %50 = vector.extract_strided_slice %21 {offsets = [0, 0], sizes = [96, 384], strides = [1, 1]} : vector<384x384xbf16> to vector<96x384xbf16>
    %cst_17 = arith.constant dense<0.000000e+00> : vector<16x384xf32>
    %51 = tpu.matmul %49, %50, %cst_17 {dimension_numbers = #tpu.dot_dimension_numbers<[1], [0], [0], [1], [0, 0, 1, 1], [], []>} : vector<16x96xbf16>, vector<96x384xbf16>, vector<16x384xf32> -> vector<16x384xf32>
    %52 = arith.addf %22, %51 : vector<16x384xf32>
    %53 = vector.extract_strided_slice %9 {offsets = [0, 96], sizes = [16, 96], strides = [1, 1]} : vector<16x384xbf16> to vector<16x96xbf16>
    %54 = vector.shape_cast %53 : vector<16x96xbf16> to vector<2x8x96xbf16>
    %55 = vector.extract_strided_slice %11 {offsets = [0, 96], sizes = [16, 96], strides = [1, 1]} : vector<16x384xbf16> to vector<16x96xbf16>
    %56 = vector.shape_cast %55 : vector<16x96xbf16> to vector<2x8x96xbf16>
    %57 = vector.extract_strided_slice %13 {offsets = [0, 96], sizes = [16, 96], strides = [1, 1]} : vector<16x384xbf16> to vector<16x96xbf16>
    %58 = vector.shape_cast %57 : vector<16x96xbf16> to vector<2x8x96xbf16>
    %cst_18 = arith.constant dense<0.000000e+00> : vector<2x8x8xf32>
    %59 = tpu.matmul %54, %56, %cst_18 {dimension_numbers = #tpu.dot_dimension_numbers<[2], [2], [1], [1], [0, 0, 0, 1, 1, 1], [0], [0]>} : vector<2x8x96xbf16>, vector<2x8x96xbf16>, vector<2x8x8xf32> -> vector<2x8x8xf32>
    %cst_19 = arith.constant 0.0510310382 : f32
    %60 = vector.broadcast %cst_19 : f32 to vector<2x8x8xf32>
    %61 = arith.mulf %59, %60 : vector<2x8x8xf32>
    %62 = vector.shape_cast %19 : vector<8x8xf32> to vector<1x8x8xf32>
    %63 = vector.broadcast %62 : vector<1x8x8xf32> to vector<2x8x8xf32>
    %64 = arith.addf %61, %63 : vector<2x8x8xf32>
    %cst_20 = arith.constant dense<0xFF800000> : vector<2x8xf32>
    %65 = vector.multi_reduction <maximumf>, %64, %cst_20 [2] : vector<2x8x8xf32> to vector<2x8xf32>
    %cst_21 = arith.constant 0xFF800000 : f32
    %66 = vector.broadcast %cst_21 : f32 to vector<2x8xf32>
    %67 = arith.maximumf %66, %65 : vector<2x8xf32>
    %68 = vector.shape_cast %67 : vector<2x8xf32> to vector<2x8x1xf32>
    %69 = vector.broadcast %68 : vector<2x8x1xf32> to vector<2x8x8xf32>
    %70 = arith.subf %64, %69 : vector<2x8x8xf32>
    %71 = math.exp %70 : vector<2x8x8xf32>
    %cst_22 = arith.constant dense<0.000000e+00> : vector<2x8xf32>
    %72 = vector.multi_reduction <add>, %71, %cst_22 [2] : vector<2x8x8xf32> to vector<2x8xf32>
    %73 = vector.shape_cast %72 : vector<2x8xf32> to vector<2x8x1xf32>
    %74 = vector.broadcast %73 : vector<2x8x1xf32> to vector<2x8x8xf32>
    %75 = arith.divf %71, %74 : vector<2x8x8xf32>
    %76 = arith.truncf %75 : vector<2x8x8xf32> to vector<2x8x8xbf16>
    %cst_23 = arith.constant dense<0.000000e+00> : vector<2x8x96xf32>
    %77 = tpu.matmul %76, %58, %cst_23 {dimension_numbers = #tpu.dot_dimension_numbers<[2], [1], [1], [2], [0, 0, 0, 1, 1, 2], [0], [0]>} : vector<2x8x8xbf16>, vector<2x8x96xbf16>, vector<2x8x96xf32> -> vector<2x8x96xf32>
    %78 = vector.shape_cast %77 : vector<2x8x96xf32> to vector<16x96xf32>
    %79 = arith.truncf %78 : vector<16x96xf32> to vector<16x96xbf16>
    %80 = vector.extract_strided_slice %21 {offsets = [96, 0], sizes = [96, 384], strides = [1, 1]} : vector<384x384xbf16> to vector<96x384xbf16>
    %cst_24 = arith.constant dense<0.000000e+00> : vector<16x384xf32>
    %81 = tpu.matmul %79, %80, %cst_24 {dimension_numbers = #tpu.dot_dimension_numbers<[1], [0], [0], [1], [0, 0, 1, 1], [], []>} : vector<16x96xbf16>, vector<96x384xbf16>, vector<16x384xf32> -> vector<16x384xf32>
    %82 = arith.addf %52, %81 : vector<16x384xf32>
    %83 = vector.extract_strided_slice %9 {offsets = [0, 192], sizes = [16, 96], strides = [1, 1]} : vector<16x384xbf16> to vector<16x96xbf16>
    %84 = vector.shape_cast %83 : vector<16x96xbf16> to vector<2x8x96xbf16>
    %85 = vector.extract_strided_slice %11 {offsets = [0, 192], sizes = [16, 96], strides = [1, 1]} : vector<16x384xbf16> to vector<16x96xbf16>
    %86 = vector.shape_cast %85 : vector<16x96xbf16> to vector<2x8x96xbf16>
    %87 = vector.extract_strided_slice %13 {offsets = [0, 192], sizes = [16, 96], strides = [1, 1]} : vector<16x384xbf16> to vector<16x96xbf16>
    %88 = vector.shape_cast %87 : vector<16x96xbf16> to vector<2x8x96xbf16>
    %cst_25 = arith.constant dense<0.000000e+00> : vector<2x8x8xf32>
    %89 = tpu.matmul %84, %86, %cst_25 {dimension_numbers = #tpu.dot_dimension_numbers<[2], [2], [1], [1], [0, 0, 0, 1, 1, 1], [0], [0]>} : vector<2x8x96xbf16>, vector<2x8x96xbf16>, vector<2x8x8xf32> -> vector<2x8x8xf32>
    %cst_26 = arith.constant 0.0510310382 : f32
    %90 = vector.broadcast %cst_26 : f32 to vector<2x8x8xf32>
    %91 = arith.mulf %89, %90 : vector<2x8x8xf32>
    %92 = vector.shape_cast %19 : vector<8x8xf32> to vector<1x8x8xf32>
    %93 = vector.broadcast %92 : vector<1x8x8xf32> to vector<2x8x8xf32>
    %94 = arith.addf %91, %93 : vector<2x8x8xf32>
    %cst_27 = arith.constant dense<0xFF800000> : vector<2x8xf32>
    %95 = vector.multi_reduction <maximumf>, %94, %cst_27 [2] : vector<2x8x8xf32> to vector<2x8xf32>
    %cst_28 = arith.constant 0xFF800000 : f32
    %96 = vector.broadcast %cst_28 : f32 to vector<2x8xf32>
    %97 = arith.maximumf %96, %95 : vector<2x8xf32>
    %98 = vector.shape_cast %97 : vector<2x8xf32> to vector<2x8x1xf32>
    %99 = vector.broadcast %98 : vector<2x8x1xf32> to vector<2x8x8xf32>
    %100 = arith.subf %94, %99 : vector<2x8x8xf32>
    %101 = math.exp %100 : vector<2x8x8xf32>
    %cst_29 = arith.constant dense<0.000000e+00> : vector<2x8xf32>
    %102 = vector.multi_reduction <add>, %101, %cst_29 [2] : vector<2x8x8xf32> to vector<2x8xf32>
    %103 = vector.shape_cast %102 : vector<2x8xf32> to vector<2x8x1xf32>
    %104 = vector.broadcast %103 : vector<2x8x1xf32> to vector<2x8x8xf32>
    %105 = arith.divf %101, %104 : vector<2x8x8xf32>
    %106 = arith.truncf %105 : vector<2x8x8xf32> to vector<2x8x8xbf16>
    %cst_30 = arith.constant dense<0.000000e+00> : vector<2x8x96xf32>
    %107 = tpu.matmul %106, %88, %cst_30 {dimension_numbers = #tpu.dot_dimension_numbers<[2], [1], [1], [2], [0, 0, 0, 1, 1, 2], [0], [0]>} : vector<2x8x8xbf16>, vector<2x8x96xbf16>, vector<2x8x96xf32> -> vector<2x8x96xf32>
    %108 = vector.shape_cast %107 : vector<2x8x96xf32> to vector<16x96xf32>
    %109 = arith.truncf %108 : vector<16x96xf32> to vector<16x96xbf16>
    %110 = vector.extract_strided_slice %21 {offsets = [192, 0], sizes = [96, 384], strides = [1, 1]} : vector<384x384xbf16> to vector<96x384xbf16>
    %cst_31 = arith.constant dense<0.000000e+00> : vector<16x384xf32>
    %111 = tpu.matmul %109, %110, %cst_31 {dimension_numbers = #tpu.dot_dimension_numbers<[1], [0], [0], [1], [0, 0, 1, 1], [], []>} : vector<16x96xbf16>, vector<96x384xbf16>, vector<16x384xf32> -> vector<16x384xf32>
    %112 = arith.addf %82, %111 : vector<16x384xf32>
    %113 = vector.extract_strided_slice %9 {offsets = [0, 288], sizes = [16, 96], strides = [1, 1]} : vector<16x384xbf16> to vector<16x96xbf16>
    %114 = vector.shape_cast %113 : vector<16x96xbf16> to vector<2x8x96xbf16>
    %115 = vector.extract_strided_slice %11 {offsets = [0, 288], sizes = [16, 96], strides = [1, 1]} : vector<16x384xbf16> to vector<16x96xbf16>
    %116 = vector.shape_cast %115 : vector<16x96xbf16> to vector<2x8x96xbf16>
    %117 = vector.extract_strided_slice %13 {offsets = [0, 288], sizes = [16, 96], strides = [1, 1]} : vector<16x384xbf16> to vector<16x96xbf16>
    %118 = vector.shape_cast %117 : vector<16x96xbf16> to vector<2x8x96xbf16>
    %cst_32 = arith.constant dense<0.000000e+00> : vector<2x8x8xf32>
    %119 = tpu.matmul %114, %116, %cst_32 {dimension_numbers = #tpu.dot_dimension_numbers<[2], [2], [1], [1], [0, 0, 0, 1, 1, 1], [0], [0]>} : vector<2x8x96xbf16>, vector<2x8x96xbf16>, vector<2x8x8xf32> -> vector<2x8x8xf32>
    %cst_33 = arith.constant 0.0510310382 : f32
    %120 = vector.broadcast %cst_33 : f32 to vector<2x8x8xf32>
    %121 = arith.mulf %119, %120 : vector<2x8x8xf32>
    %122 = vector.shape_cast %19 : vector<8x8xf32> to vector<1x8x8xf32>
    %123 = vector.broadcast %122 : vector<1x8x8xf32> to vector<2x8x8xf32>
    %124 = arith.addf %121, %123 : vector<2x8x8xf32>
    %cst_34 = arith.constant dense<0xFF800000> : vector<2x8xf32>
    %125 = vector.multi_reduction <maximumf>, %124, %cst_34 [2] : vector<2x8x8xf32> to vector<2x8xf32>
    %cst_35 = arith.constant 0xFF800000 : f32
    %126 = vector.broadcast %cst_35 : f32 to vector<2x8xf32>
    %127 = arith.maximumf %126, %125 : vector<2x8xf32>
    %128 = vector.shape_cast %127 : vector<2x8xf32> to vector<2x8x1xf32>
    %129 = vector.broadcast %128 : vector<2x8x1xf32> to vector<2x8x8xf32>
    %130 = arith.subf %124, %129 : vector<2x8x8xf32>
    %131 = math.exp %130 : vector<2x8x8xf32>
    %cst_36 = arith.constant dense<0.000000e+00> : vector<2x8xf32>
    %132 = vector.multi_reduction <add>, %131, %cst_36 [2] : vector<2x8x8xf32> to vector<2x8xf32>
    %133 = vector.shape_cast %132 : vector<2x8xf32> to vector<2x8x1xf32>
    %134 = vector.broadcast %133 : vector<2x8x1xf32> to vector<2x8x8xf32>
    %135 = arith.divf %131, %134 : vector<2x8x8xf32>
    %136 = arith.truncf %135 : vector<2x8x8xf32> to vector<2x8x8xbf16>
    %cst_37 = arith.constant dense<0.000000e+00> : vector<2x8x96xf32>
    %137 = tpu.matmul %136, %118, %cst_37 {dimension_numbers = #tpu.dot_dimension_numbers<[2], [1], [1], [2], [0, 0, 0, 1, 1, 2], [0], [0]>} : vector<2x8x8xbf16>, vector<2x8x96xbf16>, vector<2x8x96xf32> -> vector<2x8x96xf32>
    %138 = vector.shape_cast %137 : vector<2x8x96xf32> to vector<16x96xf32>
    %139 = arith.truncf %138 : vector<16x96xf32> to vector<16x96xbf16>
    %140 = vector.extract_strided_slice %21 {offsets = [288, 0], sizes = [96, 384], strides = [1, 1]} : vector<384x384xbf16> to vector<96x384xbf16>
    %cst_38 = arith.constant dense<0.000000e+00> : vector<16x384xf32>
    %141 = tpu.matmul %139, %140, %cst_38 {dimension_numbers = #tpu.dot_dimension_numbers<[1], [0], [0], [1], [0, 0, 1, 1], [], []>} : vector<16x96xbf16>, vector<96x384xbf16>, vector<16x384xf32> -> vector<16x384xf32>
    %142 = arith.addf %112, %141 : vector<16x384xf32>
    %c0_39 = arith.constant 0 : index
    %c0_40 = arith.constant 0 : index
    %c0_41 = arith.constant 0 : index
    %143 = vector.load %arg4[%c0_39, %c0_40, %c0_41] : memref<1x1x384xf32, #tpu.memory_space<vmem>>, vector<1x1x384xf32>
    %144 = vector.shape_cast %143 : vector<1x1x384xf32> to vector<1x384xf32>
    %145 = vector.broadcast %144 : vector<1x384xf32> to vector<16x384xf32>
    %146 = arith.addf %142, %145 : vector<16x384xf32>
    %147 = arith.addf %3, %146 : vector<16x384xf32>
    %148 = arith.truncf %147 : vector<16x384xf32> to vector<16x384xbf16>
    %c0_42 = arith.constant 0 : index
    %c0_43 = arith.constant 0 : index
    %c0_44 = arith.constant 0 : index
    %149 = vector.load %arg5[%c0_42, %c0_43, %c0_44] : memref<1x384x1536xbf16, #tpu.memory_space<vmem>>, vector<1x384x1536xbf16>
    %150 = vector.shape_cast %149 : vector<1x384x1536xbf16> to vector<384x1536xbf16>
    %cst_45 = arith.constant dense<0.000000e+00> : vector<16x1536xf32>
    %151 = tpu.matmul %148, %150, %cst_45 {dimension_numbers = #tpu.dot_dimension_numbers<[1], [0], [0], [1], [0, 0, 1, 1], [], []>} : vector<16x384xbf16>, vector<384x1536xbf16>, vector<16x1536xf32> -> vector<16x1536xf32>
    %c0_46 = arith.constant 0 : index
    %c0_47 = arith.constant 0 : index
    %c0_48 = arith.constant 0 : index
    %152 = vector.load %arg6[%c0_46, %c0_47, %c0_48] : memref<1x1x1536xf32, #tpu.memory_space<vmem>>, vector<1x1x1536xf32>
    %153 = vector.shape_cast %152 : vector<1x1x1536xf32> to vector<1x1536xf32>
    %154 = vector.broadcast %153 : vector<1x1536xf32> to vector<16x1536xf32>
    %155 = arith.addf %151, %154 : vector<16x1536xf32>
    %cst_49 = arith.constant 0.000000e+00 : f32
    %156 = vector.broadcast %cst_49 : f32 to vector<16x1536xf32>
    %157 = arith.maximumf %155, %156 : vector<16x1536xf32>
    %158 = arith.truncf %157 : vector<16x1536xf32> to vector<16x1536xbf16>
    %c0_50 = arith.constant 0 : index
    %c0_51 = arith.constant 0 : index
    %c0_52 = arith.constant 0 : index
    %159 = vector.load %arg7[%c0_50, %c0_51, %c0_52] : memref<1x1536x384xbf16, #tpu.memory_space<vmem>>, vector<1x1536x384xbf16>
    %160 = vector.shape_cast %159 : vector<1x1536x384xbf16> to vector<1536x384xbf16>
    %cst_53 = arith.constant dense<0.000000e+00> : vector<16x384xf32>
    %161 = tpu.matmul %158, %160, %cst_53 {dimension_numbers = #tpu.dot_dimension_numbers<[1], [0], [0], [1], [0, 0, 1, 1], [], []>} : vector<16x1536xbf16>, vector<1536x384xbf16>, vector<16x384xf32> -> vector<16x384xf32>
    %c0_54 = arith.constant 0 : index
    %c0_55 = arith.constant 0 : index
    %c0_56 = arith.constant 0 : index
    %162 = vector.load %arg8[%c0_54, %c0_55, %c0_56] : memref<1x1x384xf32, #tpu.memory_space<vmem>>, vector<1x1x384xf32>
    %163 = vector.shape_cast %162 : vector<1x1x384xf32> to vector<1x384xf32>
    %164 = vector.broadcast %163 : vector<1x384xf32> to vector<16x384xf32>
    %165 = arith.addf %161, %164 : vector<16x384xf32>
    %166 = arith.addf %147, %165 : vector<16x384xf32>
    %c0_57 = arith.constant 0 : index
    %c0_58 = arith.constant 0 : index
    %167 = vector.load %arg12[%c0_57, %c0_58] : memref<16x384xf32, #tpu.memory_space<vmem>>, vector<16x384xf32>
    tpu.vector_store %arg12[%c0_57, %c0_58], %166 {strides = array<i32>} : memref<16x384xf32, #tpu.memory_space<vmem>>, vector<16x384xf32>,
    %c2_i32 = arith.constant 2 : i32
    %168 = arith.cmpi eq, %arg0, %c2_i32 : i32
    %169 = arith.extui %168 : i1 to i32
    %c0_i32_59 = arith.constant 0 : i32
    %170 = arith.cmpi ne, %169, %c0_i32_59 : i32
    scf.if %170 {
      %171 = arith.truncf %166 : vector<16x384xf32> to vector<16x384xbf16>
      %c0_60 = arith.constant 0 : index
      %c0_61 = arith.constant 0 : index
      %172 = vector.load %arg9[%c0_60, %c0_61] : memref<384x128xbf16, #tpu.memory_space<vmem>>, vector<384x128xbf16>
      %cst_62 = arith.constant dense<0.000000e+00> : vector<16x128xf32>
      %173 = tpu.matmul %171, %172, %cst_62 {dimension_numbers = #tpu.dot_dimension_numbers<[1], [0], [0], [1], [0, 0, 1, 1], [], []>} : vector<16x384xbf16>, vector<384x128xbf16>, vector<16x128xf32> -> vector<16x128xf32>
      %c0_63 = arith.constant 0 : index
      %c0_64 = arith.constant 0 : index
      %174 = vector.load %arg10[%c0_63, %c0_64] : memref<1x128xf32, #tpu.memory_space<vmem>>, vector<1x128xf32>
      %175 = vector.broadcast %174 : vector<1x128xf32> to vector<16x128xf32>
      %176 = arith.addf %173, %175 : vector<16x128xf32>
      %c0_65 = arith.constant 0 : index
      %c0_66 = arith.constant 0 : index
      %177 = vector.load %arg11[%c0_65, %c0_66] : memref<16x128xf32, #tpu.memory_space<vmem>>, vector<16x128xf32>
      tpu.vector_store %arg11[%c0_65, %c0_66], %176 {strides = array<i32>} : memref<16x128xf32, #tpu.memory_space<vmem>>, vector<16x128xf32>,
    } else {
    }
    return
  }
  func.func @transform_0(%arg0: i32) -> (i32, i32) {
    %c0_i32 = arith.constant 0 : i32
    %c0_i32_0 = arith.constant 0 : i32
    %c0_i32_1 = arith.constant 0 : i32
    return %c0_i32, %c0_i32_0 : i32, i32
  }
  func.func @transform_1(%arg0: i32) -> (i32, i32, i32) {
    %c0_i32 = arith.constant 0 : i32
    %c0_i32_0 = arith.constant 0 : i32
    %c0_i32_1 = arith.constant 0 : i32
    return %arg0, %c0_i32, %c0_i32_0 : i32, i32, i32
  }
  func.func @transform_2(%arg0: i32) -> (i32, i32, i32) {
    %c0_i32 = arith.constant 0 : i32
    %c0_i32_0 = arith.constant 0 : i32
    %c0_i32_1 = arith.constant 0 : i32
    return %arg0, %c0_i32, %c0_i32_0 : i32, i32, i32
  }
  func.func @transform_3(%arg0: i32) -> (i32, i32, i32) {
    %c0_i32 = arith.constant 0 : i32
    %c0_i32_0 = arith.constant 0 : i32
    %c0_i32_1 = arith.constant 0 : i32
    return %arg0, %c0_i32, %c0_i32_0 : i32, i32, i32
  }
  func.func @transform_4(%arg0: i32) -> (i32, i32, i32) {
    %c0_i32 = arith.constant 0 : i32
    %c0_i32_0 = arith.constant 0 : i32
    %c0_i32_1 = arith.constant 0 : i32
    return %arg0, %c0_i32, %c0_i32_0 : i32, i32, i32
  }
  func.func @transform_5(%arg0: i32) -> (i32, i32, i32) {
    %c0_i32 = arith.constant 0 : i32
    %c0_i32_0 = arith.constant 0 : i32
    %c0_i32_1 = arith.constant 0 : i32
    return %arg0, %c0_i32, %c0_i32_0 : i32, i32, i32
  }
  func.func @transform_6(%arg0: i32) -> (i32, i32, i32) {
    %c0_i32 = arith.constant 0 : i32
    %c0_i32_0 = arith.constant 0 : i32
    %c0_i32_1 = arith.constant 0 : i32
    return %arg0, %c0_i32, %c0_i32_0 : i32, i32, i32
  }
  func.func @transform_7(%arg0: i32) -> (i32, i32, i32) {
    %c0_i32 = arith.constant 0 : i32
    %c0_i32_0 = arith.constant 0 : i32
    %c0_i32_1 = arith.constant 0 : i32
    return %arg0, %c0_i32, %c0_i32_0 : i32, i32, i32
  }
  func.func @transform_8(%arg0: i32) -> (i32, i32) {
    %c0_i32 = arith.constant 0 : i32
    %c0_i32_0 = arith.constant 0 : i32
    %c0_i32_1 = arith.constant 0 : i32
    return %c0_i32, %c0_i32_0 : i32, i32
  }
  func.func @transform_9(%arg0: i32) -> (i32, i32) {
    %c0_i32 = arith.constant 0 : i32
    %c0_i32_0 = arith.constant 0 : i32
    %c0_i32_1 = arith.constant 0 : i32
    return %c0_i32, %c0_i32_0 : i32, i32
  }
  func.func @transform_10(%arg0: i32) -> (i32, i32) {
    %c0_i32 = arith.constant 0 : i32
    %c0_i32_0 = arith.constant 0 : i32
    %c0_i32_1 = arith.constant 0 : i32
    return %c0_i32, %c0_i32_0 : i32, i32
  }
}

</mosaic_0001>

<bundles_post_ra>
// kernel: bigram_lm_forward.1
= control target key start
LH: loop header
LB: loop body
LE: loop exit
PB: predicated region body
PF: predicated region fallthrough
CT: control target
= control target key end

     0   :  { %s14694_s0 = inlined_call_operand.vmem [shape: f32[16,384], index: 0, kind: input, shape index: {}]   ;;  %s14695_s1 = inlined_call_operand.hbm [shape: bf16[3,384,1152], index: 1, kind: input, shape index: {}]   ;;  %s14696_s2 = inlined_call_operand.hbm [shape: bf16[3,384,384], index: 2, kind: input, shape index: {}]   ;;  %s14697_s3 = inlined_call_operand.hbm [shape: f32[3,1,384], index: 3, kind: input, shape index: {}]   ;;  %s14698_s4 = inlined_call_operand.hbm [shape: bf16[3,384,1536], index: 4, kind: input, shape index: {}]   ;;  %s14699_s5 = inlined_call_operand.hbm [shape: f32[3,1,1536], index: 5, kind: input, shape index: {}]   ;;  %s14700_s6 = inlined_call_operand.hbm [shape: bf16[3,1536,384], index: 6, kind: input, shape index: {}]   ;;  %s14701_s7 = inlined_call_operand.hbm [shape: f32[3,1,384], index: 7, kind: input, shape index: {}]   ;;  %s14702_s8 = inlined_call_operand.hbm [shape: bf16[384,128], index: 8, kind: input, shape index: {}]   ;;  %s14703_s9 = inlined_call_operand.hbm [shape: f32[1,128], index: 9, kind: input, shape index: {}]   ;;  %s14704_s10 = inlined_call_operand.vmem [shape: f32[16,128], index: 10, kind: output, shape index: {}]  }
   0x1   :  { %14730 = sst [smem:[#allocation27_spill]] %s14694_s0 }
   0x2   :  { %14731 = sst [smem:[#allocation28_spill]] %s14696_s2 }
   0x3   :  { %14732 = sst [smem:[#allocation29_spill]] %s14704_s10 }
   0x4   :  { %15 = vsyncpa [#allocation4], 0 }
   0x5   :  { %17 = vsyncpa [#allocation4 + $0x1], 0 }
   0x6   :  { %18 = vsyncpa [#allocation6], 0 }
   0x7   :  { %20 = vsyncpa [#allocation6 + $0x1], 0 }
   0x8   :  { %21 = vsyncpa [#allocation9], 0 }
   0x9   :  { %23 = vsyncpa [#allocation9 + $0x1], 0 }
   0xa   :  { %24 = vsyncpa [#allocation12], 0 }
   0xb   :  { %26 = vsyncpa [#allocation12 + $0x1], 0 }
   0xc   :  { %27 = vsyncpa [#allocation15], 0  ;;  %s12881_s13 = smov 0   ;;  %s12883_s14 = smov 0  }
   0xd   :  { %s12885_s15 = smov 0   ;;  %s12887_s16 = smov 0  }
   0xe LB: > { %14733 = sst [smem:[#allocation22_spill]] %s12794_s15  ;;  %s12900_s17 = sadd.s32 4294967295, %s12798_s16   ;;  %s12798_s16 = sphi %s12887_s16, %s14769_s16   ;;  %s12794_s15 = sphi %s12885_s15, %s14771_s15   ;;  %s12790_s14 = sphi %s12883_s14, %s14773_s14   ;;  %s12786_s13 = sphi %s12881_s13, %s14772_s13  }
   0xf   : > { %14734 = sst [smem:[#allocation23_spill]] %s12900_s17  ;;  %s12903_s18 = sadd.s32 1, %s12798_s16  }
  0x10   : > { %14735 = sst [smem:[#allocation24_spill]] %s12903_s18  ;;  %s58_s19 = ssub.s32 %s12798_s16, %s12903_s18 }
  0x11   : > { %s61_s20 = sadd.s32 1, %s12794_s15  ;;  %p59_p0 = scmp.eq.s32.totalorder %s58_s19, 0 }
  0x12   : > { %p68_p1 = scmp.ne.s32.totalorder %s12794_s15, %s12790_s14  ;;  %p69_p2 = scmp.eq.s32.totalorder %s12798_s16, 0 }
  0x13   : > { %p74_p3 = scmp.ne.s32.totalorder %s12790_s14, %s12786_s13  ;;  %p14705_p5 = scmp.eq.s32.totalorder %s12900_s17, 0 }
  0x14   : > { %s12913_s21 = scalar_select %p59_p0, %s12794_s15, %s61_s20  }
  0x15   : > { %p12915_p4 = por %p69_p2, %p68_p1  ;;  %p9549_p6 = scmp.ge.s32.totalorder %s12798_s16, 1 }
  0x16   : > { %14736 = sst [smem:[#allocation25_spill]] %s12913_s21  ;;  %p304_p7 = scmp.lt.s32.totalorder %s12798_s16, 4 }
  0x17   : > { %p12924_p8 = por %p14705_p5, %p74_p3  ;;  %s12800_s25 = smov [#allocation14]  }
  0x18   : > { %p12929_p10 = pnand %p9549_p6, %p304_p7  ;;  %s319_s26 = sshll.u32 %s12800_s25, 4  ;;  %s320_s26 = int_to_ptr.vmem [resolvable:$true] %s319_s26 }
  0x19   : > { %s14738_s23 = scalar_select %p12924_p8, 1, 0 }
  0x1a   : > { %s14740_s24 = scalar_select %p12929_p10, 1, 0 }
  0x1b   : > { %14739 = sst [smem:[#allocation26_spill]] %s14738_s23  ;;  %p11111_p11 = pneg %p12929_p10 }
  0x1c   : > { %p11142_p13 = scmp.lt.s32.totalorder %s12798_s16, 3  ;;  %s12943_s28 = sand.u32 1, %s12794_s15  }
  0x1d   : > { %p12937_p12 = pnand %p11111_p11, %p14705_p5  ;;  %s12946_s29 = sand.u32 1, %s12798_s16  }
  0x1e   : > { %p12950_p0 = pnand %p11142_p13, %p12915_p4  ;;  %s12482_s13 = scalar_lea.hbm %s14702_s8, 3072 }
  0x1f   : > { %s14741_s27 = scalar_select %p12937_p12, 1, 0 }
  0x20   : > { %s14742_s30 = scalar_select %p12950_p0, 1, 0 }
  0x21   : > { %p12483_p1 = scmp.ne.s32.totalorder %s14702_s8, %s12482_s13  ;;  %p14718_p2 = pneg %p12937_p12 }
  0x22   : > { %p12489_p4 = scmp.lt.u32.totalorder %s12482_s13, %s14702_s8 }
  0x23   : > { %p12485_p3 = pnand %p14718_p2, %p12483_p1 }
  0x25   : > { %p12486_p6 = pneg %p12485_p3 }
  0x27   : > { %p12491_p7 = pnand %p12489_p4, %p12486_p6 }
  0x29   : > { %12494 = shalt.err (!%p12491_p7)
}
  0x2a   : > { %s12495_s21 = scalar_lea.vmem %s320_s26, 3072  ;;  %p12503_p5 = scmp.lt.s32.totalorder %s320_s26, %s320_s26 }
  0x2b   : > { %p12496_p11 = scmp.ne.s32.totalorder %s320_s26, %s12495_s21  ;;  %p12504_p8 = scmp.lt.s32.totalorder %s12495_s21, %s12495_s21 }
  0x2d   : > { %p12498_p13 = pnand %p12496_p11, %p14718_p2  ;;  %p12505_p10 = por %p12504_p8, %p12503_p5 }
  0x2f   : > { %p12499_p9 = pneg %p12498_p13 }
  0x31   : > { %p12506_p0 = pnand %p12505_p10, %p12499_p9 }
  0x33   : > { %12509 = shalt.err (!%p12506_p0)
}
  0x34   : > { %s12801_s11 = smov 64   ;;  %s12802_s12 = smov 4  }
  0x35   : > { %11114 = dma.hbm_to_vmem [thread:$0]  (!%p12937_p12), %s14702_s8, 3072, %s320_s26, [#allocation15], %s12801_s11, %s12801_s11, %s12802_s12  }
  0x36   : > { %s11072_s20 = smul.u32 576, %s12943_s28  ;;  %s14743_s2 = sld [smem:[#allocation28_spill]] }
  0x37   : > { %s11073_s25 = smul.u32 9216, %s12798_s16  ;;  %s14721_s17 = scalar_lea.sflag [#allocation6], %s12946_s29 }
  0x38   : > { %s369_s18 = scalar_lea.vmem [#allocation5], %s11072_s20  ;;  %s11076_s0 = smul.u32 2304, %s12943_s28 }
  0x39   : > { %s376_s10 = sshll.u32 %s369_s18, 4  ;;  %p14744_p8 = scmp.ne.s32.totalorder %s14742_s30, 0  ;;  %s12983_s10 = int_to_ptr.vmem [resolvable:$true] %s376_s10 }
  0x3b   : > { %p12991_p9 = pneg %p14744_p8 }
  0x3c   : > { %s12981_s15 = scalar_lea.hbm %s14743_s2, %s11073_s25  ;;  %s12515_s13 = scalar_lea.hbm %s14743_s2, 27648 }
  0x3d   : > { %s12510_s23 = scalar_lea.hbm %s12981_s15, 9216  ;;  %p12516_p1 = scmp.lt.u32.totalorder %s12981_s15, %s14743_s2 }
  0x3e   : > { %p12511_p5 = scmp.ne.s32.totalorder %s12981_s15, %s12510_s23  ;;  %p12517_p3 = scmp.lt.u32.totalorder %s12515_s13, %s12510_s23 }
  0x3f   : > { %s14745_s26 = scalar_select %p12991_p9, 1, 0 }
  0x40   : > { %p12513_p10 = pnand %p12991_p9, %p12511_p5  ;;  %p12518_p6 = por %p12517_p3, %p12516_p1 }
  0x41   : > { %p12519_p4 = scmp.lt.u32.totalorder %s12510_s23, %s12981_s15 }
  0x42   : > { %p12514_p0 = pneg %p12513_p10 }
  0x43   : > { %p12520_p7 = por %p12519_p4, %p12518_p6 }
  0x45   : > { %p12521_p11 = pnand %p12520_p7, %p12514_p0 }
  0x47   : > { %12524 = shalt.err (!%p12521_p11)
}
  0x48   : > { %s12525_s20 = scalar_lea.vmem %s12983_s10, 9216  ;;  %s12803_s25 = smov [#allocation5]  }
  0x49   : > { %p12526_p13 = scmp.ne.s32.totalorder %s12983_s10, %s12525_s20  ;;  %s12530_s22 = sshll.u32 %s12803_s25, 4  ;;  %s12531_s22 = int_to_ptr.vmem [resolvable:$false] %s12530_s22 }
  0x4a   : > { %s12532_s21 = scalar_lea.vmem %s12531_s22, 18432  ;;  %p12533_p2 = scmp.lt.s32.totalorder %s12983_s10, %s12531_s22 }
  0x4b   : > { %p12528_p5 = pnand %p12526_p13, %p12991_p9  ;;  %p12534_p12 = scmp.lt.s32.totalorder %s12532_s21, %s12525_s20 }
  0x4d   : > { %p12529_p10 = pneg %p12528_p5  ;;  %p12535_p1 = por %p12534_p12, %p12533_p2 }
  0x4f   : > { %p12536_p3 = pnand %p12535_p1, %p12529_p10 }
  0x51   : > { %12539 = shalt.err (!%p12536_p3)
}
  0x52   : > { %s14722_s23 = smov 192   ;;  %s14723_s11 = smov 12  }
  0x53   : > { %11124 = dma.hbm_to_vmem [thread:$0]  (!%p14744_p8), %s12981_s15, 9216, %s12983_s10, %s14721_s17, %s14722_s23, %s14722_s23, %s14723_s11  }
  0x54   : > { %s11077_s12 = smul.u32 36864, %s12798_s16  ;;  %s409_s13 = scalar_lea.vmem [#allocation8], %s11076_s0 }
  0x55   : > { %s416_s18 = sshll.u32 %s409_s13, 4  ;;  %s14728_s22 = scalar_lea.sflag [#allocation9], %s12946_s29  ;;  %s13029_s18 = int_to_ptr.vmem [resolvable:$true] %s416_s18 }
  0x56   : > { %s13027_s25 = scalar_lea.hbm %s14698_s4, %s11077_s12  ;;  %s12545_s13 = scalar_lea.hbm %s14698_s4, 110592 }
  0x57   : > { %s12540_s21 = scalar_lea.hbm %s13027_s25, 36864  ;;  %p12546_p6 = scmp.lt.u32.totalorder %s13027_s25, %s14698_s4 }
  0x58   : > { %p12541_p12 = scmp.ne.s32.totalorder %s13027_s25, %s12540_s21  ;;  %p12547_p4 = scmp.lt.u32.totalorder %s12545_s13, %s12540_s21 }
  0x59   : > { %p12549_p11 = scmp.lt.u32.totalorder %s12540_s21, %s13027_s25 }
  0x5a   : > { %p12543_p2 = pnand %p12541_p12, %p12991_p9  ;;  %p12548_p7 = por %p12547_p4, %p12546_p6 }
  0x5c   : > { %p12544_p0 = pneg %p12543_p2  ;;  %p12550_p13 = por %p12549_p11, %p12548_p7 }
  0x5e   : > { %p12551_p5 = pnand %p12550_p13, %p12544_p0 }
  0x60   : > { %12554 = shalt.err (!%p12551_p5)
}
  0x61   : > { %s12555_s20 = scalar_lea.vmem %s13029_s18, 36864  ;;  %s12806_s10 = smov [#allocation8]  }
  0x62   : > { %p12556_p10 = scmp.ne.s32.totalorder %s13029_s18, %s12555_s20  ;;  %s12560_s15 = sshll.u32 %s12806_s10, 4  ;;  %s12561_s15 = int_to_ptr.vmem [resolvable:$false] %s12560_s15 }
  0x63   : > { %s12562_s17 = scalar_lea.vmem %s12561_s15, 73728  ;;  %p12563_p12 = scmp.lt.s32.totalorder %s13029_s18, %s12561_s15 }
  0x64   : > { %p12558_p1 = pnand %p12556_p10, %p12991_p9  ;;  %p12564_p2 = scmp.lt.s32.totalorder %s12562_s17, %s12555_s20 }
  0x66   : > { %p12559_p3 = pneg %p12558_p1  ;;  %p12565_p6 = por %p12564_p2, %p12563_p12 }
  0x68   : > { %p12566_p4 = pnand %p12565_p6, %p12559_p3 }
  0x6a   : > { %12569 = shalt.err (!%p12566_p4)
}
  0x6b   : > { %s12807_s21 = smov 768   ;;  %s12808_s13 = smov 48  }
  0x6c   : > { %11130 = dma.hbm_to_vmem [thread:$0]  (!%p14744_p8), %s13027_s25, 36864, %s13029_s18, %s14728_s22, %s12807_s21, %s12807_s21, %s12808_s13  }
  0x6d   : > { %s13060_s20 = scalar_lea.hbm %s14700_s6, %s11077_s12  ;;  %s449_s15 = scalar_lea.vmem [#allocation11], %s11076_s0 }
  0x6e   : > { %s456_s17 = sshll.u32 %s449_s15, 4  ;;  %s12809_s23 = smov [#allocation16]   ;;  %s13064_s17 = int_to_ptr.vmem [resolvable:$true] %s456_s17 }
  0x6f   : > { %s13066_s11 = sshll.u32 %s12809_s23, 4  ;;  %s14727_s2 = scalar_lea.sflag [#allocation12], %s12946_s29  ;;  %s334_s11 = int_to_ptr.vmem [resolvable:$true] %s13066_s11 }
  0x70   : > { %s12570_s18 = scalar_lea.hbm %s13060_s20, 36864  ;;  %s12575_s21 = scalar_lea.hbm %s14700_s6, 110592 }
  0x71   : > { %p12571_p0 = scmp.ne.s32.totalorder %s13060_s20, %s12570_s18  ;;  %p12576_p13 = scmp.lt.u32.totalorder %s13060_s20, %s14700_s6 }
  0x72   : > { %p12577_p5 = scmp.lt.u32.totalorder %s12575_s21, %s12570_s18  ;;  %p12579_p1 = scmp.lt.u32.totalorder %s12570_s18, %s13060_s20 }
  0x73   : > { %p12573_p7 = pnand %p12571_p0, %p12991_p9 }
  0x74   : > { %p12578_p10 = por %p12577_p5, %p12576_p13 }
  0x75   : > { %p12574_p11 = pneg %p12573_p7 }
  0x76   : > { %p12580_p3 = por %p12579_p1, %p12578_p10 }
  0x78   : > { %p12581_p12 = pnand %p12580_p3, %p12574_p11 }
  0x7a   : > { %12584 = shalt.err (!%p12581_p12)
}
  0x7b   : > { %s12585_s0 = scalar_lea.vmem %s13064_s17, 36864  ;;  %s12810_s23 = smov [#allocation11]  }
  0x7c   : > { %p12586_p2 = scmp.ne.s32.totalorder %s13064_s17, %s12585_s0  ;;  %s12590_s10 = sshll.u32 %s12810_s23, 4  ;;  %s12591_s10 = int_to_ptr.vmem [resolvable:$false] %s12590_s10 }
  0x7d   : > { %s12592_s15 = scalar_lea.vmem %s12591_s10, 73728  ;;  %p12593_p0 = scmp.lt.s32.totalorder %s13064_s17, %s12591_s10 }
  0x7e   : > { %p12588_p6 = pnand %p12586_p2, %p12991_p9  ;;  %p12594_p7 = scmp.lt.s32.totalorder %s12592_s15, %s12585_s0 }
  0x80   : > { %p12589_p4 = pneg %p12588_p6  ;;  %p12595_p13 = por %p12594_p7, %p12593_p0 }
  0x82   : > { %p12596_p5 = pnand %p12595_p13, %p12589_p4 }
  0x84   : > { %12599 = shalt.err (!%p12596_p5)
}
  0x85   : > { %s14746_s18 = smov 12   ;;  %s14747_s12 = smov 192  }
  0x86   : > { %11136 = dma.hbm_to_vmem [thread:$0]  (!%p14744_p8), %s13060_s20, 36864, %s13064_s17, %s14727_s2, %s14747_s12, %s14747_s12, %s14746_s18  }
  0x87   : > { %s12600_s13 = scalar_lea.hbm %s14703_s9, 16  ;;  %p14748_p10 = scmp.ne.s32.totalorder %s14741_s27, 0 }
  0x88   : > { %p12601_p11 = scmp.ne.s32.totalorder %s14703_s9, %s12600_s13  ;;  %p12607_p2 = scmp.lt.u32.totalorder %s12600_s13, %s14703_s9 }
  0x89   : > { %p14749_p1 = pneg %p14748_p10 }
  0x8b   : > { %p12603_p3 = pnand %p12601_p11, %p14749_p1 }
  0x8d   : > { %p12604_p12 = pneg %p12603_p3 }
  0x8f   : > { %p12609_p6 = pnand %p12607_p2, %p12604_p12 }
  0x91   : > { %12612 = shalt.err (!%p12609_p6)
}
  0x92   : > { %s12613_s20 = scalar_lea.vmem %s334_s11, 16  ;;  %p14750_p0 = pmov %p14749_p1 }
  0x93   : > { %p12614_p4 = scmp.ne.s32.totalorder %s334_s11, %s12613_s20  ;;  %s12620_s17 = scalar_lea.vmem %s334_s11, 32 }
  0x94   : > { %p12621_p5 = scmp.lt.s32.totalorder %s334_s11, %s334_s11  ;;  %p12622_p8 = scmp.lt.s32.totalorder %s12620_s17, %s12613_s20 }
  0x95   : > { %p12616_p7 = pnand %p12614_p4, %p14750_p0 }
  0x96   : > { %p12623_p9 = por %p12622_p8, %p12621_p5 }
  0x97   : > { %p12617_p13 = pneg %p12616_p7 }
  0x99   : > { %p12624_p1 = pnand %p12623_p9, %p12617_p13 }
  0x9b   : > { %12627 = shalt.err (!%p12624_p1)
}
  0x9c   : > { %11117 = dma.hbm_to_vmem [thread:$0]  (!%p14748_p10), %s14703_s9, 16, %s334_s11, [#allocation15]  }
  0x9d   : > { %s11070_s12 = smul.u32 1728, %s12943_s28  ;;  %s345_s10 = scalar_lea.sflag [#allocation4], %s12943_s28 }
  0x9e   : > { %s11071_s25 = smul.u32 27648, %s12798_s16  ;;  %p14751_p9 = scmp.ne.s32.totalorder %s14745_s26, 0 }
  0x9f   : > { %s11074_s21 = smul.u32 3, %s12943_s28  ;;  %s348_s27 = scalar_lea.vmem [#allocation3], %s11070_s12 }
  0xa0   : > { %s13122_s0 = scalar_lea.hbm %s14695_s1, %s11071_s25  ;;  %s355_s23 = sshll.u32 %s348_s27, 4  ;;  %s13124_s23 = int_to_ptr.vmem [resolvable:$true] %s355_s23 }
  0xa1   : > { %s12628_s20 = scalar_lea.hbm %s13122_s0, 27648  ;;  %s12633_s15 = scalar_lea.hbm %s14695_s1, 82944 }
  0xa2   : > { %p12629_p8 = scmp.ne.s32.totalorder %s13122_s0, %s12628_s20  ;;  %p12634_p3 = scmp.lt.u32.totalorder %s13122_s0, %s14695_s1 }
  0xa3   : > { %p12635_p12 = scmp.lt.u32.totalorder %s12633_s15, %s12628_s20  ;;  %p12637_p6 = scmp.lt.u32.totalorder %s12628_s20, %s13122_s0 }
  0xa4   : > { %p12631_p11 = pnand %p12629_p8, %p14751_p9 }
  0xa5   : > { %p12636_p2 = por %p12635_p12, %p12634_p3 }
  0xa6   : > { %p12632_p10 = pneg %p12631_p11 }
  0xa7   : > { %p12638_p4 = por %p12637_p6, %p12636_p2 }
  0xa9   : > { %p12639_p0 = pnand %p12638_p4, %p12632_p10 }
  0xab   : > { %12642 = shalt.err (!%p12639_p0)
}
  0xac   : > { %s12643_s12 = scalar_lea.vmem %s13124_s23, 27648  ;;  %s12811_s13 = smov [#allocation3]  }
  0xad   : > { %p12644_p7 = scmp.ne.s32.totalorder %s13124_s23, %s12643_s12  ;;  %s12648_s19 = sshll.u32 %s12811_s13, 4  ;;  %s12649_s19 = int_to_ptr.vmem [resolvable:$false] %s12648_s19 }
  0xae   : > { %s12650_s27 = scalar_lea.vmem %s12649_s19, 55296  ;;  %p12651_p1 = scmp.lt.s32.totalorder %s13124_s23, %s12649_s19 }
  0xaf   : > { %p12646_p13 = pnand %p12644_p7, %p14751_p9  ;;  %p12652_p8 = scmp.lt.s32.totalorder %s12650_s27, %s12643_s12 }
  0xb1   : > { %p12647_p5 = pneg %p12646_p13  ;;  %p12653_p11 = por %p12652_p8, %p12651_p1 }
  0xb3   : > { %p12654_p3 = pnand %p12653_p11, %p12647_p5 }
  0xb5   : > { %12657 = shalt.err (!%p12654_p3)
}
  0xb6   : > { %s12812_s20 = smov 576   ;;  %s12813_s11 = smov 36  }
  0xb7   : > { %p14752_p10 = scmp.ne.s32.totalorder %s14742_s30, 0  ;;  %s11075_s17 = smul.u32 48, %s12798_s16 }
  0xb8   : > { %s390_s15 = scalar_lea.vmem [#allocation7], %s11074_s21  ;;  %s11078_s25 = smul.u32 12, %s12943_s28 }
  0xb9   : > { %11121 = dma.hbm_to_vmem [thread:$0]  (!%p14752_p10), %s13122_s0, 27648, %s13124_s23, %s345_s10, %s12812_s20, %s12812_s20, %s12813_s11  }
  0xba   : > { %s398_s18 = sshll.u32 %s390_s15, 4  ;;  %s396_s19 = scalar_lea.hbm %s14697_s3, %s11075_s17  ;;  %s13153_s18 = int_to_ptr.vmem [resolvable:$true] %s398_s18 }
  0xbb   : > { %s11079_s27 = smul.u32 192, %s12798_s16  ;;  %s12658_s2 = scalar_lea.hbm %s396_s19, 48 }
  0xbc   : > { %p12659_p12 = scmp.ne.s32.totalorder %s396_s19, %s12658_s2  ;;  %s12663_s23 = scalar_lea.hbm %s14697_s3, 144 }
  0xbd   : > { %p12664_p4 = scmp.lt.u32.totalorder %s396_s19, %s14697_s3  ;;  %p12665_p0 = scmp.lt.u32.totalorder %s12663_s23, %s12658_s2 }
  0xbe   : > { %p12661_p2 = pnand %p12659_p12, %p14751_p9  ;;  %p12667_p13 = scmp.lt.u32.totalorder %s12658_s2, %s396_s19 }
  0xbf   : > { %p12666_p7 = por %p12665_p0, %p12664_p4 }
  0xc0   : > { %p12662_p6 = pneg %p12661_p2 }
  0xc1   : > { %p12668_p5 = por %p12667_p13, %p12666_p7 }
  0xc3   : > { %p12669_p1 = pnand %p12668_p5, %p12662_p6 }
  0xc5   : > { %12672 = shalt.err (!%p12669_p1)
}
  0xc6   : > { %s12673_s11 = scalar_lea.vmem %s13153_s18, 48  ;;  %s12814_s22 = smov [#allocation7]  }
  0xc7   : > { %p12674_p8 = scmp.ne.s32.totalorder %s13153_s18, %s12673_s11  ;;  %s12678_s15 = sshll.u32 %s12814_s22, 4  ;;  %s12679_s15 = int_to_ptr.vmem [resolvable:$false] %s12678_s15 }
  0xc8   : > { %s12680_s12 = scalar_lea.vmem %s12679_s15, 96  ;;  %p12681_p12 = scmp.lt.s32.totalorder %s13153_s18, %s12679_s15 }
  0xc9   : > { %p12676_p11 = pnand %p12674_p8, %p14751_p9  ;;  %p12682_p2 = scmp.lt.s32.totalorder %s12680_s12, %s12673_s11 }
  0xcb   : > { %p12677_p3 = pneg %p12676_p11  ;;  %p12683_p4 = por %p12682_p2, %p12681_p12 }
  0xcd   : > { %p12684_p0 = pnand %p12683_p4, %p12677_p3 }
  0xcf   : > { %12687 = shalt.err (!%p12684_p0)
}
  0xd0   : > { %s14753_s2 = scalar_lea.sflag [#allocation6], %s12946_s29  ;;  %s13183_s23 = scalar_lea.hbm %s14699_s5, %s11079_s27 }
  0xd1   : > { %11127 = dma.hbm_to_vmem [thread:$0]  (!%p14752_p10), %s396_s19, 48, %s13153_s18, %s14753_s2  }
  0xd2   : > { %s430_s10 = scalar_lea.vmem [#allocation10], %s11078_s25  ;;  %s13192_s15 = scalar_lea.hbm %s14701_s7, %s11075_s17 }
  0xd3   : > { %s438_s20 = sshll.u32 %s430_s10, 4  ;;  %s12688_s18 = scalar_lea.hbm %s13183_s23, 192  ;;  %s439_s20 = int_to_ptr.vmem [resolvable:$true] %s438_s20 }
  0xd4   : > { %p12689_p6 = scmp.ne.s32.totalorder %s13183_s23, %s12688_s18  ;;  %s12693_s12 = scalar_lea.hbm %s14699_s5, 576 }
  0xd5   : > { %p12694_p5 = scmp.lt.u32.totalorder %s13183_s23, %s14699_s5  ;;  %p12695_p1 = scmp.lt.u32.totalorder %s12693_s12, %s12688_s18 }
  0xd6   : > { %p12691_p7 = pnand %p12689_p6, %p14751_p9  ;;  %p12697_p11 = scmp.lt.u32.totalorder %s12688_s18, %s13183_s23 }
  0xd7   : > { %p12696_p8 = por %p12695_p1, %p12694_p5 }
  0xd8   : > { %p12692_p13 = pneg %p12691_p7 }
  0xd9   : > { %p12698_p3 = por %p12697_p11, %p12696_p8 }
  0xdb   : > { %p12699_p12 = pnand %p12698_p3, %p12692_p13 }
  0xdd   : > { %12702 = shalt.err (!%p12699_p12)
}
  0xde   : > { %s12703_s16 = scalar_lea.vmem %s439_s20, 192  ;;  %s12815_s17 = smov [#allocation10]  }
  0xdf   : > { %p12704_p2 = scmp.ne.s32.totalorder %s439_s20, %s12703_s16  ;;  %s12708_s25 = sshll.u32 %s12815_s17, 4  ;;  %s12709_s25 = int_to_ptr.vmem [resolvable:$false] %s12708_s25 }
  0xe0   : > { %s12710_s0 = scalar_lea.vmem %s12709_s25, 384  ;;  %p12711_p6 = scmp.lt.s32.totalorder %s439_s20, %s12709_s25 }
  0xe1   : > { %p12706_p4 = pnand %p12704_p2, %p14751_p9  ;;  %p12712_p7 = scmp.lt.s32.totalorder %s12710_s0, %s12703_s16 }
  0xe3   : > { %p12707_p0 = pneg %p12706_p4  ;;  %p12713_p10 = por %p12712_p7, %p12711_p6 }
  0xe5   : > { %p12714_p1 = pnand %p12713_p10, %p12707_p0 }
  0xe7   : > { %12717 = shalt.err (!%p12714_p1)
}
  0xe8   : > { %p14754_p5 = scmp.ne.s32.totalorder %s14742_s30, 0  ;;  %s14755_s10 = scalar_lea.sflag [#allocation9], %s12946_s29 }
  0xe9   : > { %s470_s11 = scalar_lea.vmem [#allocation13], %s11074_s21  ;;  %s12718_s18 = scalar_lea.hbm %s13192_s15, 48 }
  0xea   : > { %11133 = dma.hbm_to_vmem [thread:$0]  (!%p14754_p5), %s13183_s23, 192, %s439_s20, %s14755_s10  }
  0xeb   : > { %s478_s22 = sshll.u32 %s470_s11, 4  ;;  %p12719_p13 = scmp.ne.s32.totalorder %s13192_s15, %s12718_s18  ;;  %s479_s22 = int_to_ptr.vmem [resolvable:$true] %s478_s22 }
  0xec   : > { %s12723_s12 = scalar_lea.hbm %s14701_s7, 144  ;;  %p12724_p11 = scmp.lt.u32.totalorder %s13192_s15, %s14701_s7 }
  0xed   : > { %p12721_p10 = pnand %p12719_p13, %p14751_p9  ;;  %p12725_p3 = scmp.lt.u32.totalorder %s12723_s12, %s12718_s18 }
  0xee   : > { %p12727_p2 = scmp.lt.u32.totalorder %s12718_s18, %s13192_s15 }
  0xef   : > { %p12722_p8 = pneg %p12721_p10  ;;  %p12726_p12 = por %p12725_p3, %p12724_p11 }
  0xf1   : > { %p12728_p4 = por %p12727_p2, %p12726_p12 }
  0xf3   : > { %p12729_p0 = pnand %p12728_p4, %p12722_p8 }
  0xf5   : > { %12732 = shalt.err (!%p12729_p0)
}
  0xf6   : > { %s12733_s28 = scalar_lea.vmem %s479_s22, 48  ;;  %s12816_s21 = smov [#allocation13]  }
  0xf7   : > { %p12734_p6 = scmp.ne.s32.totalorder %s479_s22, %s12733_s28  ;;  %s12738_s23 = sshll.u32 %s12816_s21, 4  ;;  %s12739_s23 = int_to_ptr.vmem [resolvable:$false] %s12738_s23 }
  0xf8   : > { %s12740_s20 = scalar_lea.vmem %s12739_s23, 96  ;;  %p12741_p13 = scmp.lt.s32.totalorder %s479_s22, %s12739_s23 }
  0xf9   : > { %p12736_p7 = pnand %p12734_p6, %p14751_p9  ;;  %p12742_p10 = scmp.lt.s32.totalorder %s12740_s20, %s12733_s28 }
  0xfb   : > { %p12737_p1 = pneg %p12736_p7  ;;  %p12743_p5 = por %p12742_p10, %p12741_p13 }
  0xfd   : > { %p12744_p3 = pnand %p12743_p5, %p12737_p1 }
  0xff   : > { %12747 = shalt.err (!%p12744_p3)
}
 0x100   : > { %p14756_p11 = scmp.ne.s32.totalorder %s14742_s30, 0  ;;  %s14757_s16 = scalar_lea.sflag [#allocation12], %s12946_s29 }
 0x101   : > { %p14758_p8 = scmp.ne.s32.totalorder %s14740_s24, 0 }
 0x102   : > { %11139 = dma.hbm_to_vmem [thread:$0]  (!%p14756_p11), %s13192_s15, 48, %s479_s22, %s14757_s16  }
 0x103   : > { %487 = sbr.rel (%p14758_p8) target bundleno = 4850 (0x12f2), region = 60  ;;  %s14759_s26 = sld [smem:[#allocation26_spill]] (!%p14758_p8) }
 0x104   : > { %s489_s17 = sand.u32 (!%p14758_p8), 1, %s12790_s14  }
 0x105   : > { %s11084_s25 = smul.u32 (!%p14758_p8), 1728, %s489_s17  ;;  %s490_s0 = scalar_lea.sflag (!%p14758_p8), [#allocation4], %s489_s17 }
 0x107   : > { %s13237_s10 = scalar_lea.vmem (!%p14758_p8), [#allocation3], %s11084_s25 }
 0x109   : > { %p14760_p9 = scmp.ne.s32.totalorder (!%p14758_p8), %s14759_s26, 0 }
 0x10b   : > { %12765 = dma.done.wait (%p14760_p9), %s490_s0, 27648  }
 0x10c   : > { %12767 = vsyncadd (%p14760_p9), %s490_s0, 4294939648  ;;  %s14761_s30 = sld [smem:[#allocation23_spill]]  ;;  %s11085_s11 = smul.u32 576, %s489_s17 }
 0x10e   : > { %s13244_s22 = scalar_lea.vmem [#allocation5], %s11085_s11 }
 0x112   : > { %s498_s29 = sand.u32 1, %s14761_s30  }
 0x113   : > { %s499_s15 = scalar_lea.sflag [#allocation6], %s498_s29 }
 0x114   : > { %12769 = dma.done.wait (%p14760_p9), %s499_s15, 9264  }
 0x115   : > { %12771 = vsyncadd (%p14760_p9), %s499_s15, 4294958032  ;;  %s11086_s24 = smul.u32 3, %s489_s17  ;;  %s517_s27 = scalar_lea.sflag [#allocation9], %s498_s29 }
 0x116   : > { %s11087_s18 = smul.u32 2304, %s489_s17 }
 0x117   : > { %s13250_s19 = scalar_lea.vmem [#allocation7], %s11086_s24 }
 0x118   : > { %s13252_s12 = scalar_lea.vmem [#allocation8], %s11087_s18 }
 0x119   : > { %12773 = dma.done.wait (%p14760_p9), %s517_s27, 37056  }
 0x11a   : > { %12775 = vsyncadd (%p14760_p9), %s517_s27, 4294930240  ;;  %s11088_s2 = smul.u32 12, %s489_s17  ;;  %s535_s28 = scalar_lea.sflag [#allocation12], %s498_s29 }
 0x11b   : > { %s13260_s21 = scalar_lea.vmem [#allocation11], %s11087_s18 }
 0x11c   : > { %s13258_s13 = scalar_lea.vmem [#allocation10], %s11088_s2 }
 0x11d   : > { %12777 = dma.done.wait (%p14760_p9), %s535_s28, 36912  }
 0x11e   : > { %12779 = vsyncadd (%p14760_p9), %s535_s28, 4294930384  ;;  %s13266_s23 = scalar_lea.vmem [#allocation13], %s11086_s24  ;;  %p14762_p5 = scmp.eq.s32.totalorder %s14761_s30, 0 }
 0x120   : > { %12781 = dma.done.wait (%p14762_p5), [#allocation15], 3088   ;;  %p14763_p12 = pmov %p14762_p5 }
 0x121   : > { %p14764_p2 = scmp.ne.s32.totalorder %s14761_s30, 0 }
 0x122   : > { %12783 = vsyncadd (%p14763_p12), [#allocation15], 4294964208  ;;  %s14765_s17 = sld [smem:[#allocation27_spill]] (!%p14764_p2) }
 0x123   : > { %621 = sbr.rel (%p14764_p2) target bundleno = 300 (0x12c), region = 100 }
 0x128   : > { %v622_v0 = vld [vmem:[%s14765_s17] sm:$0xff] (!%p14764_p2)  ;;  %v623_v1 = vld [vmem:[%s14765_s17 + $0x8] sm:$0xff] (!%p14764_p2)  ;;  %v624_v2 = vld [vmem:[%s14765_s17 + $0x10] sm:$0xff] (!%p14764_p2) }
 0x129   : > { %628 = vst [vmem:[#allocation2] sm:$0xff] (!%p14764_p2), %v622_v0  ;;  %629 = vst [vmem:[#allocation2 + $0x8] sm:$0xff] (!%p14764_p2), %v623_v1  ;;  %v625_v3 = vld [vmem:[%s14765_s17 + $0x18] sm:$0xff] (!%p14764_p2)  ;;  %v626_v4 = vld [vmem:[%s14765_s17 + $0x20] sm:$0xff] (!%p14764_p2) }
 0x12a   : > { %630 = vst [vmem:[#allocation2 + $0x10] sm:$0xff] %v624_v2  ;;  %v627_v5 = vld [vmem:[%s14765_s17 + $0x28] sm:$0xff]  ;;  %631 = vst [vmem:[#allocation2 + $0x18] sm:$0xff] %v625_v3 }
 0x12b   : > { %632 = vst [vmem:[#allocation2 + $0x20] sm:$0xff] %v626_v4  ;;  %633 = vst [vmem:[#allocation2 + $0x28] sm:$0xff] %v627_v5 }
 0x12c PF: > { %v11196_v6 = vld [vmem:[%s13237_s10 + $0x4] ss:$36 sps:$4 sm:$0xff]   ;;  %v11199_v8 = vld [vmem:[%s13237_s10 + $0x4c] ss:$36 sps:$4 sm:$0xff]   ;;  %v11202_v10 = vld [vmem:[%s13237_s10 + $0x94] ss:$36 sps:$4 sm:$0xff]  }
 0x12d   : > { %v11198_v7 = vld [vmem:[%s13237_s10] ss:$36 sps:$4 sm:$0xff]   ;;  %1987 = vmatprep.subr.bf16.mxu1 %v11196_v6  ;;  %v11201_v9 = vld [vmem:[%s13237_s10 + $0x48] ss:$36 sps:$4 sm:$0xff]   ;;  %v11204_v11 = vld [vmem:[%s13237_s10 + $0x90] ss:$36 sps:$4 sm:$0xff]  }
 0x12e   : > { %1988 = vmatpush1.bf16.msra.mxu1 %v11198_v7  ;;  %v11205_v12 = vld [vmem:[%s13237_s10 + $0xdc] ss:$36 sps:$4 sm:$0xff]   ;;  %v11208_v14 = vld [vmem:[%s13237_s10 + $0x124] ss:$36 sps:$4 sm:$0xff]   ;;  %v11211_v16 = vld [vmem:[%s13237_s10 + $0x16c] ss:$36 sps:$4 sm:$0xff]  }
 0x12f   : > { %1989 = vmatprep.subr.bf16.mxu1 %v11199_v8  ;;  %v11207_v13 = vld [vmem:[%s13237_s10 + $0xd8] ss:$36 sps:$4 sm:$0xff]   ;;  %v11210_v15 = vld [vmem:[%s13237_s10 + $0x120] ss:$36 sps:$4 sm:$0xff]   ;;  %v11213_v17 = vld [vmem:[%s13237_s10 + $0x168] ss:$36 sps:$4 sm:$0xff]  }
 0x130   : > { %v11214_v18 = vld [vmem:[%s13237_s10 + $0x1b4] ss:$36 sps:$4 sm:$0xff]   ;;  %v11217_v23 = vld [vmem:[%s13237_s10 + $0x1fc] ss:$36 sps:$4 sm:$0xff]   ;;  %v11220_v25 = vld [vmem:[%s13237_s10 + $0x244] ss:$36 sps:$4 sm:$0xff]  }
 0x131   : > { %v11216_v22 = vld [vmem:[%s13237_s10 + $0x1b0] ss:$36 sps:$4 sm:$0xff]   ;;  %v11219_v24 = vld [vmem:[%s13237_s10 + $0x1f8] ss:$36 sps:$4 sm:$0xff]   ;;  %v11222_v26 = vld [vmem:[%s13237_s10 + $0x240] ss:$36 sps:$4 sm:$0xff]  }
 0x132   : > { %1990 = vmatpush1.bf16.msra.mxu1 %v11201_v9  ;;  %v635_v19 = vld [vmem:[#allocation2 + $0x8] sm:$0xff]  ;;  %v638_v20 = vld [vmem:[#allocation2 + $0x20] sm:$0xff]  ;;  %v11225_v29 = vld [vmem:[%s13237_s10 + $0x288] ss:$36 sps:$4 sm:$0xff]   ;;  %v12817_v2 = vmov 0   ;;  %vm12819_vm0 = vmmov 0  }
 0x133   : > { %1991 = vmatprep.subr.bf16.mxu1 %v11202_v10  ;;  %v13305_v21 = vpack.c.bf16 %v638_v20, %v635_v19  ;;  %v11223_v27 = vld [vmem:[%s13237_s10 + $0x28c] ss:$36 sps:$4 sm:$0xff]   ;;  %v11268_v28 = vld [vmem:[%s13237_s10 + $0x14] ss:$36 sps:$4 sm:$0xff]   ;;  %v11274_v32 = vld [vmem:[%s13237_s10 + $0x5c] ss:$36 sps:$4 sm:$0xff]  }
 0x134   : > { %v11226_v30 = vld [vmem:[%s13237_s10 + $0x2d4] ss:$36 sps:$4 sm:$0xff]   ;;  %2159 = vmatprep.subr.bf16.mxu0 %v11268_v28  ;;  %v11229_v34 = vld [vmem:[%s13237_s10 + $0x31c] ss:$36 sps:$4 sm:$0xff]   ;;  %v11280_v36 = vld [vmem:[%s13237_s10 + $0xa4] ss:$36 sps:$4 sm:$0xff]  }
 0x135   : > { %2019 = vmatprep.mubr.bf16.mxu1 %v13305_v21  ;;  %2191 = vmatprep.mubr.bf16.mxu0 %v13305_v21  ;;  %v11273_v31 = vld [vmem:[%s13237_s10 + $0x10] ss:$36 sps:$4 sm:$0xff]   ;;  %v11279_v35 = vld [vmem:[%s13237_s10 + $0x58] ss:$36 sps:$4 sm:$0xff]   ;;  %v11285_v38 = vld [vmem:[%s13237_s10 + $0xa0] ss:$36 sps:$4 sm:$0xff]  }
 0x136   : > { %1992 = vmatpush1.bf16.msra.mxu1 %v11204_v11  ;;  %v11228_v33 = vld [vmem:[%s13237_s10 + $0x2d0] ss:$36 sps:$4 sm:$0xff]   ;;  %2160 = vmatpush1.bf16.msra.mxu0 %v11273_v31  ;;  %v11231_v37 = vld [vmem:[%s13237_s10 + $0x318] ss:$36 sps:$4 sm:$0xff]   ;;  %v11232_v40 = vld [vmem:[%s13237_s10 + $0x364] ss:$36 sps:$4 sm:$0xff]  }
 0x137   : > { %1993 = vmatprep.subr.bf16.mxu1 %v11205_v12  ;;  %2161 = vmatprep.subr.bf16.mxu0 %v11274_v32  ;;  %v11286_v39 = vld [vmem:[%s13237_s10 + $0xec] ss:$36 sps:$4 sm:$0xff]   ;;  %v11234_v41 = vld [vmem:[%s13237_s10 + $0x360] ss:$36 sps:$4 sm:$0xff]   ;;  %v11292_v43 = vld [vmem:[%s13237_s10 + $0x134] ss:$36 sps:$4 sm:$0xff]  }
 0x138   : > { %v11291_v42 = vld [vmem:[%s13237_s10 + $0xe8] ss:$36 sps:$4 sm:$0xff]   ;;  %v11297_v46 = vld [vmem:[%s13237_s10 + $0x130] ss:$36 sps:$4 sm:$0xff]   ;;  %v11298_v47 = vld [vmem:[%s13237_s10 + $0x17c] ss:$36 sps:$4 sm:$0xff]  }
 0x139   : > { %v11235_v44 = vld [vmem:[%s13237_s10 + $0x3ac] ss:$36 sps:$4 sm:$0xff]   ;;  %v11238_v48 = vld [vmem:[%s13237_s10 + $0x3f4] ss:$36 sps:$4 sm:$0xff]   ;;  %v11304_v51 = vld [vmem:[%s13237_s10 + $0x1c4] ss:$36 sps:$4 sm:$0xff]  }
 0x13a   : > { %1994 = vmatpush1.bf16.msra.mxu1 %v11207_v13  ;;  %2162 = vmatpush1.bf16.msra.mxu0 %v11279_v35  ;;  %v11237_v45 = vld [vmem:[%s13237_s10 + $0x3a8] ss:$36 sps:$4 sm:$0xff]   ;;  %v11240_v49 = vld [vmem:[%s13237_s10 + $0x3f0] ss:$36 sps:$4 sm:$0xff]   ;;  %v11303_v50 = vld [vmem:[%s13237_s10 + $0x178] ss:$36 sps:$4 sm:$0xff]  }
 0x13b   : > { %1995 = vmatprep.subr.bf16.mxu1 %v11208_v14  ;;  %2163 = vmatprep.subr.bf16.mxu0 %v11280_v36  ;;  %v11241_v52 = vld [vmem:[%s13237_s10 + $0x43c] ss:$36 sps:$4 sm:$0xff]   ;;  %v634_v54 = vld [vmem:[#allocation2] sm:$0xff]  ;;  %v637_v55 = vld [vmem:[#allocation2 + $0x18] sm:$0xff]  ;;  %s12820_s2 = smov 32   ;;  %vm2539_vm1 = vcmask 785408  }
 0x13c   : > { %v11243_v53 = vld [vmem:[%s13237_s10 + $0x438] ss:$36 sps:$4 sm:$0xff]   ;;  %v11309_v56 = vld [vmem:[%s13237_s10 + $0x1c0] ss:$36 sps:$4 sm:$0xff]   ;;  %v11310_v57 = vld [vmem:[%s13237_s10 + $0x20c] ss:$36 sps:$4 sm:$0xff]   ;;  %v13345_v60 = vpack.c.bf16 %v637_v55, %v634_v54 }
 0x13d   : > { %v11246_v58 = vld [vmem:[%s13237_s10 + $0x484] ss:$36 sps:$4 sm:$0xff]   ;;  %v11249_v62 = vld [vmem:[%s13237_s10 + $0x4cc] ss:$36 sps:$4 sm:$0xff]   ;;  %v11316_v63 = vld [vmem:[%s13237_s10 + $0x254] ss:$36 sps:$4 sm:$0xff]  }
 0x13e   : > { %1996 = vmatpush1.bf16.msra.mxu1 %v11210_v15  ;;  %2164 = vmatpush1.bf16.msra.mxu0 %v11285_v38  ;;  %v11244_v59 = vld [vmem:[%s13237_s10 + $0x480] ss:$36 sps:$4 sm:$0xff]   ;;  %v11315_v61 = vld [vmem:[%s13237_s10 + $0x208] ss:$36 sps:$4 sm:$0xff]   ;;  %v11321_v1 = vld [vmem:[%s13237_s10 + $0x250] ss:$36 sps:$4 sm:$0xff]  }
 0x13f   : > { %1997 = vmatprep.subr.bf16.mxu1 %v11211_v16  ;;  %2165 = vmatprep.subr.bf16.mxu0 %v11286_v39  ;;  %v11247_v0 = vld [vmem:[%s13237_s10 + $0x4c8] ss:$36 sps:$4 sm:$0xff]   ;;  %v11322_v3 = vld [vmem:[%s13237_s10 + $0x29c] ss:$36 sps:$4 sm:$0xff]   ;;  %v11252_v4 = vld [vmem:[%s13237_s10 + $0x514] ss:$36 sps:$4 sm:$0xff]  }
 0x140   : > { %v11250_v5 = vld [vmem:[%s13237_s10 + $0x510] ss:$36 sps:$4 sm:$0xff]   ;;  %v11327_v6 = vld [vmem:[%s13237_s10 + $0x298] ss:$36 sps:$4 sm:$0xff]   ;;  %v11328_v7 = vld [vmem:[%s13237_s10 + $0x2e4] ss:$36 sps:$4 sm:$0xff]  }
 0x141   : > { %v11255_v8 = vld [vmem:[%s13237_s10 + $0x55c] ss:$36 sps:$4 sm:$0xff]   ;;  %v11334_v11 = vld [vmem:[%s13237_s10 + $0x32c] ss:$36 sps:$4 sm:$0xff]   ;;  %v11258_v12 = vld [vmem:[%s13237_s10 + $0x5a4] ss:$36 sps:$4 sm:$0xff]  }
 0x142   : > { %1998 = vmatpush1.bf16.msra.mxu1 %v11213_v17  ;;  %2166 = vmatpush1.bf16.msra.mxu0 %v11291_v42  ;;  %v11253_v9 = vld [vmem:[%s13237_s10 + $0x558] ss:$36 sps:$4 sm:$0xff]   ;;  %v11333_v10 = vld [vmem:[%s13237_s10 + $0x2e0] ss:$36 sps:$4 sm:$0xff]   ;;  %v11339_v14 = vld [vmem:[%s13237_s10 + $0x328] ss:$36 sps:$4 sm:$0xff]  }
 0x143   : > { %1999 = vmatprep.subr.bf16.mxu1 %v11214_v18  ;;  %2167 = vmatprep.subr.bf16.mxu0 %v11292_v43  ;;  %v11256_v13 = vld [vmem:[%s13237_s10 + $0x5a0] ss:$36 sps:$4 sm:$0xff]   ;;  %v11340_v15 = vld [vmem:[%s13237_s10 + $0x374] ss:$36 sps:$4 sm:$0xff]   ;;  %v11261_v16 = vld [vmem:[%s13237_s10 + $0x5ec] ss:$36 sps:$4 sm:$0xff]  }
 0x144   : > { %v11259_v17 = vld [vmem:[%s13237_s10 + $0x5e8] ss:$36 sps:$4 sm:$0xff]   ;;  %v11345_v18 = vld [vmem:[%s13237_s10 + $0x370] ss:$36 sps:$4 sm:$0xff]   ;;  %v11346_v19 = vld [vmem:[%s13237_s10 + $0x3bc] ss:$36 sps:$4 sm:$0xff]  }
 0x145   : > { %v11264_v20 = vld [vmem:[%s13237_s10 + $0x634] ss:$36 sps:$4 sm:$0xff]   ;;  %v11272_v31 = vld [vmem:[%s13237_s10 + $0xc] ss:$36 sps:$4 sm:$0xff]   ;;  %v11372_v39 = vld [vmem:[%s13237_s10 + $0x4dc] ss:$36 sps:$4 sm:$0xff]  }
 0x146   : > { %2000 = vmatpush1.bf16.msra.mxu1 %v11216_v22  ;;  %2168 = vmatpush1.bf16.msra.mxu0 %v11297_v46  ;;  %v11262_v22 = vld [vmem:[%s13237_s10 + $0x630] ss:$36 sps:$4 sm:$0xff]   ;;  %v639_v28 = vld [vmem:[#allocation2 + $0x28] sm:$0xff]  ;;  %v11270_v32 = vld [vmem:[%s13237_s10 + $0x8] ss:$36 sps:$4 sm:$0xff]   ;;  %vm2664_vm2 = vcmask 1043456  }
 0x147   : > { %2001 = vmatprep.subr.bf16.mxu1 %v11217_v23  ;;  %2169 = vmatprep.subr.bf16.mxu0 %v11298_v47  ;;  %v11351_v23 = vld [vmem:[%s13237_s10 + $0x3b8] ss:$36 sps:$4 sm:$0xff]   ;;  %v11364_v38 = vld [vmem:[%s13237_s10 + $0x490] ss:$36 sps:$4 sm:$0xff]   ;;  %v11378_v43 = vld [vmem:[%s13237_s10 + $0x524] ss:$36 sps:$4 sm:$0xff]  }
 0x148   : > { %v11366_v35 = vld [vmem:[%s13237_s10 + $0x494] ss:$36 sps:$4 sm:$0xff]   ;;  %v11376_v46 = vld [vmem:[%s13237_s10 + $0x520] ss:$36 sps:$4 sm:$0xff]   ;;  %v11384_v47 = vld [vmem:[%s13237_s10 + $0x56c] ss:$36 sps:$4 sm:$0xff]  }
 0x149   : > { %v11278_v36 = vld [vmem:[%s13237_s10 + $0x54] ss:$36 sps:$4 sm:$0xff]   ;;  %v11396_v55 = vld [vmem:[%s13237_s10 + $0x5fc] ss:$36 sps:$4 sm:$0xff]   ;;  %vm2636_vm4 = vcmask 64512   ;;  %vm2769_vm5 = vcmask 261120  }
 0x14a   : > { %2002 = vmatpush1.bf16.msra.mxu1 %v11219_v24  ;;  %2170 = vmatpush1.bf16.msra.mxu0 %v11303_v50  ;;  %v11352_v24 = vld [vmem:[%s13237_s10 + $0x404] ss:$36 sps:$4 sm:$0xff]   ;;  %v11370_v42 = vld [vmem:[%s13237_s10 + $0x4d8] ss:$36 sps:$4 sm:$0xff]   ;;  %v11388_v54 = vld [vmem:[%s13237_s10 + $0x5b0] ss:$36 sps:$4 sm:$0xff]  }
 0x14b   : > { %2003 = vmatprep.subr.bf16.mxu1 %v11220_v25  ;;  %2171 = vmatprep.subr.bf16.mxu0 %v11304_v51  ;;  %v11267_v25 = vld [vmem:[%s13237_s10 + $0x67c] ss:$36 sps:$4 sm:$0xff]   ;;  %v11382_v50 = vld [vmem:[%s13237_s10 + $0x568] ss:$36 sps:$4 sm:$0xff]   ;;  %v11390_v51 = vld [vmem:[%s13237_s10 + $0x5b4] ss:$36 sps:$4 sm:$0xff]  }
 0x14c   : > { %vm3394_vm6 = vcmask 523264   ;;  %s12823_s28 = smov 96  }
 0x14e   : > { %2004 = vmatpush1.bf16.msra.mxu1 %v11222_v26  ;;  %2172 = vmatpush1.bf16.msra.mxu0 %v11309_v56  ;;  %v11265_v26 = vld [vmem:[%s13237_s10 + $0x678] ss:$36 sps:$4 sm:$0xff]  }
 0x14f   : > { %2005 = vmatprep.subr.bf16.mxu1 %v11223_v27  ;;  %2173 = vmatprep.subr.bf16.mxu0 %v11310_v57  ;;  %v636_v27 = vld [vmem:[#allocation2 + $0x10] sm:$0xff]  ;;  %v11394_v57 = vld [vmem:[%s13237_s10 + $0x5f8] ss:$36 sps:$4 sm:$0xff]  }
 0x150   : > { %v11308_v56 = vld [vmem:[%s13237_s10 + $0x1bc] ss:$36 sps:$4 sm:$0xff]  }
 0x152   : > { %2006 = vmatpush1.bf16.msra.mxu1 %v11225_v29  ;;  %2174 = vmatpush1.bf16.msra.mxu0 %v11315_v61  ;;  %v11357_v29 = vld [vmem:[%s13237_s10 + $0x400] ss:$36 sps:$4 sm:$0xff]  }
 0x153   : > { %2007 = vmatprep.subr.bf16.mxu1 %v11226_v30  ;;  %2175 = vmatprep.subr.bf16.mxu0 %v11316_v63  ;;  %v11358_v30 = vld [vmem:[%s13237_s10 + $0x44c] ss:$36 sps:$4 sm:$0xff]   ;;  %v11402_v61 = vld [vmem:[%s13237_s10 + $0x644] ss:$36 sps:$4 sm:$0xff]  }
 0x154   : > { %v11312_v63 = vld [vmem:[%s13237_s10 + $0x200] ss:$36 sps:$4 sm:$0xff]  }
 0x156   : > { %2008 = vmatpush1.bf16.msra.mxu1 %v11228_v33  ;;  %2176 = vmatpush1.bf16.msra.mxu0 %v11321_v1  ;;  %v13381_v33 = vpack.c.bf16 %v639_v28, %v636_v27  ;;  %v11408_v1 = vld [vmem:[%s13237_s10 + $0x68c] ss:$36 sps:$4 sm:$0xff]   ;;  %v11385_v27 = vld [vmem:[%s13237_s10 + $0x560] ss:$36 sps:$4 sm:$0xff]  }
 0x157   : > { %2009 = vmatprep.subr.bf16.mxu1 %v11229_v34  ;;  %2177 = vmatprep.subr.bf16.mxu0 %v11322_v3  ;;  %v11363_v34 = vld [vmem:[%s13237_s10 + $0x448] ss:$36 sps:$4 sm:$0xff]  }
 0x158   : > { %v11406_v3 = vld [vmem:[%s13237_s10 + $0x688] ss:$36 sps:$4 sm:$0xff]  }
 0x159   : > { %v11393_v28 = vld [vmem:[%s13237_s10 + $0x5ac] ss:$36 sps:$4 sm:$0xff]  }
 0x15a   : > { %2010 = vmatpush1.bf16.msra.mxu1 %v11231_v37  ;;  %2178 = vmatpush1.bf16.msra.mxu0 %v11327_v6  ;;  %v11276_v37 = vld [vmem:[%s13237_s10 + $0x50] ss:$36 sps:$4 sm:$0xff]  }
 0x15b   : > { %2011 = vmatprep.subr.bf16.mxu1 %v11232_v40  ;;  %2179 = vmatprep.subr.bf16.mxu0 %v11328_v7  ;;  %v11284_v40 = vld [vmem:[%s13237_s10 + $0x9c] ss:$36 sps:$4 sm:$0xff]   ;;  %v11324_v6 = vld [vmem:[%s13237_s10 + $0x290] ss:$36 sps:$4 sm:$0xff]  }
 0x15c   : > { %v11332_v7 = vld [vmem:[%s13237_s10 + $0x2dc] ss:$36 sps:$4 sm:$0xff]  }
 0x15e   : > { %2012 = vmatpush1.bf16.msra.mxu1 %v11234_v41  ;;  %2180 = vmatpush1.bf16.msra.mxu0 %v11333_v10  ;;  %v11282_v41 = vld [vmem:[%s13237_s10 + $0x98] ss:$36 sps:$4 sm:$0xff]   ;;  %v11336_v10 = vld [vmem:[%s13237_s10 + $0x320] ss:$36 sps:$4 sm:$0xff]  }
 0x15f   : > { %2013 = vmatprep.subr.bf16.mxu1 %v11235_v44  ;;  %2181 = vmatprep.subr.bf16.mxu0 %v11334_v11  ;;  %v11290_v44 = vld [vmem:[%s13237_s10 + $0xe4] ss:$36 sps:$4 sm:$0xff]   ;;  %v11344_v11 = vld [vmem:[%s13237_s10 + $0x36c] ss:$36 sps:$4 sm:$0xff]  }
 0x162   : > { %2014 = vmatpush1.bf16.msra.mxu1 %v11237_v45  ;;  %2182 = vmatpush1.bf16.msra.mxu0 %v11339_v14  ;;  %v11288_v45 = vld [vmem:[%s13237_s10 + $0xe0] ss:$36 sps:$4 sm:$0xff]   ;;  %v11348_v14 = vld [vmem:[%s13237_s10 + $0x3b0] ss:$36 sps:$4 sm:$0xff]  }
 0x163   : > { %2015 = vmatprep.subr.bf16.mxu1 %v11238_v48  ;;  %2183 = vmatprep.subr.bf16.mxu0 %v11340_v15  ;;  %v11296_v48 = vld [vmem:[%s13237_s10 + $0x12c] ss:$36 sps:$4 sm:$0xff]   ;;  %v11356_v15 = vld [vmem:[%s13237_s10 + $0x3fc] ss:$36 sps:$4 sm:$0xff]  }
 0x166   : > { %2016 = vmatpush1.bf16.msra.mxu1 %v11240_v49  ;;  %2184 = vmatpush1.bf16.msra.mxu0 %v11345_v18  ;;  %v11294_v49 = vld [vmem:[%s13237_s10 + $0x128] ss:$36 sps:$4 sm:$0xff]   ;;  %v11360_v18 = vld [vmem:[%s13237_s10 + $0x440] ss:$36 sps:$4 sm:$0xff]  }
 0x167   : > { %2017 = vmatprep.subr.bf16.mxu1 %v11241_v52  ;;  %2185 = vmatprep.subr.bf16.mxu0 %v11346_v19  ;;  %v11302_v52 = vld [vmem:[%s13237_s10 + $0x174] ss:$36 sps:$4 sm:$0xff]   ;;  %v11369_v19 = vld [vmem:[%s13237_s10 + $0x48c] ss:$36 sps:$4 sm:$0xff]  }
 0x16a   : > { %2018 = vmatpush1.bf16.msra.mxu1 %v11243_v53  ;;  %2186 = vmatpush1.bf16.msra.mxu0 %v11351_v23  ;;  %v11300_v53 = vld [vmem:[%s13237_s10 + $0x170] ss:$36 sps:$4 sm:$0xff]  }
 0x16b   : > { %2030 = vmatprep.subr.bf16.mxu1 %v11246_v58  ;;  %2187 = vmatprep.subr.bf16.mxu0 %v11352_v24  ;;  %v11306_v58 = vld [vmem:[%s13237_s10 + $0x1b8] ss:$36 sps:$4 sm:$0xff]   ;;  %v11373_v23 = vld [vmem:[%s13237_s10 + $0x4d0] ss:$36 sps:$4 sm:$0xff]  }
 0x16c   : > { %v11381_v24 = vld [vmem:[%s13237_s10 + $0x51c] ss:$36 sps:$4 sm:$0xff]  }
 0x16d   : > { %2020 = vmatmul.mubr.bf16.vlgmr.msra.gmra.mrb[0].mxu1 %v13345_v60 }
 0x16e   : > { %2031 = vmatpush1.bf16.msra.mxu1 %v11244_v59  ;;  %2062 = vmatprep.mubr.bf16.mxu1 %v12817_v2  ;;  %v11314_v59 = vld [vmem:[%s13237_s10 + $0x204] ss:$36 sps:$4 sm:$0xff]  }
 0x16f   : > { %2032 = vmatprep.subr.bf16.mxu1 %v11249_v62  ;;  %2188 = vmatpush1.bf16.msra.mxu0 %v11357_v29  ;;  %v11400_v62 = vld [vmem:[%s13237_s10 + $0x640] ss:$36 sps:$4 sm:$0xff]   ;;  %v11391_v29 = vld [vmem:[%s13237_s10 + $0x5a8] ss:$36 sps:$4 sm:$0xff]  }
 0x170   : > { %2189 = vmatprep.subr.bf16.mxu0 %v11358_v30  ;;  %v11399_v30 = vld [vmem:[%s13237_s10 + $0x5f4] ss:$36 sps:$4 sm:$0xff]  }
 0x172   : > { %2033 = vmatpush1.bf16.msra.mxu1 %v11247_v0  ;;  %v11320_v0 = vld [vmem:[%s13237_s10 + $0x24c] ss:$36 sps:$4 sm:$0xff]  }
 0x173   : > { %2034 = vmatprep.subr.bf16.mxu1 %v11252_v4  ;;  %2190 = vmatpush1.bf16.msra.mxu0 %v11363_v34  ;;  %v11318_v4 = vld [vmem:[%s13237_s10 + $0x248] ss:$36 sps:$4 sm:$0xff]   ;;  %v11403_v34 = vld [vmem:[%s13237_s10 + $0x638] ss:$36 sps:$4 sm:$0xff]  }
 0x174   : > { %2202 = vmatprep.subr.bf16.mxu0 %v11366_v35  ;;  %v11411_v35 = vld [vmem:[%s13237_s10 + $0x684] ss:$36 sps:$4 sm:$0xff]  }
 0x176   : > { %2035 = vmatpush1.bf16.msra.mxu1 %v11250_v5  ;;  %2192 = vmatmul.mubr.bf16.vlgmr.msra.gmra.mrb[0].mxu0 %v13345_v60  ;;  %v11326_v5 = vld [vmem:[%s13237_s10 + $0x294] ss:$36 sps:$4 sm:$0xff]  }
 0x177   : > { %2036 = vmatprep.subr.bf16.mxu1 %v11255_v8  ;;  %2203 = vmatpush1.bf16.msra.mxu0 %v11364_v38  ;;  %v11330_v8 = vld [vmem:[%s13237_s10 + $0x2d8] ss:$36 sps:$4 sm:$0xff]   ;;  %v11484_v38 = vld [vmem:[%s13237_s10 + $0x260] ss:$36 sps:$4 sm:$0xff]  }
 0x178   : > { %2234 = vmatprep.mubr.bf16.mxu0 %v12817_v2  ;;  %2204 = vmatprep.subr.bf16.mxu0 %v11372_v39  ;;  %v11485_v39 = vld [vmem:[%s13237_s10 + $0x20] ss:$36 sps:$4 sm:$0xff]  }
 0x17a   : > { %2037 = vmatpush1.bf16.msra.mxu1 %v11253_v9  ;;  %v11338_v9 = vld [vmem:[%s13237_s10 + $0x324] ss:$36 sps:$4 sm:$0xff]  }
 0x17b   : > { %2038 = vmatprep.subr.bf16.mxu1 %v11258_v12  ;;  %2205 = vmatpush1.bf16.msra.mxu0 %v11370_v42  ;;  %v11342_v12 = vld [vmem:[%s13237_s10 + $0x368] ss:$36 sps:$4 sm:$0xff]  }
 0x17c   : > { %2206 = vmatprep.subr.bf16.mxu0 %v11378_v43  ;;  %v11417_v42 = vld [vmem:[%s13237_s10 + $0x64] ss:$36 sps:$4 sm:$0xff]  }
 0x17d   : > { %v11488_v43 = vld [vmem:[%s13237_s10 + $0x68] ss:$36 sps:$4 sm:$0xff]  }
 0x17e   : > { %2039 = vmatpush1.bf16.msra.mxu1 %v11256_v13  ;;  %v11350_v13 = vld [vmem:[%s13237_s10 + $0x3b4] ss:$36 sps:$4 sm:$0xff]  }
 0x17f   : > { %2040 = vmatprep.subr.bf16.mxu1 %v11261_v16  ;;  %2207 = vmatpush1.bf16.msra.mxu0 %v11376_v46  ;;  %v11354_v16 = vld [vmem:[%s13237_s10 + $0x3f8] ss:$36 sps:$4 sm:$0xff]   ;;  %v11420_v46 = vld [vmem:[%s13237_s10 + $0xac] ss:$36 sps:$4 sm:$0xff]  }
 0x180   : > { %2208 = vmatprep.subr.bf16.mxu0 %v11384_v47  ;;  %v11491_v47 = vld [vmem:[%s13237_s10 + $0xb0] ss:$36 sps:$4 sm:$0xff]  }
 0x182   : > { %2041 = vmatpush1.bf16.msra.mxu1 %v11259_v17  ;;  %v11362_v17 = vld [vmem:[%s13237_s10 + $0x444] ss:$36 sps:$4 sm:$0xff]  }
 0x183   : > { %2042 = vmatprep.subr.bf16.mxu1 %v11264_v20  ;;  %2209 = vmatpush1.bf16.msra.mxu0 %v11382_v50  ;;  %v11367_v20 = vld [vmem:[%s13237_s10 + $0x488] ss:$36 sps:$4 sm:$0xff]   ;;  %v11423_v50 = vld [vmem:[%s13237_s10 + $0xf4] ss:$36 sps:$4 sm:$0xff]  }
 0x184   : > { %2210 = vmatprep.subr.bf16.mxu0 %v11390_v51  ;;  %v11494_v51 = vld [vmem:[%s13237_s10 + $0xf8] ss:$36 sps:$4 sm:$0xff]  }
 0x186   : > { %2043 = vmatpush1.bf16.msra.mxu1 %v11262_v22  ;;  %v11375_v22 = vld [vmem:[%s13237_s10 + $0x4d4] ss:$36 sps:$4 sm:$0xff]  }
 0x187   : > { %2044 = vmatprep.subr.bf16.mxu1 %v11267_v25  ;;  %2211 = vmatpush1.bf16.msra.mxu0 %v11388_v54  ;;  %v11379_v25 = vld [vmem:[%s13237_s10 + $0x518] ss:$36 sps:$4 sm:$0xff]   ;;  %v11497_v54 = vld [vmem:[%s13237_s10 + $0x140] ss:$36 sps:$4 sm:$0xff]  }
 0x188   : > { %2212 = vmatprep.subr.bf16.mxu0 %v11396_v55  ;;  %v11499_v55 = vld [vmem:[%s13237_s10 + $0x3c8] ss:$36 sps:$4 sm:$0xff]  }
 0x18a   : > { %2045 = vmatpush1.bf16.msra.mxu1 %v11265_v26  ;;  %v11387_v26 = vld [vmem:[%s13237_s10 + $0x564] ss:$36 sps:$4 sm:$0xff]  }
 0x18b   : > { %2073 = vmatprep.subr.bf16.mxu1 %v11272_v31  ;;  %2213 = vmatpush1.bf16.msra.mxu0 %v11394_v57  ;;  %v11397_v31 = vld [vmem:[%s13237_s10 + $0x5f0] ss:$36 sps:$4 sm:$0xff]   ;;  %v11429_v57 = vld [vmem:[%s13237_s10 + $0x184] ss:$36 sps:$4 sm:$0xff]  }
 0x18c   : > { %2214 = vmatprep.subr.bf16.mxu0 %v11402_v61  ;;  %v11427_v61 = vld [vmem:[%s13237_s10 + $0x180] ss:$36 sps:$4 sm:$0xff]  }
 0x18d   : > { %2063 = vmatmul.mubr.bf16.vlgmr.msra.gmra.mrb[0].mxu1 %v13381_v33 }
 0x18e   : > { %2074 = vmatpush1.bf16.msra.mxu1 %v11270_v32  ;;  %2105 = vmatprep.mubr.bf16.mxu1 %v13305_v21  ;;  %v11405_v32 = vld [vmem:[%s13237_s10 + $0x63c] ss:$36 sps:$4 sm:$0xff]  }
 0x18f   : > { %2075 = vmatprep.subr.bf16.mxu1 %v11278_v36  ;;  %2215 = vmatpush1.bf16.msra.mxu0 %v11400_v62  ;;  %v11409_v36 = vld [vmem:[%s13237_s10 + $0x680] ss:$36 sps:$4 sm:$0xff]   ;;  %v11432_v62 = vld [vmem:[%s13237_s10 + $0x1cc] ss:$36 sps:$4 sm:$0xff]  }
 0x190   : > { %2216 = vmatprep.subr.bf16.mxu0 %v11408_v1  ;;  %v11430_v1 = vld [vmem:[%s13237_s10 + $0x1c8] ss:$36 sps:$4 sm:$0xff]  }
 0x192   : > { %2076 = vmatpush1.bf16.msra.mxu1 %v11276_v37  ;;  %v11414_v37 = vld [vmem:[%s13237_s10 + $0x1c] ss:$36 sps:$4 sm:$0xff]  }
 0x193   : > { %2077 = vmatprep.subr.bf16.mxu1 %v11284_v40  ;;  %2217 = vmatpush1.bf16.msra.mxu0 %v11406_v3  ;;  %v11487_v40 = vld [vmem:[%s13237_s10 + $0x2a8] ss:$36 sps:$4 sm:$0xff]   ;;  %v11435_v3 = vld [vmem:[%s13237_s10 + $0x214] ss:$36 sps:$4 sm:$0xff]  }
 0x194   : > { %10516 = vmatprep.subr.bf16.mxu0 %v11484_v38  ;;  %v11483_v38 = vld [vmem:[%s13237_s10 + $0x694] ss:$36 sps:$4 sm:$0xff]  }
 0x196   : > { %2078 = vmatpush1.bf16.msra.mxu1 %v11282_v41  ;;  %2235 = vmatmul.mubr.bf16.vlgmr.msra.gmra.mrb[0].mxu0 %v13381_v33  ;;  %v11412_v41 = vld [vmem:[%s13237_s10 + $0x18] ss:$36 sps:$4 sm:$0xff]  }
 0x197   : > { %2079 = vmatprep.subr.bf16.mxu1 %v11290_v44  ;;  %2363 = vmatprep.mubr.bf16.mxu0 %v13305_v21  ;;  %v11490_v44 = vld [vmem:[%s13237_s10 + $0x2f0] ss:$36 sps:$4 sm:$0xff]  }
 0x198   : > { %10517 = vmatpush3.bf16.msra.mxu0 %v11485_v39  ;;  %v11481_v39 = vld [vmem:[%s13237_s10 + $0x690] ss:$36 sps:$4 sm:$0xff]  }
 0x199   : > { %10518 = vmatprep.subr.bf16.mxu0 %v11487_v40  ;;  %v11486_v40 = vld [vmem:[%s13237_s10 + $0x4a0] ss:$36 sps:$4 sm:$0xff]  }
 0x19a   : > { %2080 = vmatpush1.bf16.msra.mxu1 %v11288_v45  ;;  %v11415_v45 = vld [vmem:[%s13237_s10 + $0x60] ss:$36 sps:$4 sm:$0xff]  }
 0x19b   : > { %2081 = vmatprep.subr.bf16.mxu1 %v11296_v48  ;;  %v11418_v48 = vld [vmem:[%s13237_s10 + $0xa8] ss:$36 sps:$4 sm:$0xff]  }
 0x19c   : > { %10519 = vmatpush3.bf16.msra.mxu0 %v11488_v43  ;;  %v11495_v43 = vld [vmem:[%s13237_s10 + $0x578] ss:$36 sps:$4 sm:$0xff]  }
 0x19d   : > { %10520 = vmatprep.subr.bf16.mxu0 %v11490_v44  ;;  %v11498_v44 = vld [vmem:[%s13237_s10 + $0x5c0] ss:$36 sps:$4 sm:$0xff]  }
 0x19e   : > { %2082 = vmatpush1.bf16.msra.mxu1 %v11294_v49  ;;  %v11493_v49 = vld [vmem:[%s13237_s10 + $0x338] ss:$36 sps:$4 sm:$0xff]  }
 0x19f   : > { %2083 = vmatprep.subr.bf16.mxu1 %v11302_v52  ;;  %v11496_v52 = vld [vmem:[%s13237_s10 + $0x380] ss:$36 sps:$4 sm:$0xff]  }
 0x1a0   : > { %10521 = vmatpush3.bf16.msra.mxu0 %v11491_v47  ;;  %v11504_v47 = vld [vmem:[%s13237_s10 + $0x650] ss:$36 sps:$4 sm:$0xff]  }
 0x1a1   : > { %10522 = vmatprep.subr.bf16.mxu0 %v11493_v49 }
 0x1a2   : > { %2084 = vmatpush1.bf16.msra.mxu1 %v11300_v53  ;;  %v11426_v53 = vld [vmem:[%s13237_s10 + $0x13c] ss:$36 sps:$4 sm:$0xff]  }
 0x1a3   : > { %2085 = vmatprep.subr.bf16.mxu1 %v11308_v56  ;;  %v11424_v56 = vld [vmem:[%s13237_s10 + $0x138] ss:$36 sps:$4 sm:$0xff]  }
 0x1a4   : > { %10523 = vmatpush3.bf16.msra.mxu0 %v11494_v51  ;;  %v11507_v51 = vld [vmem:[%s13237_s10 + $0x698] ss:$36 sps:$4 sm:$0xff]  }
 0x1a5   : > { %10524 = vmatprep.subr.bf16.mxu0 %v11496_v52 }
 0x1a6   : > { %2086 = vmatpush1.bf16.msra.mxu1 %v11306_v58  ;;  %v11500_v58 = vld [vmem:[%s13237_s10 + $0x188] ss:$36 sps:$4 sm:$0xff]  }
 0x1a7   : > { %2087 = vmatprep.subr.bf16.mxu1 %v11314_v59  ;;  %v11502_v59 = vld [vmem:[%s13237_s10 + $0x410] ss:$36 sps:$4 sm:$0xff]  }
 0x1a8   : > { %10525 = vmatpush3.bf16.msra.mxu0 %v11497_v54 }
 0x1a9   : > { %10526 = vmatprep.subr.bf16.mxu0 %v11499_v55 }
 0x1aa   : > { %2088 = vmatpush1.bf16.msra.mxu1 %v11312_v63  ;;  %v11503_v63 = vld [vmem:[%s13237_s10 + $0x1d0] ss:$36 sps:$4 sm:$0xff]  }
 0x1ab   : > { %2089 = vmatprep.subr.bf16.mxu1 %v11320_v0  ;;  %v11505_v0 = vld [vmem:[%s13237_s10 + $0x458] ss:$36 sps:$4 sm:$0xff]  }
 0x1ac   : > { %10527 = vmatpush3.bf16.msra.mxu0 %v11500_v58 }
 0x1ad   : > { %10528 = vmatprep.subr.bf16.mxu0 %v11502_v59 }
 0x1ae   : > { %2090 = vmatpush1.bf16.msra.mxu1 %v11318_v4  ;;  %v11506_v4 = vld [vmem:[%s13237_s10 + $0x218] ss:$36 sps:$4 sm:$0xff]  }
 0x1af   : > { %2091 = vmatprep.subr.bf16.mxu1 %v11326_v5  ;;  %v11433_v5 = vld [vmem:[%s13237_s10 + $0x210] ss:$36 sps:$4 sm:$0xff]  }
 0x1b0   : > { %10529 = vmatpush3.bf16.msra.mxu0 %v11503_v63 }
 0x1b1   : > { %10530 = vmatprep.subr.bf16.mxu0 %v11505_v0 }
 0x1b2   : > { %2092 = vmatpush1.bf16.msra.mxu1 %v11324_v6  ;;  %v11438_v6 = vld [vmem:[%s13237_s10 + $0x25c] ss:$36 sps:$4 sm:$0xff]  }
 0x1b3   : > { %2093 = vmatprep.subr.bf16.mxu1 %v11332_v7  ;;  %v11436_v7 = vld [vmem:[%s13237_s10 + $0x258] ss:$36 sps:$4 sm:$0xff]  }
 0x1b4   : > { %10531 = vmatpush3.bf16.msra.mxu0 %v11506_v4 }
 0x1b6   : > { %2094 = vmatpush1.bf16.msra.mxu1 %v11330_v8  ;;  %v12818_v8 = vmov 0.0  }
 0x1b7   : > { %2095 = vmatprep.subr.bf16.mxu1 %v11338_v9  ;;  %10790 = vmatprep.subr.bf16.mxu0 %v12818_v8  ;;  %v11441_v9 = vld [vmem:[%s13237_s10 + $0x2a4] ss:$36 sps:$4 sm:$0xff]  }
 0x1b8   : > { %2364 = vmatmul.mubr.bf16.vlgmr.msra.gmra.mrb[4].mxu0 %v13345_v60 }
 0x1b9   : > { %10792 = vmatprep.mubr.msk.bf16.mxu0 %vm12819_vm0, %v12818_v8 }
 0x1ba   : > { %2096 = vmatpush1.bf16.msra.mxu1 %v11336_v10  ;;  %v11439_v10 = vld [vmem:[%s13237_s10 + $0x2a0] ss:$36 sps:$4 sm:$0xff]  }
 0x1bb   : > { %2097 = vmatprep.subr.bf16.mxu1 %v11344_v11  ;;  %v11444_v11 = vld [vmem:[%s13237_s10 + $0x2ec] ss:$36 sps:$4 sm:$0xff]  }
 0x1be   : > { %2098 = vmatpush1.bf16.msra.mxu1 %v11342_v12  ;;  %v11442_v12 = vld [vmem:[%s13237_s10 + $0x2e8] ss:$36 sps:$4 sm:$0xff]  }
 0x1bf   : > { %2099 = vmatprep.subr.bf16.mxu1 %v11350_v13  ;;  %v11447_v13 = vld [vmem:[%s13237_s10 + $0x334] ss:$36 sps:$4 sm:$0xff]  }
 0x1c2   : > { %2100 = vmatpush1.bf16.msra.mxu1 %v11348_v14  ;;  %v11445_v14 = vld [vmem:[%s13237_s10 + $0x330] ss:$36 sps:$4 sm:$0xff]  }
 0x1c3   : > { %2101 = vmatprep.subr.bf16.mxu1 %v11356_v15  ;;  %v11450_v15 = vld [vmem:[%s13237_s10 + $0x37c] ss:$36 sps:$4 sm:$0xff]  }
 0x1c6   : > { %2102 = vmatpush1.bf16.msra.mxu1 %v11354_v16  ;;  %v11448_v16 = vld [vmem:[%s13237_s10 + $0x378] ss:$36 sps:$4 sm:$0xff]  }
 0x1c7   : > { %2103 = vmatprep.subr.bf16.mxu1 %v11362_v17  ;;  %v11453_v17 = vld [vmem:[%s13237_s10 + $0x3c4] ss:$36 sps:$4 sm:$0xff]  }
 0x1ca   : > { %2104 = vmatpush1.bf16.msra.mxu1 %v11360_v18  ;;  %v11451_v18 = vld [vmem:[%s13237_s10 + $0x3c0] ss:$36 sps:$4 sm:$0xff]  }
 0x1cb   : > { %2116 = vmatprep.subr.bf16.mxu1 %v11369_v19  ;;  %v11456_v19 = vld [vmem:[%s13237_s10 + $0x40c] ss:$36 sps:$4 sm:$0xff]  }
 0x1cd   : > { %2106 = vmatmul.mubr.bf16.vlgmr.msra.gmra.mrb[4].mxu1 %v13345_v60 }
 0x1ce   : > { %2117 = vmatpush1.bf16.msra.mxu1 %v11367_v20  ;;  %2148 = vmatprep.mubr.bf16.mxu1 %v12817_v2  ;;  %v11454_v20 = vld [vmem:[%s13237_s10 + $0x408] ss:$36 sps:$4 sm:$0xff]  }
 0x1cf   : > { %2118 = vmatprep.subr.bf16.mxu1 %v11375_v22  ;;  %v11459_v22 = vld [vmem:[%s13237_s10 + $0x454] ss:$36 sps:$4 sm:$0xff]  }
 0x1d2   : > { %2119 = vmatpush1.bf16.msra.mxu1 %v11373_v23  ;;  %v11457_v23 = vld [vmem:[%s13237_s10 + $0x450] ss:$36 sps:$4 sm:$0xff]  }
 0x1d3   : > { %2120 = vmatprep.subr.bf16.mxu1 %v11381_v24  ;;  %v11462_v24 = vld [vmem:[%s13237_s10 + $0x49c] ss:$36 sps:$4 sm:$0xff]  }
 0x1d6   : > { %2121 = vmatpush1.bf16.msra.mxu1 %v11379_v25  ;;  %v11460_v25 = vld [vmem:[%s13237_s10 + $0x498] ss:$36 sps:$4 sm:$0xff]  }
 0x1d7   : > { %2122 = vmatprep.subr.bf16.mxu1 %v11387_v26  ;;  %v11465_v26 = vld [vmem:[%s13237_s10 + $0x4e4] ss:$36 sps:$4 sm:$0xff]  }
 0x1da   : > { %2123 = vmatpush1.bf16.msra.mxu1 %v11385_v27  ;;  %v11463_v27 = vld [vmem:[%s13237_s10 + $0x4e0] ss:$36 sps:$4 sm:$0xff]  }
 0x1db   : > { %2124 = vmatprep.subr.bf16.mxu1 %v11393_v28  ;;  %v11468_v28 = vld [vmem:[%s13237_s10 + $0x52c] ss:$36 sps:$4 sm:$0xff]  }
 0x1de   : > { %2125 = vmatpush1.bf16.msra.mxu1 %v11391_v29  ;;  %v11466_v29 = vld [vmem:[%s13237_s10 + $0x528] ss:$36 sps:$4 sm:$0xff]  }
 0x1df   : > { %2126 = vmatprep.subr.bf16.mxu1 %v11399_v30  ;;  %v11471_v30 = vld [vmem:[%s13237_s10 + $0x574] ss:$36 sps:$4 sm:$0xff]  }
 0x1e2   : > { %2127 = vmatpush1.bf16.msra.mxu1 %v11397_v31  ;;  %v11469_v31 = vld [vmem:[%s13237_s10 + $0x570] ss:$36 sps:$4 sm:$0xff]  }
 0x1e3   : > { %2128 = vmatprep.subr.bf16.mxu1 %v11405_v32  ;;  %v11474_v32 = vld [vmem:[%s13237_s10 + $0x5bc] ss:$36 sps:$4 sm:$0xff]  }
 0x1e6   : > { %2129 = vmatpush1.bf16.msra.mxu1 %v11403_v34  ;;  %v11472_v34 = vld [vmem:[%s13237_s10 + $0x5b8] ss:$36 sps:$4 sm:$0xff]  }
 0x1e7   : > { %2130 = vmatprep.subr.bf16.mxu1 %v11411_v35  ;;  %v11475_v35 = vld [vmem:[%s13237_s10 + $0x600] ss:$36 sps:$4 sm:$0xff]  }
 0x1ea   : > { %2131 = vmatpush1.bf16.msra.mxu1 %v11409_v36  ;;  %v11480_v36 = vld [vmem:[%s13237_s10 + $0x64c] ss:$36 sps:$4 sm:$0xff]  }
 0x1eb   : > { %2245 = vmatprep.subr.bf16.mxu1 %v11414_v37  ;;  %v11478_v37 = vld [vmem:[%s13237_s10 + $0x648] ss:$36 sps:$4 sm:$0xff]  }
 0x1ed   : > { %2149 = vmatmul.mubr.bf16.vlgmr.msra.gmra.mrb[4].mxu1 %v13381_v33 }
 0x1ee   : > { %2246 = vmatpush1.bf16.msra.mxu1 %v11412_v41  ;;  %2277 = vmatprep.mubr.bf16.mxu1 %v13305_v21  ;;  %v11421_v21 = vld [vmem:[%s13237_s10 + $0xf0] ss:$36 sps:$4 sm:$0xff]   ;;  %v11489_v41 = vld [vmem:[%s13237_s10 + $0x4e8] ss:$36 sps:$4 sm:$0xff]  }
 0x1ef   : > { %2247 = vmatprep.subr.bf16.mxu1 %v11417_v42  ;;  %v11492_v42 = vld [vmem:[%s13237_s10 + $0x530] ss:$36 sps:$4 sm:$0xff]  }
 0x1f2   : > { %2248 = vmatpush1.bf16.msra.mxu1 %v11415_v45  ;;  %v11501_v45 = vld [vmem:[%s13237_s10 + $0x608] ss:$36 sps:$4 sm:$0xff]  }
 0x1f3   : > { %2249 = vmatprep.subr.bf16.mxu1 %v11420_v46 }
 0x1f6   : > { %2250 = vmatpush1.bf16.msra.mxu1 %v11418_v48 }
 0x1f7   : > { %2251 = vmatprep.subr.bf16.mxu1 %v11423_v50 }
 0x1fa   : > { %2252 = vmatpush1.bf16.msra.mxu1 %v11421_v21 }
 0x1fb   : > { %2253 = vmatprep.subr.bf16.mxu1 %v11426_v53 }
 0x1fe   : > { %2254 = vmatpush1.bf16.msra.mxu1 %v11424_v56 }
 0x1ff   : > { %2255 = vmatprep.subr.bf16.mxu1 %v11429_v57 }
 0x202   : > { %2256 = vmatpush1.bf16.msra.mxu1 %v11427_v61 }
 0x203   : > { %2257 = vmatprep.subr.bf16.mxu1 %v11432_v62 }
 0x206   : > { %2258 = vmatpush1.bf16.msra.mxu1 %v11430_v1 }
 0x207   : > { %2259 = vmatprep.subr.bf16.mxu1 %v11435_v3 }
 0x20a   : > { %2260 = vmatpush1.bf16.msra.mxu1 %v11433_v5 }
 0x20b   : > { %2261 = vmatprep.subr.bf16.mxu1 %v11438_v6 }
 0x20e   : > { %2262 = vmatpush1.bf16.msra.mxu1 %v11436_v7 }
 0x20f   : > { %2263 = vmatprep.subr.bf16.mxu1 %v11441_v9 }
 0x212   : > { %2264 = vmatpush1.bf16.msra.mxu1 %v11439_v10 }
 0x213   : > { %2265 = vmatprep.subr.bf16.mxu1 %v11444_v11 }
 0x216   : > { %2266 = vmatpush1.bf16.msra.mxu1 %v11442_v12 }
 0x217   : > { %2267 = vmatprep.subr.bf16.mxu1 %v11447_v13 }
 0x21a   : > { %2268 = vmatpush1.bf16.msra.mxu1 %v11445_v14 }
 0x21b   : > { %2269 = vmatprep.subr.bf16.mxu1 %v11450_v15 }
 0x21e   : > { %2270 = vmatpush1.bf16.msra.mxu1 %v11448_v16 }
 0x21f   : > { %2271 = vmatprep.subr.bf16.mxu1 %v11453_v17 }
 0x222   : > { %2272 = vmatpush1.bf16.msra.mxu1 %v11451_v18 }
 0x223   : > { %2273 = vmatprep.subr.bf16.mxu1 %v11456_v19 }
 0x226   : > { %2274 = vmatpush1.bf16.msra.mxu1 %v11454_v20 }
 0x227   : > { %2275 = vmatprep.subr.bf16.mxu1 %v11459_v22 }
 0x22a   : > { %2276 = vmatpush1.bf16.msra.mxu1 %v11457_v23 }
 0x22b   : > { %2288 = vmatprep.subr.bf16.mxu1 %v11462_v24 }
 0x22d   : > { %2278 = vmatmul.mubr.bf16.vlgmr.msra.gmra.mrb[8].mxu1 %v13345_v60  ;;  %v11477_v60 = vld [vmem:[%s13237_s10 + $0x604] ss:$36 sps:$4 sm:$0xff]   ;;  %s12822_s10 = smov 64  }
 0x22e   : > { %2289 = vmatpush1.bf16.msra.mxu1 %v11460_v25  ;;  %2320 = vmatprep.mubr.bf16.mxu1 %v12817_v2 }
 0x22f   : > { %2290 = vmatprep.subr.bf16.mxu1 %v11465_v26 }
 0x232   : > { %2291 = vmatpush1.bf16.msra.mxu1 %v11463_v27  ;;  %v2422_v27 = vlaneseq }
 0x233   : > { %2292 = vmatprep.subr.bf16.mxu1 %v11468_v28 }
 0x234   : > { %v13603_v28 = vshrl.u32 %v2422_v27, 7 }
 0x236   : > { %2293 = vmatpush1.bf16.msra.mxu1 %v11466_v29  ;;  %v2425_v29 = vand.u32 127, %v2422_v27 }
 0x237   : > { %2294 = vmatprep.subr.bf16.mxu1 %v11471_v30 }
 0x238   : > { %vm2426_vm3 = vcmp.le.s32.totalorder %v2425_v29, %v13603_v28 }
 0x23a   : > { %2295 = vmatpush1.bf16.msra.mxu1 %v11469_v31  ;;  %v12821_v31 = vmov -1e+30  }
 0x23b   : > { %2296 = vmatprep.subr.bf16.mxu1 %v11474_v32  ;;  %v13606_v32 = vsel %vm2426_vm3, 0.0, %v12821_v31 }
 0x23e   : > { %2297 = vmatpush1.bf16.msra.mxu1 %v11472_v34 }
 0x23f   : > { %2298 = vmatprep.subr.bf16.mxu1 %v11477_v60 }
 0x242   : > { %2299 = vmatpush1.bf16.msra.mxu1 %v11475_v35 }
 0x243   : > { %2300 = vmatprep.subr.bf16.mxu1 %v11480_v36 }
 0x246   : > { %2301 = vmatpush1.bf16.msra.mxu1 %v11478_v37 }
 0x247   : > { %2302 = vmatprep.subr.bf16.mxu1 %v11483_v38 }
 0x24a   : > { %2303 = vmatpush1.bf16.msra.mxu1 %v11481_v39 }
 0x24b   : > { %10770 = vmatprep.subr.bf16.mxu1 %v12818_v8 }
 0x24d   : > { %2321 = vmatmul.mubr.bf16.vlgmr.msra.gmra.mrb[8].mxu1 %v13381_v33 }
 0x24e   : > { %10771 = vmatpush3.bf16.msra.mxu1 %v11486_v40  ;;  %10786 = vmatprep.mubr.msk.bf16.mxu1 %vm12819_vm0, %v12818_v8 }
 0x24f   : > { %10772 = vmatprep.subr.bf16.mxu1 %v12818_v8 }
 0x252   : > { %10773 = vmatpush3.bf16.msra.mxu1 %v11489_v41 }
 0x253   : > { %10774 = vmatprep.subr.bf16.mxu1 %v12818_v8 }
 0x256   : > { %10775 = vmatpush3.bf16.msra.mxu1 %v11492_v42 }
 0x257   : > { %10776 = vmatprep.subr.bf16.mxu1 %v12818_v8 }
 0x25a   : > { %10777 = vmatpush3.bf16.msra.mxu1 %v11495_v43 }
 0x25b   : > { %10778 = vmatprep.subr.bf16.mxu1 %v12818_v8 }
 0x25e   : > { %10779 = vmatpush3.bf16.msra.mxu1 %v11498_v44 }
 0x25f   : > { %10780 = vmatprep.subr.bf16.mxu1 %v12818_v8 }
 0x260   : > { %v2064_v46 = vpop.f32.mrb[0].mxu1 }
 0x261   : > { %v2066_v48 = vpop.f32.mrb[1].mxu1  ;;  %v10498_v1 = vpack.c.bf16 %v2064_v46, %v2064_v46 }
 0x262   : > { %v2068_v49 = vpop.f32.mrb[2].mxu1  ;;  %10781 = vmatpush3.bf16.msra.mxu1 %v11501_v45  ;;  %v13575_v3 = vpack.c.bf16 %v2066_v48, %v2066_v48 }
 0x263   : > { %v13542_v50 = vpop.f32.mrb[3].mxu1  ;;  %10782 = vmatprep.subr.bf16.mxu1 %v12818_v8  ;;  %v10499_v4 = vpack.c.bf16 %v2068_v49, %v2068_v49 }
 0x266   : > { %10783 = vmatpush3.bf16.msra.mxu1 %v11504_v47 }
 0x267   : > { %10784 = vmatprep.subr.bf16.mxu1 %v12818_v8 }
 0x269   : > { %v2236_v52 = vpop.f32.mrb[0].mxu0 }
 0x26a   : > { %10785 = vmatpush3.bf16.msra.mxu1 %v11507_v51  ;;  %v13551_v21 = vpack.c.bf16 %v2236_v52, %v2236_v52  ;;  %v13553_v53 = vpop.f32.mrb[1].mxu0 }
 0x26b   : > { %10796 = vmatprep.subr.bf16.mxu1 %v12818_v8  ;;  %v2240_v54 = vpop.f32.mrb[2].mxu0 }
 0x26c   : > { %2774 = vrot.lane.b32.xlu1 %v13551_v21, %s12820_s2  ;;  %v13559_v56 = vpop.f32.mrb[3].mxu0  ;;  %v13569_v0 = vpack.c.bf16 %v2240_v54, %v2240_v54 }
 0x26d   : > { %10787 = vmatmul.mubr.bf16.vlgmr.msra.gmra.mrb[12].mxu1 %v13381_v33 }
 0x26e   : > { %10798 = vmatprep.mubr.msk.bf16.mxu1 %vm12819_vm0, %v12818_v8 }
 0x28b   : > { %v10532_v5 = vpop.f32.mrb[4].mxu0 }
 0x28c   : > { %v10533_v6 = vpop.f32.mrb[5].mxu0 }
 0x28d   : > { %v10534_v7 = vadd.f32 %v10533_v6, %v10532_v5  ;;  %v10535_v9 = vpop.f32.mrb[6].mxu0 }
 0x28e   : > { %v10536_v10 = vpop.f32.mrb[7].mxu0 }
 0x28f   : > { %v10537_v11 = vadd.f32 %v10536_v10, %v10535_v9 }
 0x2c0   : > { %v13557_v55 = vpop.f32.mrb[4].mxu1 }
 0x2c1   : > { %v2152_v57 = vpop.f32.mrb[5].mxu1 }
 0x2c2   : > { %v13561_v33 = vpack.c.bf16 %v2152_v57, %v2152_v57  ;;  %v13563_v58 = vpop.f32.mrb[6].mxu1 }
 0x2c3   : > { %v2156_v59 = vpop.f32.mrb[7].mxu1 }
 0x2c4   : > { %v2544_v61 = vsel %vm2539_vm1, %v13561_v33, 0  ;;  %v10501_v62 = vpack.c.bf16 %v2156_v59, %v2156_v59 }
 0x2c5   : > { %10791 = vmatpush3.bf16.xpose.msra.mxu0 %v2544_v61 }
 0x2c6   : > { %v2590_v63 = vsel %vm2539_vm1, %v10501_v62, 0  ;;  %2830 = vrot.lane.b32.xlu1 %v10501_v62, %s12820_s2  ;;  %10802 = vmatprep.subr.bf16.mxu0 %v12818_v8 }
 0x2c7   : > { %10797 = vmatpush3.bf16.xpose.msra.mxu1 %v2590_v63 }
 0x2c8   : > { %10808 = vmatprep.subr.bf16.mxu1 %v12818_v8 }
 0x2ca   : > { %2832 = vrot.lane.b32.xlu1 %v13569_v0, %s12820_s2 }
 0x2cc   : > { %10793 = vmatmul.mubr.msk.bf16.vlgmr.msra.gmra.mrb[8].mxu0 %vm2539_vm1, %v10498_v1 }
 0x2cd   : > { %10804 = vmatprep.mubr.msk.bf16.mxu0 %vm12819_vm0, %v12818_v8 }
 0x2ce   : > { %2767 = vrot.lane.b32.xlu1 %v13575_v3, %s12820_s2  ;;  %10799 = vmatmul.mubr.msk.bf16.vlgmr.msra.gmra.mrb[16].mxu1 %vm2539_vm1, %v10499_v4 }
 0x2cf   : > { %10810 = vmatprep.mubr.msk.bf16.mxu1 %vm12819_vm0, %v12818_v8 }
 0x2de   : > { %v2775_v62 = vpop.permute.xlu1 %2774 }
 0x320   : > { %v2322_v12 = vpop.f32.mrb[8].mxu1 }
 0x321   : > { %v13585_v13 = vpack.c.bf16 %v2322_v12, %v2322_v12  ;;  %v13587_v14 = vpop.f32.mrb[9].mxu1 }
 0x322   : > { %v2326_v15 = vpop.f32.mrb[10].mxu1 }
 0x323   : > { %v2666_v16 = vsel %vm2664_vm2, %v13585_v13, 0  ;;  %v13591_v17 = vpack.c.bf16 %v2326_v15, %v2326_v15  ;;  %v13593_v18 = vpop.f32.mrb[11].mxu1 }
 0x324   : > { %10803 = vmatpush3.bf16.msra.mxu0 %v2666_v16 }
 0x325   : > { %v2712_v19 = vsel %vm2664_vm2, %v13591_v17, 0  ;;  %10814 = vmatprep.subr.bf16.mxu0 %v12818_v8 }
 0x326   : > { %10809 = vmatpush3.bf16.msra.mxu1 %v2712_v19 }
 0x327   : > { %10820 = vmatprep.subr.bf16.mxu1 %v12818_v8 }
 0x338   : > { %v2831_v63 = vpop.permute.xlu1 %2830 }
 0x340   : > { %v2406_v20 = vpop.f32.mrb[12].mxu1 }
 0x341   : > { %v13599_v22 = vadd.f32 %v10534_v7, %v2406_v20  ;;  %v10788_v23 = vpop.f32.mrb[13].mxu1 }
 0x342   : > { %v2409_v24 = vpop.f32.mrb[14].mxu1 }
 0x343   : > { %v13601_v25 = vadd.f32 %v10537_v11, %v2409_v24  ;;  %v10789_v26 = vpop.f32.mrb[15].mxu1 }
 0x39f   : > { %v2580_v30 = vpop.f32.mrb[8].mxu0 }
 0x3a0   : > { %v2632_v34 = vmul.f32 0.05103104, %v2580_v30  ;;  %v10794_v60 = vpop.f32.mrb[9].mxu0 }
 0x3a1   : > { %v2583_v35 = vpop.f32.mrb[10].mxu0  ;;  %v2626_v36 = vpop.f32.mrb[16].mxu1 }
 0x3a2   : > { %v2633_v37 = vmul.f32 0.05103104, %v2626_v36  ;;  %v10795_v38 = vpop.f32.mrb[11].mxu0  ;;  %v10800_v39 = vpop.f32.mrb[17].mxu1  ;;  %v2634_v40 = vadd.f32 %v2632_v34, %v13606_v32 }
 0x3a3   : > { %v2629_v41 = vpop.f32.mrb[18].mxu1 }
 0x3a4   : > { %v10801_v42 = vpop.f32.mrb[19].mxu1  ;;  %v2637_v43 = vsel %vm2636_vm4, %v2634_v40, -inf  ;;  %v2635_v44 = vadd.f32 %v2633_v37, %v13606_v32 }
 0x3a5   : > { %2638 = vmax.xlane.f32.xlu0 %v2637_v43 }
 0x3a6   : > { %v2640_v45 = vsel %vm2636_vm4, %v2635_v44, -inf }
 0x3a9   : > { %2641 = vmax.xlane.f32.xlu0 %v2640_v45 }
 0x3bf   : > { %2772 = vrot.lane.b32.xlu0 %v13561_v33, %s12820_s2  ;;  %v13620_v33 = vpack.c.bf16 %v13542_v50, %v13542_v50 }
 0x3c3   : > { %2765 = vrot.lane.b32.xlu0 %v10498_v1, %s12820_s2  ;;  %v2833_v1 = vpop.permute.xlu1 %2832 }
 0x3c4   : > { %v2834_v19 = vsel %vm2769_vm5, %v2831_v63, %v2833_v1  ;;  %v13666_v63 = vpack.c.bf16 %v13553_v53, %v13553_v53  ;;  %v13684_v53 = vpack.c.bf16 %v13563_v58, %v13563_v58 }
 0x3c5   : > { %v2839_v23 = vsel %vm2539_vm1, %v2834_v19, 0 }
 0x3c7   : > { %2824 = vrot.lane.b32.xlu0 %v10499_v4, %s12820_s2  ;;  %v2768_v4 = vpop.permute.xlu1 %2767 }
 0x432   : > { %v2639_v46 = vpop.xlane.xlu0 %2638 }
 0x433   : > { %v2643_v47 = vsub.f32 %v2634_v40, %v2639_v46 }
 0x435   : > { %v2645_v48 = vmul.f32 1.442695, %v2643_v47 }
 0x436   : > { %v2642_v49 = vpop.xlane.xlu0 %2641 }
 0x437   : > { %12420 = vpow2.f32 %v2645_v48  ;;  %v2644_v51 = vsub.f32 %v2635_v44, %v2642_v49 }
 0x439   : > { %v2647_v52 = vmul.f32 1.442695, %v2644_v51 }
 0x43a   : > { %v2773_v7 = vpop.permute.xlu0 %2772 }
 0x43b   : > { %12422 = vpow2.f32 %v2647_v52  ;;  %v2776_v11 = vsel %vm2769_vm5, %v2773_v7, %v2775_v62  ;;  %v13660_v62 = vpack.c.bf16 %v13593_v18, %v13593_v18 }
 0x43c   : > { %v2781_v15 = vsel %vm2539_vm1, %v2776_v11, 0 }
 0x43e   : > { %v2766_v24 = vpop.permute.xlu0 %2765 }
 0x43f   : > { %v2770_v26 = vsel %vm2769_vm5, %v2766_v24, %v2768_v4  ;;  %v11508_v24 = vld [vmem:[%s13244_s22 + $0x90] ss:$12 sps:$4 sm:$0xff]  }
 0x441   : > { %v12421_v54 = vpop.eup %12420 }
 0x442   : > { %v2649_v57 = vsel %vm2636_vm4, %v12421_v54, 0.0  ;;  %v2825_v29 = vpop.permute.xlu0 %2824 }
 0x443   : > { %2650 = vadd.xlane.f32.xlu1 %v2649_v57 }
 0x445   : > { %v12423_v59 = vpop.eup %12422 }
 0x446   : > { %v2652_v61 = vsel %vm2636_vm4, %v12423_v59, 0.0 }
 0x447   : > { %2653 = vadd.xlane.f32.xlu1 %v2652_v61  ;;  %v13652_v61 = vpack.c.bf16 %v13587_v14, %v13587_v14  ;;  %v13672_v14 = vpack.c.bf16 %v13559_v56, %v13559_v56 }
 0x458   : > { %2826 = vrot.lane.b32.xlu1 %v13620_v33, %s12820_s2 }
 0x4d0   : > { %v2651_v5 = vpop.xlane.xlu1 %2650 }
 0x4d1   : > { %12424 = vrcp.f32 %v2651_v5 }
 0x4d4   : > { %v2654_v6 = vpop.xlane.xlu1 %2653 }
 0x4d5   : > { %12426 = vrcp.f32 %v2654_v6 }
 0x4d8   : > { %v2827_v27 = vpop.permute.xlu1 %2826 }
 0x4d9   : > { %v2828_v30 = vsel %vm2769_vm5, %v2825_v29, %v2827_v27 }
 0x4db   : > { %v12425_v9 = vpop.eup %12424 }
 0x4dc   : > { %v2656_v10 = vmul.f32 %v12425_v9, %v12421_v54 }
 0x4de   : > { %v2659_v12 = vpack.c.bf16 %v2656_v10, %v2656_v10 }
 0x4df   : > { %v12427_v50 = vpop.eup %12426 }
 0x4e0   : > { %v2658_v16 = vmul.f32 %v12427_v50, %v12423_v59  ;;  %10805 = vmatmul.mubr.msk.bf16.vlgmr.msra.gmra.mrb[12].mxu0 %vm2636_vm4, %v2659_v12 }
 0x4e1   : > { %10815 = vmatpush3.bf16.xpose.msra.mxu0 %v2781_v15  ;;  %10816 = vmatprep.mubr.msk.bf16.mxu0 %vm12819_vm0, %v12818_v8 }
 0x4e2   : > { %v2660_v20 = vpack.c.bf16 %v2658_v16, %v2658_v16  ;;  %10826 = vmatprep.subr.bf16.mxu0 %v12818_v8 }
 0x4e4   : > { %10811 = vmatmul.mubr.msk.bf16.vlgmr.msra.gmra.mrb[20].mxu1 %vm2636_vm4, %v2660_v20  ;;  %v11510_v20 = vld [vmem:[%s13244_s22 + $0x94] ss:$12 sps:$4 sm:$0xff]  }
 0x4e5   : > { %10821 = vmatpush3.bf16.xpose.msra.mxu1 %v2839_v23  ;;  %10822 = vmatprep.mubr.msk.bf16.mxu1 %vm12819_vm0, %v12818_v8 }
 0x4e6   : > { %10832 = vmatprep.subr.bf16.mxu1 %v12818_v8 }
 0x4e8   : > { %10817 = vmatmul.mubr.msk.bf16.vlgmr.msra.gmra.mrb[16].mxu0 %vm2539_vm1, %v2770_v26  ;;  %v11514_v26 = vld [vmem:[%s13244_s22 + $0xac] ss:$12 sps:$4 sm:$0xff]  }
 0x4e9   : > { %10828 = vmatprep.mubr.msk.bf16.mxu0 %vm12819_vm0, %v12818_v8 }
 0x4ec   : > { %10823 = vmatmul.mubr.msk.bf16.vlgmr.msra.gmra.mrb[24].mxu1 %vm2539_vm1, %v2828_v30  ;;  %v11511_v30 = vld [vmem:[%s13244_s22 + $0x98] ss:$12 sps:$4 sm:$0xff]  }
 0x4ed   : > { %10834 = vmatprep.mubr.msk.bf16.mxu1 %vm12819_vm0, %v12818_v8 }
 0x5b3   : > { %v2702_v31 = vpop.f32.mrb[12].mxu0 }
 0x5b4   : > { %v10806_v34 = vpop.f32.mrb[13].mxu0 }
 0x5b5   : > { %v2705_v60 = vpop.f32.mrb[14].mxu0 }
 0x5b6   : > { %v10807_v35 = vpop.f32.mrb[15].mxu0  ;;  %v11518_v60 = vld [vmem:[%s13244_s22 + $0xc4] ss:$12 sps:$4 sm:$0xff]  }
 0x5b7   : > { %v2748_v36 = vpop.f32.mrb[20].mxu1  ;;  %v11515_v35 = vld [vmem:[%s13244_s22 + $0xb0] ss:$12 sps:$4 sm:$0xff]  }
 0x5b8   : > { %v13644_v37 = vpack.c.bf16 %v2748_v36, %v2702_v31  ;;  %v10812_v38 = vpop.f32.mrb[21].mxu1  ;;  %v11512_v31 = vld [vmem:[%s13244_s22 + $0xa8] ss:$12 sps:$4 sm:$0xff]   ;;  %v11516_v36 = vld [vmem:[%s13244_s22 + $0xc0] ss:$12 sps:$4 sm:$0xff]  }
 0x5b9   : > { %v2751_v39 = vpop.f32.mrb[22].mxu1  ;;  %v11522_v38 = vld [vmem:[%s13244_s22 + $0xdc] ss:$12 sps:$4 sm:$0xff]  }
 0x5ba   : > { %v10813_v40 = vpop.f32.mrb[23].mxu1  ;;  %v11519_v39 = vld [vmem:[%s13244_s22 + $0xc8] ss:$12 sps:$4 sm:$0xff]  }
 0x5bb   : > { %v2817_v41 = vpop.f32.mrb[16].mxu0  ;;  %v11520_v40 = vld [vmem:[%s13244_s22 + $0xd8] ss:$12 sps:$4 sm:$0xff]  }
 0x5bc   : > { %v2881_v42 = vmul.f32 0.05103104, %v2817_v41  ;;  %v10818_v43 = vpop.f32.mrb[17].mxu0  ;;  %v11526_v41 = vld [vmem:[%s13244_s22 + $0xf4] ss:$12 sps:$4 sm:$0xff]  }
 0x5bd   : > { %v2820_v44 = vpop.f32.mrb[18].mxu0  ;;  %v11524_v43 = vld [vmem:[%s13244_s22 + $0xf0] ss:$12 sps:$4 sm:$0xff]  }
 0x5be   : > { %v10819_v45 = vpop.f32.mrb[19].mxu0  ;;  %v2883_v46 = vadd.f32 %v2881_v42, %v13606_v32  ;;  %v11523_v42 = vld [vmem:[%s13244_s22 + $0xe0] ss:$12 sps:$4 sm:$0xff]   ;;  %v11527_v44 = vld [vmem:[%s13244_s22 + $0xf8] ss:$12 sps:$4 sm:$0xff]  }
 0x5bf   : > { %v2875_v47 = vpop.f32.mrb[24].mxu1  ;;  %v11530_v45 = vld [vmem:[%s13244_s22 + $0x10c] ss:$12 sps:$4 sm:$0xff]  }
 0x5c0   : > { %v2882_v48 = vmul.f32 0.05103104, %v2875_v47  ;;  %v10824_v49 = vpop.f32.mrb[25].mxu1  ;;  %v2885_v51 = vsel %vm2636_vm4, %v2883_v46, -inf  ;;  %v11531_v47 = vld [vmem:[%s13244_s22 + $0x110] ss:$12 sps:$4 sm:$0xff]  }
 0x5c1   : > { %2886 = vmax.xlane.f32.xlu0 %v2885_v51  ;;  %v2878_v52 = vpop.f32.mrb[26].mxu1 }
 0x5c2   : > { %v10825_v54 = vpop.f32.mrb[27].mxu1  ;;  %v2884_v57 = vadd.f32 %v2882_v48, %v13606_v32  ;;  %v11534_v48 = vld [vmem:[%s13244_s22 + $0x4] ss:$12 sps:$4 sm:$0xff]  }
 0x5c4   : > { %v2888_v59 = vsel %vm2636_vm4, %v2884_v57, -inf }
 0x5c5   : > { %2889 = vmax.xlane.f32.xlu1 %v2888_v59  ;;  %v11532_v59 = vld [vmem:[%s13244_s22] ss:$12 sps:$4 sm:$0xff]  }
 0x5d6   : > { %2912 = vrot.lane.b32.xlu1 %v13652_v61, %s12820_s2 }
 0x5da   : > { %2962 = vrot.lane.b32.xlu1 %v13591_v17, %s12820_s2  ;;  %v13678_v17 = vpack.c.bf16 %v13557_v55, %v13557_v55 }
 0x5de   : > { %2964 = vrot.lane.b32.xlu1 %v13660_v62, %s12820_s2 }
 0x5e2   : > { %3399 = vrot.lane.b32.xlu1 %v13666_v63, %s12822_s10 }
 0x5e6   : > { %3457 = vrot.lane.b32.xlu1 %v13672_v14, %s12822_s10 }
 0x5ea   : > { %3392 = vrot.lane.b32.xlu1 %v13678_v17, %s12822_s10 }
 0x5ee   : > { %3451 = vrot.lane.b32.xlu1 %v13684_v53, %s12822_s10 }
 0x64e   : > { %v2887_v18 = vpop.xlane.xlu0 %2886 }
 0x64f   : > { %v2891_v56 = vsub.f32 %v2883_v46, %v2887_v18  ;;  %v11528_v46 = vld [vmem:[%s13244_s22 + $0x108] ss:$12 sps:$4 sm:$0xff]  }
 0x650   : > { %v11535_v18 = vld [vmem:[%s13244_s22 + $0x8] ss:$12 sps:$4 sm:$0xff]  }
 0x651   : > { %v2893_v1 = vmul.f32 1.442695, %v2891_v56 }
 0x652   : > { %v2890_v4 = vpop.xlane.xlu1 %2889 }
 0x653   : > { %12428 = vpow2.f32 %v2893_v1  ;;  %v2892_v5 = vsub.f32 %v2884_v57, %v2890_v4  ;;  %v11538_v4 = vld [vmem:[%s13244_s22 + $0x1c] ss:$12 sps:$4 sm:$0xff]  }
 0x655   : > { %v2895_v6 = vmul.f32 1.442695, %v2892_v5 }
 0x656   : > { %v2913_v7 = vpop.permute.xlu1 %2912 }
 0x657   : > { %12430 = vpow2.f32 %v2895_v6 }
 0x65a   : > { %v2963_v55 = vpop.permute.xlu1 %2962 }
 0x65d   : > { %v12429_v9 = vpop.eup %12428 }
 0x65e   : > { %v2965_v10 = vpop.permute.xlu1 %2964  ;;  %v2897_v11 = vsel %vm2636_vm4, %v12429_v9, 0.0 }
 0x65f   : > { %v2966_v58 = vsel %vm2769_vm5, %v2963_v55, %v2965_v10  ;;  %2898 = vadd.xlane.f32.xlu0 %v2897_v11  ;;  %v11539_v55 = vld [vmem:[%s13244_s22 + $0x20] ss:$12 sps:$4 sm:$0xff]   ;;  %v11540_v10 = vld [vmem:[%s13244_s22 + $0x30] ss:$12 sps:$4 sm:$0xff]   ;;  %v11543_v11 = vld [vmem:[%s13244_s22 + $0x38] ss:$12 sps:$4 sm:$0xff]  }
 0x660   : > { %v2971_v12 = vsel %vm2664_vm2, %v2966_v58, 0  ;;  %v11546_v58 = vld [vmem:[%s13244_s22 + $0x4c] ss:$12 sps:$4 sm:$0xff]  }
 0x661   : > { %v12431_v50 = vpop.eup %12430  ;;  %10833 = vmatpush3.bf16.msra.mxu1 %v2971_v12  ;;  %v11544_v12 = vld [vmem:[%s13244_s22 + $0x48] ss:$12 sps:$4 sm:$0xff]  }
 0x662   : > { %v2900_v15 = vsel %vm2636_vm4, %v12431_v50, 0.0  ;;  %10838 = vmatprep.subr.bf16.mxu1 %v12818_v8 }
 0x663   : > { %2901 = vadd.xlane.f32.xlu0 %v2900_v15  ;;  %v11550_v15 = vld [vmem:[%s13244_s22 + $0x64] ss:$12 sps:$4 sm:$0xff]  }
 0x679   : > { %2910 = vrot.lane.b32.xlu0 %v13585_v13, %s12820_s2 }
 0x67d   : > { %3397 = vrot.lane.b32.xlu0 %v13551_v21, %s12822_s10 }
 0x681   : > { %3455 = vrot.lane.b32.xlu0 %v13569_v0, %s12822_s10 }
 0x685   : > { %3390 = vrot.lane.b32.xlu0 %v13575_v3, %s12822_s10 }
 0x689   : > { %3449 = vrot.lane.b32.xlu0 %v13620_v33, %s12822_s10 }
 0x6ec   : > { %v2899_v16 = vpop.xlane.xlu0 %2898 }
 0x6ed   : > { %12432 = vrcp.f32 %v2899_v16  ;;  %v11548_v16 = vld [vmem:[%s13244_s22 + $0x60] ss:$12 sps:$4 sm:$0xff]  }
 0x6f0   : > { %v2902_v19 = vpop.xlane.xlu0 %2901 }
 0x6f1   : > { %12434 = vrcp.f32 %v2902_v19  ;;  %v11551_v19 = vld [vmem:[%s13244_s22 + $0x68] ss:$12 sps:$4 sm:$0xff]  }
 0x6f4   : > { %v2911_v13 = vpop.permute.xlu0 %2910 }
 0x6f5   : > { %v2914_v21 = vsel %vm2769_vm5, %v2911_v13, %v2913_v7  ;;  %v11536_v7 = vld [vmem:[%s13244_s22 + $0x18] ss:$12 sps:$4 sm:$0xff]   ;;  %v11554_v13 = vld [vmem:[%s13244_s22 + $0x7c] ss:$12 sps:$4 sm:$0xff]  }
 0x6f6   : > { %v2919_v23 = vsel %vm2664_vm2, %v2914_v21, 0  ;;  %v3400_v21 = vpop.permute.xlu1 %3399 }
 0x6f7   : > { %v12433_v0 = vpop.eup %12432  ;;  %10827 = vmatpush3.bf16.msra.mxu0 %v2919_v23  ;;  %v11552_v23 = vld [vmem:[%s13244_s22 + $0x78] ss:$12 sps:$4 sm:$0xff]  }
 0x6f8   : > { %v2904_v3 = vmul.f32 %v12433_v0, %v12429_v9  ;;  %3113 = vmatprep.subr.bf16.mxu0 %v11510_v20  ;;  %v11542_v9 = vld [vmem:[%s13244_s22 + $0x34] ss:$12 sps:$4 sm:$0xff]   ;;  %v3398_v20 = vpop.permute.xlu0 %3397 }
 0x6f9   : > { %v11555_v0 = vld [vmem:[%s13244_s22 + $0x80] ss:$12 sps:$4 sm:$0xff]  }
 0x6fa   : > { %v2907_v33 = vpack.c.bf16 %v2904_v3, %v2904_v3 }
 0x6fb   : > { %v12435_v27 = vpop.eup %12434 }
 0x6fc   : > { %v2906_v29 = vmul.f32 %v12435_v27, %v12431_v50  ;;  %10829 = vmatmul.mubr.msk.bf16.vlgmr.msra.gmra.mrb[20].mxu0 %vm2636_vm4, %v2907_v33  ;;  %v11547_v50 = vld [vmem:[%s13244_s22 + $0x50] ss:$12 sps:$4 sm:$0xff]   ;;  %v3456_v3 = vpop.permute.xlu0 %3455  ;;  %v3401_v33 = vsel %vm3394_vm6, %v3398_v20, %v3400_v21 }
 0x6fd   : > { %3114 = vmatpush1.bf16.msra.mxu0 %v11508_v24  ;;  %3145 = vmatprep.mubr.bf16.mxu0 %v12817_v2  ;;  %v3458_v24 = vpop.permute.xlu1 %3457 }
 0x6fe   : > { %v2908_v34 = vpack.c.bf16 %v2906_v29, %v2906_v29  ;;  %3115 = vmatprep.subr.bf16.mxu0 %v11514_v26  ;;  %v3459_v26 = vsel %vm3394_vm6, %v3456_v3, %v3458_v24 }
 0x700   : > { %10835 = vmatmul.mubr.msk.bf16.vlgmr.msra.gmra.mrb[28].mxu1 %vm2636_vm4, %v2908_v34  ;;  %v3391_v27 = vpop.permute.xlu0 %3390 }
 0x701   : > { %10839 = vmatpush3.bf16.msra.mxu1 %v11511_v30  ;;  %3116 = vmatpush1.bf16.msra.mxu0 %v11512_v31  ;;  %v3393_v29 = vpop.permute.xlu1 %3392  ;;  %v3406_v30 = vsel %vm2539_vm1, %v3401_v33, 0  ;;  %v3464_v31 = vsel %vm2539_vm1, %v3459_v26, 0  ;;  %v11556_v33 = vld [vmem:[%s13244_s22 + $0x120] ss:$12 sps:$4 sm:$0xff]   ;;  %v11562_v26 = vld [vmem:[%s13244_s22 + $0x13c] ss:$12 sps:$4 sm:$0xff]  }
 0x702   : > { %10840 = vmatprep.subr.bf16.mxu1 %v12818_v8  ;;  %3117 = vmatprep.subr.bf16.mxu0 %v11518_v60  ;;  %v3395_v60 = vsel %vm3394_vm6, %v3391_v27, %v3393_v29 }
 0x703   : > { %10850 = vmatprep.mubr.msk.bf16.mxu1 %vm12819_vm0, %v12818_v8 }
 0x705   : > { %10841 = vmatpush3.bf16.msra.mxu1 %v11515_v35  ;;  %3118 = vmatpush1.bf16.msra.mxu0 %v11516_v36  ;;  %v3452_v34 = vpop.permute.xlu1 %3451 }
 0x706   : > { %10842 = vmatprep.subr.bf16.mxu1 %v12818_v8  ;;  %3119 = vmatprep.subr.bf16.mxu0 %v11522_v38 }
 0x709   : > { %10843 = vmatpush3.bf16.msra.mxu1 %v11519_v39  ;;  %3120 = vmatpush1.bf16.msra.mxu0 %v11520_v40 }
 0x70a   : > { %10844 = vmatprep.subr.bf16.mxu1 %v12818_v8  ;;  %3121 = vmatprep.subr.bf16.mxu0 %v11526_v41 }
 0x70d   : > { %10845 = vmatpush3.bf16.msra.mxu1 %v11523_v42  ;;  %3122 = vmatpush1.bf16.msra.mxu0 %v11524_v43 }
 0x70e   : > { %10846 = vmatprep.subr.bf16.mxu1 %v12818_v8  ;;  %3123 = vmatprep.subr.bf16.mxu0 %v11530_v45 }
 0x711   : > { %10847 = vmatpush3.bf16.msra.mxu1 %v11527_v44  ;;  %3124 = vmatpush1.bf16.msra.mxu0 %v11528_v46 }
 0x712   : > { %10848 = vmatprep.subr.bf16.mxu1 %v12818_v8  ;;  %3296 = vmatprep.subr.bf16.mxu0 %v11534_v48 }
 0x715   : > { %10849 = vmatpush3.bf16.msra.mxu1 %v11531_v47 }
 0x716   : > { %10854 = vmatprep.subr.bf16.mxu1 %v12818_v8 }
 0x7cf   : > { %v2955_v49 = vpop.f32.mrb[20].mxu0 }
 0x7d0   : > { %v10830_v51 = vpop.f32.mrb[21].mxu0 }
 0x7d1   : > { %v2958_v52 = vpop.f32.mrb[22].mxu0 }
 0x7d2   : > { %v10831_v54 = vpop.f32.mrb[23].mxu0 }
 0x7d3   : > { %v3007_v57 = vpop.f32.mrb[28].mxu1 }
 0x7d4   : > { %v3013_v56 = vpack.c.bf16 %v3007_v57, %v2955_v49  ;;  %v10836_v1 = vpop.f32.mrb[29].mxu1 }
 0x7d5   : > { %v3010_v5 = vpop.f32.mrb[30].mxu1 }
 0x7d6   : > { %v10837_v6 = vpop.f32.mrb[31].mxu1  ;;  %9818 = vmatmul.mubr.msk.bf16.vlgmr.msra.gmra.mrb[24].mxu0 %vm2539_vm1, %v3013_v56  ;;  %10851 = vmatmul.mubr.msk.bf16.vlgmr.msra.gmra.mrb[32].mxu1 %vm2539_vm1, %v3013_v56 }
 0x7d7   : > { %3297 = vmatpush1.bf16.msra.mxu0 %v11532_v59  ;;  %10855 = vmatpush3.bf16.msra.mxu1 %v11535_v18 }
 0x7d8   : > { %3298 = vmatprep.subr.bf16.mxu0 %v11538_v4  ;;  %10856 = vmatprep.subr.bf16.mxu1 %v12818_v8 }
 0x7d9   : > { %3328 = vmatprep.mubr.bf16.mxu0 %v12817_v2  ;;  %10866 = vmatprep.mubr.msk.bf16.mxu1 %vm12819_vm0, %v12818_v8 }
 0x7db   : > { %3299 = vmatpush1.bf16.msra.mxu0 %v11536_v7  ;;  %10857 = vmatpush3.bf16.msra.mxu1 %v11539_v55  ;;  %v13796_v7 = vpack.c.bf16 %v13599_v22, %v13599_v22  ;;  %v13804_v55 = vpack.c.bf16 %v13601_v25, %v13601_v25 }
 0x7dc   : > { %3300 = vmatprep.subr.bf16.mxu0 %v11542_v9  ;;  %10858 = vmatprep.subr.bf16.mxu1 %v12818_v8 }
 0x7df   : > { %3301 = vmatpush1.bf16.msra.mxu0 %v11540_v10  ;;  %10859 = vmatpush3.bf16.msra.mxu1 %v11543_v11 }
 0x7e0   : > { %3302 = vmatprep.subr.bf16.mxu0 %v11546_v58  ;;  %10860 = vmatprep.subr.bf16.mxu1 %v12818_v8 }
 0x7e3   : > { %3303 = vmatpush1.bf16.msra.mxu0 %v11544_v12  ;;  %10861 = vmatpush3.bf16.msra.mxu1 %v11547_v50 }
 0x7e4   : > { %3304 = vmatprep.subr.bf16.mxu0 %v11550_v15  ;;  %10862 = vmatprep.subr.bf16.mxu1 %v12818_v8 }
 0x7e7   : > { %3305 = vmatpush1.bf16.msra.mxu0 %v11548_v16  ;;  %10863 = vmatpush3.bf16.msra.mxu1 %v11551_v19 }
 0x7e8   : > { %3306 = vmatprep.subr.bf16.mxu0 %v11554_v13  ;;  %10864 = vmatprep.subr.bf16.mxu1 %v12818_v8 }
 0x7eb   : > { %3307 = vmatpush1.bf16.msra.mxu0 %v11552_v23  ;;  %10865 = vmatpush3.bf16.msra.mxu1 %v11555_v0  ;;  %v11558_v0 = vld [vmem:[%s13244_s22 + $0x124] ss:$12 sps:$4 sm:$0xff]  }
 0x7ec   : > { %10870 = vmatprep.subr.bf16.mxu0 %v12818_v8  ;;  %10876 = vmatprep.subr.bf16.mxu1 %v12818_v8 }
 0x7ee   : > { %9838 = vmatmul.mubr.msk.bf16.vlgmr.msra.gmra.mrb[24].mxu0 %vm2539_vm1, %v13644_v37  ;;  %10867 = vmatmul.mubr.msk.bf16.vlgmr.msra.gmra.mrb[36].mxu1 %vm2539_vm1, %v13644_v37  ;;  %v3450_v37 = vpop.permute.xlu0 %3449 }
 0x7ef   : > { %10872 = vmatprep.mubr.msk.bf16.mxu0 %vm12819_vm0, %v12818_v8  ;;  %10878 = vmatprep.mubr.msk.bf16.mxu1 %vm12819_vm0, %v12818_v8  ;;  %v3453_v35 = vsel %vm3394_vm6, %v3450_v37, %v3452_v34  ;;  %v11566_v34 = vld [vmem:[%s13244_s22 + $0x154] ss:$12 sps:$4 sm:$0xff]  }
 0x7f4   : > { %10871 = vmatpush3.bf16.xpose.msra.mxu0 %v3406_v30  ;;  %10877 = vmatpush3.bf16.xpose.msra.mxu1 %v3464_v31  ;;  %v11559_v30 = vld [vmem:[%s13244_s22 + $0x128] ss:$12 sps:$4 sm:$0xff]   ;;  %v11560_v31 = vld [vmem:[%s13244_s22 + $0x138] ss:$12 sps:$4 sm:$0xff]  }
 0x7f5   : > { %10888 = vmatprep.subr.bf16.mxu1 %v12818_v8  ;;  %10882 = vmatprep.subr.bf16.mxu0 %v12818_v8 }
 0x7fb   : > { %10873 = vmatmul.mubr.msk.bf16.vlgmr.msra.gmra.mrb[28].mxu0 %vm2539_vm1, %v3395_v60  ;;  %10879 = vmatmul.mubr.msk.bf16.vlgmr.msra.gmra.mrb[40].mxu1 %vm2539_vm1, %v3453_v35  ;;  %v11563_v60 = vld [vmem:[%s13244_s22 + $0x140] ss:$12 sps:$4 sm:$0xff]   ;;  %v11564_v35 = vld [vmem:[%s13244_s22 + $0x150] ss:$12 sps:$4 sm:$0xff]  }
 0x7fc   : > { %10884 = vmatprep.mubr.msk.bf16.mxu0 %vm12819_vm0, %v12818_v8  ;;  %10890 = vmatprep.mubr.msk.bf16.mxu1 %vm12819_vm0, %v12818_v8 }
 0x8a9   : > { %v3190_v36 = vpop.f32.mrb[32].mxu1 }
 0x8aa   : > { %v10852_v38 = vpop.f32.mrb[33].mxu1 }
 0x8ab   : > { %v3193_v39 = vpop.f32.mrb[34].mxu1  ;;  %v11567_v38 = vld [vmem:[%s13244_s22 + $0x158] ss:$12 sps:$4 sm:$0xff]  }
 0x8ac   : > { %v10853_v40 = vpop.f32.mrb[35].mxu1 }
 0x8ad   : > { %v11574_v40 = vld [vmem:[%s13244_s22 + $0x184] ss:$12 sps:$4 sm:$0xff]  }
 0x8c1   : > { %v3373_v41 = vpop.f32.mrb[36].mxu1 }
 0x8c2   : > { %v13786_v42 = vadd.f32 %v3373_v41, %v3190_v36  ;;  %v10868_v43 = vpop.f32.mrb[37].mxu1  ;;  %v11570_v36 = vld [vmem:[%s13244_s22 + $0x16c] ss:$12 sps:$4 sm:$0xff]   ;;  %v11571_v41 = vld [vmem:[%s13244_s22 + $0x170] ss:$12 sps:$4 sm:$0xff]  }
 0x8c3   : > { %v3376_v44 = vpop.f32.mrb[38].mxu1  ;;  %v11572_v43 = vld [vmem:[%s13244_s22 + $0x180] ss:$12 sps:$4 sm:$0xff]  }
 0x8c4   : > { %v13788_v45 = vadd.f32 %v3376_v44, %v3193_v39  ;;  %v10869_v46 = vpop.f32.mrb[39].mxu1  ;;  %v11568_v39 = vld [vmem:[%s13244_s22 + $0x168] ss:$12 sps:$4 sm:$0xff]  }
 0x8c5   : > { %v11578_v44 = vld [vmem:[%s13244_s22 + $0x19c] ss:$12 sps:$4 sm:$0xff]  }
 0x8c6   : > { %v11575_v46 = vld [vmem:[%s13244_s22 + $0x188] ss:$12 sps:$4 sm:$0xff]  }
 0x8ce   : > { %v3442_v47 = vpop.f32.mrb[28].mxu0  ;;  %v3500_v48 = vpop.f32.mrb[40].mxu1 }
 0x8cf   : > { %v3506_v49 = vmul.f32 0.05103104, %v3442_v47  ;;  %v3507_v51 = vmul.f32 0.05103104, %v3500_v48  ;;  %v10874_v52 = vpop.f32.mrb[29].mxu0  ;;  %v10880_v54 = vpop.f32.mrb[41].mxu1 }
 0x8d0   : > { %v3445_v57 = vpop.f32.mrb[30].mxu0  ;;  %v3503_v59 = vpop.f32.mrb[42].mxu1  ;;  %v11576_v47 = vld [vmem:[%s13244_s22 + $0x198] ss:$12 sps:$4 sm:$0xff]   ;;  %v11579_v48 = vld [vmem:[%s13244_s22 + $0x1a0] ss:$12 sps:$4 sm:$0xff]  }
 0x8d1   : > { %v10875_v18 = vpop.f32.mrb[31].mxu0  ;;  %v10881_v56 = vpop.f32.mrb[43].mxu1  ;;  %v3508_v1 = vadd.f32 %v3506_v49, %v13606_v32  ;;  %v3509_v4 = vadd.f32 %v3507_v51, %v13606_v32 }
 0x8d3   : > { %v3510_v5 = vsel %vm2636_vm4, %v3508_v1, -inf  ;;  %v3513_v6 = vsel %vm2636_vm4, %v3509_v4, -inf }
 0x8d4   : > { %3511 = vmax.xlane.f32.xlu0 %v3510_v5  ;;  %3514 = vmax.xlane.f32.xlu1 %v3513_v6 }
 0x8e5   : > { %3537 = vrot.lane.b32.xlu1 %v13796_v7, %s12822_s10 }
 0x8e9   : > { %3587 = vrot.lane.b32.xlu1 %v13660_v62, %s12822_s10 }
 0x8ed   : > { %3589 = vrot.lane.b32.xlu1 %v13804_v55, %s12822_s10 }
 0x8f1   : > { %3880 = vrot.lane.b32.xlu1 %v13672_v14, %s12823_s28 }
 0x8f5   : > { %3878 = vrot.lane.b32.xlu1 %v13684_v53, %s12823_s28 }
 0x961   : > { %v3512_v22 = vpop.xlane.xlu0 %3511  ;;  %v3515_v9 = vpop.xlane.xlu1 %3514 }
 0x962   : > { %v3516_v10 = vsub.f32 %v3508_v1, %v3512_v22  ;;  %v3517_v11 = vsub.f32 %v3509_v4, %v3515_v9 }
 0x964   : > { %v3518_v58 = vmul.f32 1.442695, %v3516_v10  ;;  %v3520_v62 = vmul.f32 1.442695, %v3517_v11 }
 0x965   : > { %v3538_v12 = vpop.permute.xlu1 %3537 }
 0x966   : > { %12436 = vpow2.f32 %v3518_v58 }
 0x967   : > { %12438 = vpow2.f32 %v3520_v62 }
 0x969   : > { %v3588_v25 = vpop.permute.xlu1 %3587 }
 0x96d   : > { %v3590_v50 = vpop.permute.xlu1 %3589 }
 0x96e   : > { %v3591_v15 = vsel %vm3394_vm6, %v3588_v25, %v3590_v50 }
 0x96f   : > { %v3596_v16 = vsel %vm2664_vm2, %v3591_v15, 0 }
 0x970   : > { %v12437_v19 = vpop.eup %12436  ;;  %10889 = vmatpush3.bf16.msra.mxu1 %v3596_v16 }
 0x971   : > { %v3522_v14 = vsel %vm2636_vm4, %v12437_v19, 0.0  ;;  %10894 = vmatprep.subr.bf16.mxu1 %v12818_v8  ;;  %v12439_v53 = vpop.eup %12438  ;;  %v3881_v54 = vpop.permute.xlu1 %3880 }
 0x972   : > { %3523 = vadd.xlane.f32.xlu0 %v3522_v14  ;;  %v3525_v13 = vsel %vm2636_vm4, %v12439_v53, 0.0  ;;  %v3886_v5 = vsel %vm2539_vm1, %v3881_v54, 0  ;;  %v11588_v54 = vld [vmem:[%s13244_s22 + $0x1e0] ss:$12 sps:$4 sm:$0xff]  }
 0x975   : > { %v3879_v9 = vpop.permute.xlu1 %3878 }
 0x976   : > { %3526 = vadd.xlane.f32.xlu0 %v3525_v13 }
 0x98c   : > { %3535 = vrot.lane.b32.xlu0 %v13652_v61, %s12822_s10 }
 0x990   : > { %3830 = vrot.lane.b32.xlu0 %v13666_v63, %s12823_s28 }
 0x994   : > { %3828 = vrot.lane.b32.xlu0 %v13678_v17, %s12823_s28 }
 0x9ff   : > { %v3524_v20 = vpop.xlane.xlu0 %3523 }
 0xa00   : > { %12440 = vrcp.f32 %v3524_v20 }
 0xa03   : > { %v3527_v21 = vpop.xlane.xlu0 %3526 }
 0xa04   : > { %12442 = vrcp.f32 %v3527_v21 }
 0xa07   : > { %v3536_v23 = vpop.permute.xlu0 %3535 }
 0xa08   : > { %v3539_v3 = vsel %vm3394_vm6, %v3536_v23, %v3538_v12 }
 0xa09   : > { %v3544_v24 = vsel %vm2664_vm2, %v3539_v3, 0 }
 0xa0a   : > { %v12441_v61 = vpop.eup %12440  ;;  %10883 = vmatpush3.bf16.msra.mxu0 %v3544_v24 }
 0xa0b   : > { %v3529_v63 = vmul.f32 %v12441_v61, %v12437_v19  ;;  %3738 = vmatprep.subr.bf16.mxu0 %v11558_v0  ;;  %v3831_v59 = vpop.permute.xlu0 %3830 }
 0xa0c   : > { %v3836_v6 = vsel %vm2539_vm1, %v3831_v59, 0  ;;  %v11591_v59 = vld [vmem:[%s13244_s22 + $0x1e8] ss:$12 sps:$4 sm:$0xff]  }
 0xa0d   : > { %v3532_v17 = vpack.c.bf16 %v3529_v63, %v3529_v63 }
 0xa0e   : > { %v12443_v27 = vpop.eup %12442 }
 0xa0f   : > { %v3531_v29 = vmul.f32 %v12443_v27, %v12439_v53  ;;  %10885 = vmatmul.mubr.msk.bf16.vlgmr.msra.gmra.mrb[32].mxu0 %vm2636_vm4, %v3532_v17  ;;  %v3829_v10 = vpop.permute.xlu0 %3828 }
 0xa10   : > { %3739 = vmatpush1.bf16.msra.mxu0 %v11556_v33  ;;  %3770 = vmatprep.mubr.bf16.mxu0 %v12817_v2 }
 0xa11   : > { %v3533_v37 = vpack.c.bf16 %v3531_v29, %v3531_v29  ;;  %3740 = vmatprep.subr.bf16.mxu0 %v11562_v26 }
 0xa13   : > { %10891 = vmatmul.mubr.msk.bf16.vlgmr.msra.gmra.mrb[44].mxu1 %vm2636_vm4, %v3533_v37 }
 0xa14   : > { %10895 = vmatpush3.bf16.msra.mxu1 %v11559_v30  ;;  %3741 = vmatpush1.bf16.msra.mxu0 %v11560_v31 }
 0xa15   : > { %10896 = vmatprep.subr.bf16.mxu1 %v12818_v8  ;;  %3742 = vmatprep.subr.bf16.mxu0 %v11566_v34 }
 0xa16   : > { %10906 = vmatprep.mubr.msk.bf16.mxu1 %vm12819_vm0, %v12818_v8 }
 0xa18   : > { %10897 = vmatpush3.bf16.msra.mxu1 %v11563_v60  ;;  %3743 = vmatpush1.bf16.msra.mxu0 %v11564_v35  ;;  %v11582_v35 = vld [vmem:[%s13244_s22 + $0x1b4] ss:$12 sps:$4 sm:$0xff]  }
 0xa19   : > { %10898 = vmatprep.subr.bf16.mxu1 %v12818_v8  ;;  %3744 = vmatprep.subr.bf16.mxu0 %v11570_v36 }
 0xa1c   : > { %10899 = vmatpush3.bf16.msra.mxu1 %v11567_v38  ;;  %3745 = vmatpush1.bf16.msra.mxu0 %v11568_v39 }
 0xa1d   : > { %10900 = vmatprep.subr.bf16.mxu1 %v12818_v8  ;;  %3746 = vmatprep.subr.bf16.mxu0 %v11574_v40 }
 0xa20   : > { %10901 = vmatpush3.bf16.msra.mxu1 %v11571_v41  ;;  %3747 = vmatpush1.bf16.msra.mxu0 %v11572_v43  ;;  %v11580_v41 = vld [vmem:[%s13244_s22 + $0x1b0] ss:$12 sps:$4 sm:$0xff]  }
 0xa21   : > { %10902 = vmatprep.subr.bf16.mxu1 %v12818_v8  ;;  %3748 = vmatprep.subr.bf16.mxu0 %v11578_v44 }
 0xa24   : > { %10903 = vmatpush3.bf16.msra.mxu1 %v11575_v46  ;;  %3749 = vmatpush1.bf16.msra.mxu0 %v11576_v47  ;;  %v11583_v47 = vld [vmem:[%s13244_s22 + $0x1b8] ss:$12 sps:$4 sm:$0xff]  }
 0xa25   : > { %10904 = vmatprep.subr.bf16.mxu1 %v12818_v8  ;;  %10910 = vmatprep.subr.bf16.mxu0 %v12818_v8 }
 0xa28   : > { %10905 = vmatpush3.bf16.msra.mxu1 %v11579_v48  ;;  %v11584_v48 = vld [vmem:[%s13244_s22 + $0x1c8] ss:$12 sps:$4 sm:$0xff]  }
 0xa29   : > { %10916 = vmatprep.subr.bf16.mxu1 %v12818_v8 }
 0xae2   : > { %v3580_v49 = vpop.f32.mrb[32].mxu0 }
 0xae3   : > { %v10886_v51 = vpop.f32.mrb[33].mxu0 }
 0xae4   : > { %v3583_v52 = vpop.f32.mrb[34].mxu0  ;;  %v11590_v51 = vld [vmem:[%s13244_s22 + $0x1e4] ss:$12 sps:$4 sm:$0xff]  }
 0xae5   : > { %v10887_v57 = vpop.f32.mrb[35].mxu0  ;;  %v11587_v52 = vld [vmem:[%s13244_s22 + $0x1d0] ss:$12 sps:$4 sm:$0xff]  }
 0xae6   : > { %v3632_v18 = vpop.f32.mrb[44].mxu1  ;;  %v11594_v57 = vld [vmem:[%s13244_s22 + $0x1fc] ss:$12 sps:$4 sm:$0xff]  }
 0xae7   : > { %v3638_v56 = vpack.c.bf16 %v3632_v18, %v3580_v49  ;;  %v10892_v1 = vpop.f32.mrb[45].mxu1  ;;  %v11592_v18 = vld [vmem:[%s13244_s22 + $0x1f8] ss:$12 sps:$4 sm:$0xff]  }
 0xae8   : > { %v3635_v4 = vpop.f32.mrb[46].mxu1  ;;  %v11595_v1 = vld [vmem:[%s13244_s22 + $0x200] ss:$12 sps:$4 sm:$0xff]  }
 0xae9   : > { %v10893_v22 = vpop.f32.mrb[47].mxu1  ;;  %9868 = vmatmul.mubr.msk.bf16.vlgmr.msra.gmra.mrb[24].mxu0 %vm2539_vm1, %v3638_v56  ;;  %10907 = vmatmul.mubr.msk.bf16.vlgmr.msra.gmra.mrb[48].mxu1 %vm2539_vm1, %v3638_v56  ;;  %v11598_v56 = vld [vmem:[%s13244_s22 + $0x214] ss:$12 sps:$4 sm:$0xff]   ;;  %v11596_v4 = vld [vmem:[%s13244_s22 + $0x210] ss:$12 sps:$4 sm:$0xff]  }
 0xaea   : > { %10911 = vmatpush3.bf16.xpose.msra.mxu0 %v3836_v6  ;;  %10917 = vmatpush3.bf16.xpose.msra.mxu1 %v3886_v5  ;;  %v11599_v5 = vld [vmem:[%s13244_s22 + $0x218] ss:$12 sps:$4 sm:$0xff]   ;;  %v11600_v22 = vld [vmem:[%s13244_s22 + $0x228] ss:$12 sps:$4 sm:$0xff]  }
 0xaeb   : > { %10912 = vmatprep.mubr.msk.bf16.mxu0 %vm12819_vm0, %v12818_v8  ;;  %10918 = vmatprep.mubr.msk.bf16.mxu1 %vm12819_vm0, %v12818_v8  ;;  %v11602_v6 = vld [vmem:[%s13244_s22 + $0x22c] ss:$12 sps:$4 sm:$0xff]  }
 0xaec   : > { %10928 = vmatprep.subr.bf16.mxu1 %v12818_v8  ;;  %10922 = vmatprep.subr.bf16.mxu0 %v12818_v8 }
 0xaf1   : > { %10913 = vmatmul.mubr.msk.bf16.vlgmr.msra.gmra.mrb[36].mxu0 %vm2539_vm1, %v3829_v10  ;;  %10919 = vmatmul.mubr.msk.bf16.vlgmr.msra.gmra.mrb[52].mxu1 %vm2539_vm1, %v3879_v9  ;;  %v11603_v9 = vld [vmem:[%s13244_s22 + $0x230] ss:$12 sps:$4 sm:$0xff]  }
 0xaf2   : > { %10924 = vmatprep.mubr.msk.bf16.mxu0 %vm12819_vm0, %v12818_v8  ;;  %10930 = vmatprep.mubr.msk.bf16.mxu1 %vm12819_vm0, %v12818_v8  ;;  %v11606_v10 = vld [vmem:[%s13252_s12 + $0x4] ss:$48 sps:$4 sm:$0xff]  }
 0xbbc   : > { %v3815_v11 = vpop.f32.mrb[48].mxu1 }
 0xbbd   : > { %v13872_v58 = vadd.f32 %v3815_v11, %v13786_v42  ;;  %v10908_v62 = vpop.f32.mrb[49].mxu1  ;;  %v11609_v11 = vld [vmem:[%s13252_s12 + $0xc] ss:$48 sps:$4 sm:$0xff]  }
 0xbbe   : > { %v3818_v12 = vpop.f32.mrb[50].mxu1 }
 0xbbf   : > { %v13875_v25 = vadd.f32 %v3818_v12, %v13788_v45  ;;  %v10909_v50 = vpop.f32.mrb[51].mxu1 }
 0xbc4   : > { %v3872_v15 = vpop.f32.mrb[36].mxu0  ;;  %v3922_v16 = vpop.f32.mrb[52].mxu1 }
 0xbc5   : > { %v3928_v19 = vmul.f32 0.05103104, %v3872_v15  ;;  %v3929_v14 = vmul.f32 0.05103104, %v3922_v16  ;;  %v10914_v53 = vpop.f32.mrb[37].mxu0  ;;  %v10920_v13 = vpop.f32.mrb[53].mxu1 }
 0xbc6   : > { %v3875_v20 = vpop.f32.mrb[38].mxu0  ;;  %v3925_v21 = vpop.f32.mrb[54].mxu1  ;;  %v11612_v13 = vld [vmem:[%s13252_s12 + $0x64] ss:$48 sps:$4 sm:$0xff]  }
 0xbc7   : > { %v10915_v23 = vpop.f32.mrb[39].mxu0  ;;  %v10921_v0 = vpop.f32.mrb[55].mxu1  ;;  %v3930_v3 = vadd.f32 %v3928_v19, %v13606_v32  ;;  %v3931_v42 = vadd.f32 %v3929_v14, %v13606_v32  ;;  %v11607_v19 = vld [vmem:[%s13252_s12 + $0x8] ss:$48 sps:$4 sm:$0xff]   ;;  %v11615_v20 = vld [vmem:[%s13252_s12 + $0x6c] ss:$48 sps:$4 sm:$0xff]  }
 0xbc8   : > { %v11610_v0 = vld [vmem:[%s13252_s12 + $0x60] ss:$48 sps:$4 sm:$0xff]  }
 0xbc9   : > { %v3932_v24 = vsel %vm2636_vm4, %v3930_v3, -inf  ;;  %v3935_v45 = vsel %vm2636_vm4, %v3931_v42, -inf }
 0xbca   : > { %3933 = vmax.xlane.f32.xlu0 %v3932_v24  ;;  %3936 = vmax.xlane.f32.xlu1 %v3935_v45  ;;  %v11621_v24 = vld [vmem:[%s13252_s12 + $0xcc] ss:$48 sps:$4 sm:$0xff]   ;;  %v11616_v45 = vld [vmem:[%s13252_s12 + $0xc0] ss:$48 sps:$4 sm:$0xff]  }
 0xbdb   : > { %4004 = vrot.lane.b32.xlu1 %v13804_v55, %s12823_s28 }
 0xc57   : > { %v3934_v61 = vpop.xlane.xlu0 %3933  ;;  %v3937_v63 = vpop.xlane.xlu1 %3936 }
 0xc58   : > { %v3938_v33 = vsub.f32 %v3930_v3, %v3934_v61  ;;  %v3939_v17 = vsub.f32 %v3931_v42, %v3937_v63  ;;  %v11613_v3 = vld [vmem:[%s13252_s12 + $0x68] ss:$48 sps:$4 sm:$0xff]   ;;  %v11618_v42 = vld [vmem:[%s13252_s12 + $0xc4] ss:$48 sps:$4 sm:$0xff]  }
 0xc59   : > { %v11619_v61 = vld [vmem:[%s13252_s12 + $0xc8] ss:$48 sps:$4 sm:$0xff]   ;;  %v11624_v63 = vld [vmem:[%s13252_s12 + $0x124] ss:$48 sps:$4 sm:$0xff]  }
 0xc5a   : > { %v3940_v26 = vmul.f32 1.442695, %v3938_v33  ;;  %v3942_v27 = vmul.f32 1.442695, %v3939_v17  ;;  %v11627_v33 = vld [vmem:[%s13252_s12 + $0x12c] ss:$48 sps:$4 sm:$0xff]  }
 0xc5b   : > { %v4005_v29 = vpop.permute.xlu1 %4004  ;;  %v11622_v17 = vld [vmem:[%s13252_s12 + $0x120] ss:$48 sps:$4 sm:$0xff]  }
 0xc5c   : > { %12444 = vpow2.f32 %v3940_v26  ;;  %v4010_v32 = vsel %vm2664_vm2, %v4005_v29, 0  ;;  %v11625_v26 = vld [vmem:[%s13252_s12 + $0x128] ss:$48 sps:$4 sm:$0xff]   ;;  %v11633_v29 = vld [vmem:[%s13252_s12 + $0x18c] ss:$48 sps:$4 sm:$0xff]  }
 0xc5d   : > { %10929 = vmatpush3.bf16.msra.mxu1 %v4010_v32  ;;  %12446 = vpow2.f32 %v3942_v27  ;;  %v11630_v27 = vld [vmem:[%s13252_s12 + $0x184] ss:$48 sps:$4 sm:$0xff]   ;;  %v11628_v32 = vld [vmem:[%s13252_s12 + $0x180] ss:$48 sps:$4 sm:$0xff]  }
 0xc5e   : > { %10934 = vmatprep.subr.bf16.mxu1 %v12818_v8 }
 0xc66   : > { %v12445_v30 = vpop.eup %12444 }
 0xc67   : > { %v3944_v31 = vsel %vm2636_vm4, %v12445_v30, 0.0  ;;  %v12447_v37 = vpop.eup %12446 }
 0xc68   : > { %3945 = vadd.xlane.f32.xlu0 %v3944_v31  ;;  %v3947_v55 = vsel %vm2636_vm4, %v12447_v37, 0.0  ;;  %v11636_v31 = vld [vmem:[%s13252_s12 + $0x1e4] ss:$48 sps:$4 sm:$0xff]  }
 0xc6c   : > { %3948 = vadd.xlane.f32.xlu0 %v3947_v55  ;;  %v11634_v55 = vld [vmem:[%s13252_s12 + $0x1e0] ss:$48 sps:$4 sm:$0xff]  }
 0xc82   : > { %3956 = vrot.lane.b32.xlu0 %v13796_v7, %s12823_s28  ;;  %v11586_v7 = vld [vmem:[%s13244_s22 + $0x1cc] ss:$12 sps:$4 sm:$0xff]   ;;  %s14766_s22 = sld [smem:[#allocation23_spill]] }
 0xc88   : > { %p10470_p4 = scmp.ne.s32.totalorder %s14766_s22, 2 }
 0xc89   : > { %vm12825_vm7 = vmmov (!%p10470_p4), 0  }
 0xcf5   : > { %v3946_v34 = vpop.xlane.xlu0 %3945 }
 0xcf6   : > { %12448 = vrcp.f32 %v3946_v34  ;;  %v11637_v34 = vld [vmem:[%s13252_s12 + $0x1e8] ss:$48 sps:$4 sm:$0xff]  }
 0xcf9   : > { %v3949_v60 = vpop.xlane.xlu0 %3948 }
 0xcfa   : > { %12450 = vrcp.f32 %v3949_v60  ;;  %v11642_v60 = vld [vmem:[%s13252_s12 + $0x244] ss:$48 sps:$4 sm:$0xff]  }
 0xcfd   : > { %v3957_v36 = vpop.permute.xlu0 %3956 }
 0xcfe   : > { %v3962_v38 = vsel %vm2664_vm2, %v3957_v36, 0  ;;  %v11640_v36 = vld [vmem:[%s13252_s12 + $0x240] ss:$48 sps:$4 sm:$0xff]  }
 0xcff   : > { %10923 = vmatpush3.bf16.msra.mxu0 %v3962_v38  ;;  %v11643_v38 = vld [vmem:[%s13252_s12 + $0x248] ss:$48 sps:$4 sm:$0xff]  }
 0xd00   : > { %v12449_v39 = vpop.eup %12448  ;;  %4152 = vmatprep.subr.bf16.mxu0 %v11582_v35  ;;  %v11645_v35 = vld [vmem:[%s13252_s12 + $0x24c] ss:$48 sps:$4 sm:$0xff]  }
 0xd01   : > { %v3951_v40 = vmul.f32 %v12449_v39, %v12445_v30  ;;  %v11631_v30 = vld [vmem:[%s13252_s12 + $0x188] ss:$48 sps:$4 sm:$0xff]   ;;  %v11648_v39 = vld [vmem:[%s13252_s12 + $0x2a4] ss:$48 sps:$4 sm:$0xff]  }
 0xd03   : > { %v3954_v43 = vpack.c.bf16 %v3951_v40, %v3951_v40  ;;  %v11651_v40 = vld [vmem:[%s13252_s12 + $0x2ac] ss:$48 sps:$4 sm:$0xff]  }
 0xd04   : > { %v12451_v44 = vpop.eup %12450 }
 0xd05   : > { %v3953_v46 = vmul.f32 %v12451_v44, %v12447_v37  ;;  %10925 = vmatmul.mubr.msk.bf16.vlgmr.msra.gmra.mrb[40].mxu0 %vm2636_vm4, %v3954_v43  ;;  %v11639_v37 = vld [vmem:[%s13252_s12 + $0x1ec] ss:$48 sps:$4 sm:$0xff]   ;;  %v11649_v43 = vld [vmem:[%s13252_s12 + $0x2a8] ss:$48 sps:$4 sm:$0xff]  }
 0xd06   : > { %4153 = vmatpush1.bf16.msra.mxu0 %v11580_v41  ;;  %4184 = vmatprep.mubr.bf16.mxu0 %v12817_v2  ;;  %v11646_v41 = vld [vmem:[%s13252_s12 + $0x2a0] ss:$48 sps:$4 sm:$0xff]   ;;  %v11657_v44 = vld [vmem:[%s13252_s12 + $0x30c] ss:$48 sps:$4 sm:$0xff]  }
 0xd07   : > { %v3955_v49 = vpack.c.bf16 %v3953_v46, %v3953_v46  ;;  %4154 = vmatprep.subr.bf16.mxu0 %v11586_v7  ;;  %v11654_v7 = vld [vmem:[%s13252_s12 + $0x304] ss:$48 sps:$4 sm:$0xff]   ;;  %v11652_v46 = vld [vmem:[%s13252_s12 + $0x300] ss:$48 sps:$4 sm:$0xff]  }
 0xd09   : > { %10931 = vmatmul.mubr.msk.bf16.vlgmr.msra.gmra.mrb[56].mxu1 %vm2636_vm4, %v3955_v49  ;;  %v11663_v49 = vld [vmem:[%s13252_s12 + $0x36c] ss:$48 sps:$4 sm:$0xff]  }
 0xd0a   : > { %10935 = vmatpush3.bf16.msra.mxu1 %v11583_v47  ;;  %4155 = vmatpush1.bf16.msra.mxu0 %v11584_v48  ;;  %v11655_v47 = vld [vmem:[%s13252_s12 + $0x308] ss:$48 sps:$4 sm:$0xff]   ;;  %v11660_v48 = vld [vmem:[%s13252_s12 + $0x364] ss:$48 sps:$4 sm:$0xff]  }
 0xd0b   : > { %10936 = vmatprep.subr.bf16.mxu1 %v12818_v8  ;;  %4156 = vmatprep.subr.bf16.mxu0 %v11590_v51  ;;  %v11658_v51 = vld [vmem:[%s13252_s12 + $0x360] ss:$48 sps:$4 sm:$0xff]  }
 0xd0c   : > { %10946 = vmatprep.mubr.msk.bf16.mxu1 %vm12819_vm0, %v12818_v8 }
 0xd0e   : > { %10937 = vmatpush3.bf16.msra.mxu1 %v11587_v52  ;;  %4157 = vmatpush1.bf16.msra.mxu0 %v11588_v54  ;;  %v11661_v52 = vld [vmem:[%s13252_s12 + $0x368] ss:$48 sps:$4 sm:$0xff]   ;;  %v11666_v54 = vld [vmem:[%s13252_s12 + $0x3c4] ss:$48 sps:$4 sm:$0xff]  }
 0xd0f   : > { %10938 = vmatprep.subr.bf16.mxu1 %v12818_v8  ;;  %4158 = vmatprep.subr.bf16.mxu0 %v11594_v57  ;;  %v11669_v57 = vld [vmem:[%s13252_s12 + $0x3cc] ss:$48 sps:$4 sm:$0xff]  }
 0xd12   : > { %10939 = vmatpush3.bf16.msra.mxu1 %v11591_v59  ;;  %4159 = vmatpush1.bf16.msra.mxu0 %v11592_v18  ;;  %v11664_v59 = vld [vmem:[%s13252_s12 + $0x3c0] ss:$48 sps:$4 sm:$0xff]   ;;  %v11667_v18 = vld [vmem:[%s13252_s12 + $0x3c8] ss:$48 sps:$4 sm:$0xff]  }
 0xd13   : > { %10940 = vmatprep.subr.bf16.mxu1 %v12818_v8  ;;  %4160 = vmatprep.subr.bf16.mxu0 %v11598_v56  ;;  %v11672_v56 = vld [vmem:[%s13252_s12 + $0x424] ss:$48 sps:$4 sm:$0xff]  }
 0xd16   : > { %10941 = vmatpush3.bf16.msra.mxu1 %v11595_v1  ;;  %4161 = vmatpush1.bf16.msra.mxu0 %v11596_v4  ;;  %v11675_v1 = vld [vmem:[%s13252_s12 + $0x42c] ss:$48 sps:$4 sm:$0xff]   ;;  %v11670_v4 = vld [vmem:[%s13252_s12 + $0x420] ss:$48 sps:$4 sm:$0xff]  }
 0xd17   : > { %10942 = vmatprep.subr.bf16.mxu1 %v12818_v8  ;;  %4162 = vmatprep.subr.bf16.mxu0 %v11602_v6  ;;  %v11678_v6 = vld [vmem:[%s13252_s12 + $0x484] ss:$48 sps:$4 sm:$0xff]  }
 0xd1a   : > { %10943 = vmatpush3.bf16.msra.mxu1 %v11599_v5  ;;  %4163 = vmatpush1.bf16.msra.mxu0 %v11600_v22  ;;  %v11673_v5 = vld [vmem:[%s13252_s12 + $0x428] ss:$48 sps:$4 sm:$0xff]   ;;  %v11681_v22 = vld [vmem:[%s13252_s12 + $0x48c] ss:$48 sps:$4 sm:$0xff]  }
 0xd1b   : > { %10944 = vmatprep.subr.bf16.mxu1 %v12818_v8  ;;  %6066 = vmatprep.subr.bf16.mxu0 %v11606_v10  ;;  %v11604_v8 = vld [vmem:[%s13252_s12] ss:$48 sps:$4 sm:$0xff]   ;;  %v11679_v10 = vld [vmem:[%s13252_s12 + $0x488] ss:$48 sps:$4 sm:$0xff]  }
 0xd1e   : > { %10945 = vmatpush3.bf16.msra.mxu1 %v11603_v9  ;;  %v11676_v9 = vld [vmem:[%s13252_s12 + $0x480] ss:$48 sps:$4 sm:$0xff]  }
 0xd1f   : > { %6152 = vmatprep.subr.bf16.mxu1 %v11609_v11  ;;  %v11684_v11 = vld [vmem:[%s13252_s12 + $0x4e4] ss:$48 sps:$4 sm:$0xff]  }
 0xdd8   : > { %v3998_v62 = vpop.f32.mrb[40].mxu0 }
 0xdd9   : > { %v10926_v12 = vpop.f32.mrb[41].mxu0 }
 0xdda   : > { %v4001_v50 = vpop.f32.mrb[42].mxu0  ;;  %v11682_v12 = vld [vmem:[%s13252_s12 + $0x4e0] ss:$48 sps:$4 sm:$0xff]  }
 0xddb   : > { %v10927_v15 = vpop.f32.mrb[43].mxu0  ;;  %v11685_v50 = vld [vmem:[%s13252_s12 + $0x4e8] ss:$48 sps:$4 sm:$0xff]  }
 0xddc   : > { %v4046_v16 = vpop.f32.mrb[56].mxu1  ;;  %v11690_v15 = vld [vmem:[%s13252_s12 + $0x544] ss:$48 sps:$4 sm:$0xff]  }
 0xddd   : > { %v4052_v14 = vpack.c.bf16 %v4046_v16, %v3998_v62  ;;  %v10932_v53 = vpop.f32.mrb[57].mxu1  ;;  %v11687_v62 = vld [vmem:[%s13252_s12 + $0x4ec] ss:$48 sps:$4 sm:$0xff]  }
 0xdde   : > { %v4049_v21 = vpop.f32.mrb[58].mxu1  ;;  %v11693_v16 = vld [vmem:[%s13252_s12 + $0x54c] ss:$48 sps:$4 sm:$0xff]  }
 0xddf   : > { %v10933_v23 = vpop.f32.mrb[59].mxu1  ;;  %9892 = vmatmul.mubr.msk.bf16.vlgmr.msra.gmra.mrb[24].mxu0 %vm2539_vm1, %v4052_v14  ;;  %10947 = vmatmul.mubr.msk.bf16.vlgmr.msra.gmra.mrb[60].mxu1 %vm2539_vm1, %v4052_v14  ;;  %v11696_v14 = vld [vmem:[%s13252_s12 + $0x5a4] ss:$48 sps:$4 sm:$0xff]   ;;  %v11699_v53 = vld [vmem:[%s13252_s12 + $0x5ac] ss:$48 sps:$4 sm:$0xff]  }
 0xde0   : > { %6067 = vmatpush1.bf16.msra.mxu0 %v11604_v8  ;;  %6153 = vmatpush1.bf16.msra.mxu1 %v11607_v19  ;;  %v11688_v8 = vld [vmem:[%s13252_s12 + $0x540] ss:$48 sps:$4 sm:$0xff]   ;;  %v11691_v19 = vld [vmem:[%s13252_s12 + $0x548] ss:$48 sps:$4 sm:$0xff]   ;;  %v11702_v21 = vld [vmem:[%s13252_s12 + $0x604] ss:$48 sps:$4 sm:$0xff]  }
 0xde1   : > { %6068 = vmatprep.subr.bf16.mxu0 %v11612_v13  ;;  %6154 = vmatprep.subr.bf16.mxu1 %v11615_v20  ;;  %v11694_v13 = vld [vmem:[%s13252_s12 + $0x5a0] ss:$48 sps:$4 sm:$0xff]   ;;  %v11697_v20 = vld [vmem:[%s13252_s12 + $0x5a8] ss:$48 sps:$4 sm:$0xff]   ;;  %v11705_v23 = vld [vmem:[%s13252_s12 + $0x60c] ss:$48 sps:$4 sm:$0xff]  }
 0xde4   : > { %6069 = vmatpush1.bf16.msra.mxu0 %v11610_v0  ;;  %6155 = vmatpush1.bf16.msra.mxu1 %v11613_v3  ;;  %v13987_v0 = vsub.s32 1, %v13603_v28  ;;  %v13990_v3 = vld [vmem:[%s13250_s19] sm:$0x7] }
 0xde5   : > { %6070 = vmatprep.subr.bf16.mxu0 %v11618_v42  ;;  %6156 = vmatprep.subr.bf16.mxu1 %v11621_v24  ;;  %v13993_v42 = vsub.s32 0, %v13603_v28 }
 0xde6   : > { %v4251_v24 = vrot.slane %v13990_v3, %v13987_v0 }
 0xde8   : > { %6071 = vmatpush1.bf16.msra.mxu0 %v11616_v45  ;;  %6157 = vmatpush1.bf16.msra.mxu1 %v11619_v61  ;;  %v4247_v45 = vrot.slane %v13990_v3, %v13993_v42 }
 0xde9   : > { %6072 = vmatprep.subr.bf16.mxu0 %v11624_v63  ;;  %6158 = vmatprep.subr.bf16.mxu1 %v11627_v33 }
 0xdec   : > { %6073 = vmatpush1.bf16.msra.mxu0 %v11622_v17  ;;  %6159 = vmatpush1.bf16.msra.mxu1 %v11625_v26 }
 0xded   : > { %6074 = vmatprep.subr.bf16.mxu0 %v11630_v27  ;;  %6160 = vmatprep.subr.bf16.mxu1 %v11633_v29 }
 0xdf0   : > { %6075 = vmatpush1.bf16.msra.mxu0 %v11628_v32  ;;  %6161 = vmatpush1.bf16.msra.mxu1 %v11631_v30 }
 0xdf1   : > { %6076 = vmatprep.subr.bf16.mxu0 %v11636_v31  ;;  %6162 = vmatprep.subr.bf16.mxu1 %v11639_v37 }
 0xdf4   : > { %6077 = vmatpush1.bf16.msra.mxu0 %v11634_v55  ;;  %6163 = vmatpush1.bf16.msra.mxu1 %v11637_v34 }
 0xdf5   : > { %6078 = vmatprep.subr.bf16.mxu0 %v11642_v60  ;;  %6164 = vmatprep.subr.bf16.mxu1 %v11645_v35  ;;  %v12452_v35 = vld [vmem:[#allocation2 + $0x18] sm:$0xff] }
 0xdf8   : > { %6079 = vmatpush1.bf16.msra.mxu0 %v11640_v36  ;;  %6165 = vmatpush1.bf16.msra.mxu1 %v11643_v38  ;;  %v12453_v36 = vld [vmem:[#allocation2 + $0x8] sm:$0xff] }
 0xdf9   : > { %6080 = vmatprep.subr.bf16.mxu0 %v11648_v39  ;;  %6166 = vmatprep.subr.bf16.mxu1 %v11651_v40  ;;  %v12454_v39 = vld [vmem:[#allocation2 + $0x20] sm:$0xff] }
 0xdfc   : > { %6081 = vmatpush1.bf16.msra.mxu0 %v11646_v41  ;;  %6167 = vmatpush1.bf16.msra.mxu1 %v11649_v43  ;;  %v12455_v41 = vld [vmem:[#allocation2] sm:$0xff] }
 0xdfd   : > { %6082 = vmatprep.subr.bf16.mxu0 %v11654_v7  ;;  %6168 = vmatprep.subr.bf16.mxu1 %v11657_v44  ;;  %v11700_v7 = vld [vmem:[%s13252_s12 + $0x600] ss:$48 sps:$4 sm:$0xff]   ;;  %v11703_v44 = vld [vmem:[%s13252_s12 + $0x608] ss:$48 sps:$4 sm:$0xff]  }
 0xe00   : > { %6083 = vmatpush1.bf16.msra.mxu0 %v11652_v46  ;;  %6169 = vmatpush1.bf16.msra.mxu1 %v11655_v47  ;;  %v11708_v47 = vld [vmem:[%s13252_s12 + $0x664] ss:$48 sps:$4 sm:$0xff]  }
 0xe01   : > { %6084 = vmatprep.subr.bf16.mxu0 %v11660_v48  ;;  %6170 = vmatprep.subr.bf16.mxu1 %v11663_v49  ;;  %v11711_v48 = vld [vmem:[%s13252_s12 + $0x66c] ss:$48 sps:$4 sm:$0xff]   ;;  %v11706_v49 = vld [vmem:[%s13252_s12 + $0x660] ss:$48 sps:$4 sm:$0xff]  }
 0xe04   : > { %6085 = vmatpush1.bf16.msra.mxu0 %v11658_v51  ;;  %6171 = vmatpush1.bf16.msra.mxu1 %v11661_v52  ;;  %v11709_v51 = vld [vmem:[%s13252_s12 + $0x668] ss:$48 sps:$4 sm:$0xff]   ;;  %v11714_v52 = vld [vmem:[%s13252_s12 + $0x6c4] ss:$48 sps:$4 sm:$0xff]  }
 0xe05   : > { %6086 = vmatprep.subr.bf16.mxu0 %v11666_v54  ;;  %6172 = vmatprep.subr.bf16.mxu1 %v11669_v57  ;;  %v11717_v54 = vld [vmem:[%s13252_s12 + $0x6cc] ss:$48 sps:$4 sm:$0xff]   ;;  %v11712_v57 = vld [vmem:[%s13252_s12 + $0x6c0] ss:$48 sps:$4 sm:$0xff]  }
 0xe08   : > { %6087 = vmatpush1.bf16.msra.mxu0 %v11664_v59  ;;  %6173 = vmatpush1.bf16.msra.mxu1 %v11667_v18  ;;  %v11715_v59 = vld [vmem:[%s13252_s12 + $0x6c8] ss:$48 sps:$4 sm:$0xff]   ;;  %v11720_v18 = vld [vmem:[%s13252_s12 + $0x724] ss:$48 sps:$4 sm:$0xff]  }
 0xe09   : > { %6088 = vmatprep.subr.bf16.mxu0 %v11672_v56  ;;  %6174 = vmatprep.subr.bf16.mxu1 %v11675_v1  ;;  %v11723_v56 = vld [vmem:[%s13252_s12 + $0x72c] ss:$48 sps:$4 sm:$0xff]   ;;  %v11718_v1 = vld [vmem:[%s13252_s12 + $0x720] ss:$48 sps:$4 sm:$0xff]  }
 0xe0c   : > { %6089 = vmatpush1.bf16.msra.mxu0 %v11670_v4  ;;  %6175 = vmatpush1.bf16.msra.mxu1 %v11673_v5  ;;  %v11721_v4 = vld [vmem:[%s13252_s12 + $0x728] ss:$48 sps:$4 sm:$0xff]   ;;  %v11726_v5 = vld [vmem:[%s13252_s12 + $0x784] ss:$48 sps:$4 sm:$0xff]  }
 0xe0d   : > { %6090 = vmatprep.subr.bf16.mxu0 %v11678_v6  ;;  %6176 = vmatprep.subr.bf16.mxu1 %v11681_v22  ;;  %v11729_v6 = vld [vmem:[%s13252_s12 + $0x78c] ss:$48 sps:$4 sm:$0xff]   ;;  %v11724_v22 = vld [vmem:[%s13252_s12 + $0x780] ss:$48 sps:$4 sm:$0xff]  }
 0xe10   : > { %6091 = vmatpush1.bf16.msra.mxu0 %v11676_v9  ;;  %6177 = vmatpush1.bf16.msra.mxu1 %v11679_v10  ;;  %v11727_v9 = vld [vmem:[%s13252_s12 + $0x788] ss:$48 sps:$4 sm:$0xff]   ;;  %v11732_v10 = vld [vmem:[%s13252_s12 + $0x7e4] ss:$48 sps:$4 sm:$0xff]  }
 0xe11   : > { %6092 = vmatprep.subr.bf16.mxu0 %v11684_v11  ;;  %6178 = vmatprep.subr.bf16.mxu1 %v11687_v62  ;;  %v11735_v11 = vld [vmem:[%s13252_s12 + $0x7ec] ss:$48 sps:$4 sm:$0xff]   ;;  %v14048_v62 = vsub.s32 2, %v13603_v28 }
 0xe14   : > { %6093 = vmatpush1.bf16.msra.mxu0 %v11682_v12  ;;  %6179 = vmatpush1.bf16.msra.mxu1 %v11685_v50  ;;  %v11730_v12 = vld [vmem:[%s13252_s12 + $0x7e0] ss:$48 sps:$4 sm:$0xff]   ;;  %v11733_v50 = vld [vmem:[%s13252_s12 + $0x7e8] ss:$48 sps:$4 sm:$0xff]  }
 0xe15   : > { %6094 = vmatprep.subr.bf16.mxu0 %v11690_v15  ;;  %6180 = vmatprep.subr.bf16.mxu1 %v11693_v16  ;;  %v11738_v15 = vld [vmem:[%s13252_s12 + $0x844] ss:$48 sps:$4 sm:$0xff]   ;;  %v11741_v16 = vld [vmem:[%s13252_s12 + $0x84c] ss:$48 sps:$4 sm:$0xff]  }
 0xe18   : > { %6095 = vmatpush1.bf16.msra.mxu0 %v11688_v8  ;;  %6181 = vmatpush1.bf16.msra.mxu1 %v11691_v19  ;;  %v4255_v8 = vrot.slane %v13990_v3, %v14048_v62  ;;  %v11736_v19 = vld [vmem:[%s13252_s12 + $0x840] ss:$48 sps:$4 sm:$0xff]   ;;  %v11745_v3 = vld [vmem:[%s13252_s12 + $0x8a8] ss:$48 sps:$4 sm:$0xff]  }
 0xe19   : > { %6096 = vmatprep.subr.bf16.mxu0 %v11696_v14  ;;  %6182 = vmatprep.subr.bf16.mxu1 %v11699_v53  ;;  %v11739_v14 = vld [vmem:[%s13252_s12 + $0x848] ss:$48 sps:$4 sm:$0xff]  }
 0xe1c   : > { %6097 = vmatpush1.bf16.msra.mxu0 %v11694_v13  ;;  %6183 = vmatpush1.bf16.msra.mxu1 %v11697_v20  ;;  %v11744_v13 = vld [vmem:[%s13252_s12 + $0x8a4] ss:$48 sps:$4 sm:$0xff]   ;;  %v11747_v20 = vld [vmem:[%s13252_s12 + $0x8ac] ss:$48 sps:$4 sm:$0xff]  }
 0xe1d   : > { %6109 = vmatprep.subr.bf16.mxu0 %v11702_v21  ;;  %6195 = vmatprep.subr.bf16.mxu1 %v11705_v23  ;;  %v11742_v23 = vld [vmem:[%s13252_s12 + $0x8a0] ss:$48 sps:$4 sm:$0xff]  }
 0xeb2   : > { %v4186_v61 = vpop.f32.mrb[24].mxu0  ;;  %v4229_v63 = vpop.f32.mrb[60].mxu1 }
 0xeb3   : > { %v14000_v33 = vadd.f32 %v4229_v63, %v13872_v58  ;;  %v4188_v17 = vpop.f32.mrb[25].mxu0  ;;  %v10948_v26 = vpop.f32.mrb[61].mxu1  ;;  %v4259_v30 = vadd.f32 %v4247_v45, %v4186_v61  ;;  %v11750_v61 = vld [vmem:[%s13252_s12 + $0x14] ss:$48 sps:$4 sm:$0xff]   ;;  %v11753_v63 = vld [vmem:[%s13252_s12 + $0x1c] ss:$48 sps:$4 sm:$0xff]  }
 0xeb4   : > { %v4260_v27 = vadd.f32 %v4251_v24, %v4188_v17  ;;  %v4190_v29 = vpop.f32.mrb[26].mxu0  ;;  %v4232_v32 = vpop.f32.mrb[62].mxu1  ;;  %v12457_v17 = vld [vmem:[#allocation2 + $0x10] sm:$0xff] }
 0xeb5   : > { %v4262_v31 = vadd.f32 %v4247_v45, %v4190_v29  ;;  %v14003_v37 = vadd.f32 %v4232_v32, %v13875_v25  ;;  %v4192_v55 = vpop.f32.mrb[27].mxu0  ;;  %v10949_v34 = vpop.f32.mrb[63].mxu1  ;;  %v14011_v43 = vadd.f32 %v12455_v41, %v4259_v30  ;;  %v4261_v21 = vadd.f32 %v4255_v8, %v14000_v33  ;;  %v11748_v33 = vld [vmem:[%s13252_s12 + $0x10] ss:$48 sps:$4 sm:$0xff]   ;;  %v11751_v29 = vld [vmem:[%s13252_s12 + $0x18] ss:$48 sps:$4 sm:$0xff]  }
 0xeb6   : > { %v4263_v60 = vadd.f32 %v4251_v24, %v4192_v55  ;;  %v14007_v38 = vadd.f32 %v12453_v36, %v4260_v27  ;;  %v12456_v24 = vld [vmem:[#allocation2 + $0x28] sm:$0xff]  ;;  %v11759_v30 = vld [vmem:[%s13252_s12 + $0x7c] ss:$48 sps:$4 sm:$0xff]  }
 0xeb7   : > { %v14005_v58 = vadd.f32 %v12452_v35, %v4262_v31  ;;  %v4264_v53 = vadd.f32 %v4255_v8, %v14003_v37  ;;  %v14068_v26 = vadd.f32 %v12457_v17, %v4261_v21  ;;  %v11756_v32 = vld [vmem:[%s13252_s12 + $0x74] ss:$48 sps:$4 sm:$0xff]   ;;  %v11754_v31 = vld [vmem:[%s13252_s12 + $0x70] ss:$48 sps:$4 sm:$0xff]   ;;  %v11757_v37 = vld [vmem:[%s13252_s12 + $0x78] ss:$48 sps:$4 sm:$0xff]  }
 0xeb8   : > { %v14009_v40 = vadd.f32 %v12454_v39, %v4263_v60  ;;  %v11762_v55 = vld [vmem:[%s13252_s12 + $0xd4] ss:$48 sps:$4 sm:$0xff]   ;;  %v11765_v34 = vld [vmem:[%s13252_s12 + $0xdc] ss:$48 sps:$4 sm:$0xff]   ;;  %v11760_v60 = vld [vmem:[%s13252_s12 + $0xd0] ss:$48 sps:$4 sm:$0xff]  }
 0xeb9   : > { %v14021_v46 = vpack.c.bf16 %v14005_v58, %v14011_v43  ;;  %v14064_v45 = vadd.f32 %v12456_v24, %v4264_v53  ;;  %v11763_v35 = vld [vmem:[%s13252_s12 + $0xd8] ss:$48 sps:$4 sm:$0xff]   ;;  %v11768_v36 = vld [vmem:[%s13252_s12 + $0x134] ss:$48 sps:$4 sm:$0xff]   ;;  %v11771_v39 = vld [vmem:[%s13252_s12 + $0x13c] ss:$48 sps:$4 sm:$0xff]  }
 0xeba   : > { %v14015_v25 = vpack.c.bf16 %v14009_v40, %v14007_v38  ;;  %v11766_v41 = vld [vmem:[%s13252_s12 + $0x130] ss:$48 sps:$4 sm:$0xff]   ;;  %v11805_v8 = vld [vmem:[%s13252_s12 + $0x378] ss:$48 sps:$4 sm:$0xff]   ;;  %v11819_v21 = vld [vmem:[%s13252_s12 + $0x43c] ss:$48 sps:$4 sm:$0xff]  }
 0xebb   : > { %v14073_v27 = vpack.c.bf16 %v14064_v45, %v14068_v26  ;;  %v11808_v53 = vld [vmem:[%s13252_s12 + $0x3d0] ss:$48 sps:$4 sm:$0xff]   ;;  %v11822_v24 = vld [vmem:[%s13252_s12 + $0x494] ss:$48 sps:$4 sm:$0xff]   ;;  %v11823_v17 = vld [vmem:[%s13252_s12 + $0x498] ss:$48 sps:$4 sm:$0xff]  }
 0xebc   : > { %6098 = vmatprep.mubr.bf16.mxu0 %v14015_v25  ;;  %6184 = vmatprep.mubr.bf16.mxu1 %v14015_v25 }
 0xebd   : > { %6099 = vmatmul.mubr.bf16.vlgmr.msra.gmra.mrb[44].mxu0 %v14021_v46  ;;  %6185 = vmatmul.mubr.bf16.vlgmr.msra.gmra.mrb[64].mxu1 %v14021_v46 }
 0xebe   : > { %6110 = vmatpush1.bf16.msra.mxu0 %v11700_v7  ;;  %6196 = vmatpush1.bf16.msra.mxu1 %v11703_v44  ;;  %v11769_v7 = vld [vmem:[%s13252_s12 + $0x138] ss:$48 sps:$4 sm:$0xff]   ;;  %v11774_v44 = vld [vmem:[%s13252_s12 + $0x194] ss:$48 sps:$4 sm:$0xff]  }
 0xebf   : > { %6111 = vmatprep.subr.bf16.mxu0 %v11708_v47  ;;  %6197 = vmatprep.subr.bf16.mxu1 %v11711_v48  ;;  %v11777_v47 = vld [vmem:[%s13252_s12 + $0x19c] ss:$48 sps:$4 sm:$0xff]   ;;  %v11772_v48 = vld [vmem:[%s13252_s12 + $0x190] ss:$48 sps:$4 sm:$0xff]  }
 0xec0   : > { %6141 = vmatprep.mubr.bf16.mxu0 %v12817_v2  ;;  %6227 = vmatprep.mubr.bf16.mxu1 %v12817_v2 }
 0xec2   : > { %6112 = vmatpush1.bf16.msra.mxu0 %v11706_v49  ;;  %6198 = vmatpush1.bf16.msra.mxu1 %v11709_v51  ;;  %v11775_v49 = vld [vmem:[%s13252_s12 + $0x198] ss:$48 sps:$4 sm:$0xff]   ;;  %v11780_v51 = vld [vmem:[%s13252_s12 + $0x1f4] ss:$48 sps:$4 sm:$0xff]  }
 0xec3   : > { %6113 = vmatprep.subr.bf16.mxu0 %v11714_v52  ;;  %6199 = vmatprep.subr.bf16.mxu1 %v11717_v54  ;;  %v11783_v52 = vld [vmem:[%s13252_s12 + $0x1fc] ss:$48 sps:$4 sm:$0xff]   ;;  %v11778_v54 = vld [vmem:[%s13252_s12 + $0x1f0] ss:$48 sps:$4 sm:$0xff]  }
 0xec6   : > { %6114 = vmatpush1.bf16.msra.mxu0 %v11712_v57  ;;  %6200 = vmatpush1.bf16.msra.mxu1 %v11715_v59  ;;  %v11781_v57 = vld [vmem:[%s13252_s12 + $0x1f8] ss:$48 sps:$4 sm:$0xff]   ;;  %v11786_v59 = vld [vmem:[%s13252_s12 + $0x254] ss:$48 sps:$4 sm:$0xff]  }
 0xec7   : > { %6115 = vmatprep.subr.bf16.mxu0 %v11720_v18  ;;  %6201 = vmatprep.subr.bf16.mxu1 %v11723_v56  ;;  %v11789_v18 = vld [vmem:[%s13252_s12 + $0x25c] ss:$48 sps:$4 sm:$0xff]   ;;  %v11784_v56 = vld [vmem:[%s13252_s12 + $0x250] ss:$48 sps:$4 sm:$0xff]  }
 0xeca   : > { %6116 = vmatpush1.bf16.msra.mxu0 %v11718_v1  ;;  %6202 = vmatpush1.bf16.msra.mxu1 %v11721_v4  ;;  %v11787_v1 = vld [vmem:[%s13252_s12 + $0x258] ss:$48 sps:$4 sm:$0xff]   ;;  %v11792_v4 = vld [vmem:[%s13252_s12 + $0x2b4] ss:$48 sps:$4 sm:$0xff]  }
 0xecb   : > { %6117 = vmatprep.subr.bf16.mxu0 %v11726_v5  ;;  %6203 = vmatprep.subr.bf16.mxu1 %v11729_v6  ;;  %v11795_v5 = vld [vmem:[%s13252_s12 + $0x2bc] ss:$48 sps:$4 sm:$0xff]   ;;  %v11790_v6 = vld [vmem:[%s13252_s12 + $0x2b0] ss:$48 sps:$4 sm:$0xff]  }
 0xece   : > { %6118 = vmatpush1.bf16.msra.mxu0 %v11724_v22  ;;  %6204 = vmatpush1.bf16.msra.mxu1 %v11727_v9  ;;  %v11793_v22 = vld [vmem:[%s13252_s12 + $0x2b8] ss:$48 sps:$4 sm:$0xff]   ;;  %v11798_v9 = vld [vmem:[%s13252_s12 + $0x314] ss:$48 sps:$4 sm:$0xff]  }
 0xecf   : > { %6119 = vmatprep.subr.bf16.mxu0 %v11732_v10  ;;  %6205 = vmatprep.subr.bf16.mxu1 %v11735_v11  ;;  %v11801_v10 = vld [vmem:[%s13252_s12 + $0x31c] ss:$48 sps:$4 sm:$0xff]   ;;  %v11796_v11 = vld [vmem:[%s13252_s12 + $0x310] ss:$48 sps:$4 sm:$0xff]  }
 0xed2   : > { %6120 = vmatpush1.bf16.msra.mxu0 %v11730_v12  ;;  %6206 = vmatpush1.bf16.msra.mxu1 %v11733_v50  ;;  %v11799_v12 = vld [vmem:[%s13252_s12 + $0x318] ss:$48 sps:$4 sm:$0xff]   ;;  %v11804_v50 = vld [vmem:[%s13252_s12 + $0x374] ss:$48 sps:$4 sm:$0xff]  }
 0xed3   : > { %6121 = vmatprep.subr.bf16.mxu0 %v11738_v15  ;;  %6207 = vmatprep.subr.bf16.mxu1 %v11741_v16  ;;  %v11807_v15 = vld [vmem:[%s13252_s12 + $0x37c] ss:$48 sps:$4 sm:$0xff]   ;;  %v11802_v16 = vld [vmem:[%s13252_s12 + $0x370] ss:$48 sps:$4 sm:$0xff]  }
 0xed6   : > { %6122 = vmatpush1.bf16.msra.mxu0 %v11736_v19  ;;  %6208 = vmatpush1.bf16.msra.mxu1 %v11739_v14  ;;  %v11810_v19 = vld [vmem:[%s13252_s12 + $0x3d4] ss:$48 sps:$4 sm:$0xff]   ;;  %v11813_v14 = vld [vmem:[%s13252_s12 + $0x3dc] ss:$48 sps:$4 sm:$0xff]  }
 0xed7   : > { %6123 = vmatprep.subr.bf16.mxu0 %v11744_v13  ;;  %6209 = vmatprep.subr.bf16.mxu1 %v11747_v20  ;;  %v11811_v13 = vld [vmem:[%s13252_s12 + $0x3d8] ss:$48 sps:$4 sm:$0xff]   ;;  %v11816_v20 = vld [vmem:[%s13252_s12 + $0x434] ss:$48 sps:$4 sm:$0xff]  }
 0xeda   : > { %6124 = vmatpush1.bf16.msra.mxu0 %v11742_v23  ;;  %6210 = vmatpush1.bf16.msra.mxu1 %v11745_v3  ;;  %v11814_v23 = vld [vmem:[%s13252_s12 + $0x430] ss:$48 sps:$4 sm:$0xff]   ;;  %v11817_v3 = vld [vmem:[%s13252_s12 + $0x438] ss:$48 sps:$4 sm:$0xff]  }
 0xedb   : > { %6238 = vmatprep.subr.bf16.mxu0 %v11750_v61  ;;  %6324 = vmatprep.subr.bf16.mxu1 %v11753_v63  ;;  %v11825_v61 = vld [vmem:[%s13252_s12 + $0x49c] ss:$48 sps:$4 sm:$0xff]   ;;  %v11820_v63 = vld [vmem:[%s13252_s12 + $0x490] ss:$48 sps:$4 sm:$0xff]  }
 0xedd   : > { %6142 = vmatmul.mubr.bf16.vlgmr.msra.gmra.mrb[44].mxu0 %v14073_v27  ;;  %6228 = vmatmul.mubr.bf16.vlgmr.msra.gmra.mrb[64].mxu1 %v14073_v27 }
 0xede   : > { %6239 = vmatpush1.bf16.msra.mxu0 %v11748_v33  ;;  %6270 = vmatprep.mubr.bf16.mxu0 %v14015_v25  ;;  %v11828_v33 = vld [vmem:[%s13252_s12 + $0x4f4] ss:$48 sps:$4 sm:$0xff]  }
 0xedf   : > { %6325 = vmatpush1.bf16.msra.mxu1 %v11751_v29  ;;  %6356 = vmatprep.mubr.bf16.mxu1 %v14015_v25  ;;  %v11831_v29 = vld [vmem:[%s13252_s12 + $0x4fc] ss:$48 sps:$4 sm:$0xff]  }
 0xee0   : > { %6240 = vmatprep.subr.bf16.mxu0 %v11756_v32  ;;  %6326 = vmatprep.subr.bf16.mxu1 %v11759_v30  ;;  %v11826_v32 = vld [vmem:[%s13252_s12 + $0x4f0] ss:$48 sps:$4 sm:$0xff]   ;;  %v11829_v30 = vld [vmem:[%s13252_s12 + $0x4f8] ss:$48 sps:$4 sm:$0xff]  }
 0xee2   : > { %6241 = vmatpush1.bf16.msra.mxu0 %v11754_v31  ;;  %v11834_v31 = vld [vmem:[%s13252_s12 + $0x554] ss:$48 sps:$4 sm:$0xff]  }
 0xee3   : > { %6327 = vmatpush1.bf16.msra.mxu1 %v11757_v37  ;;  %6242 = vmatprep.subr.bf16.mxu0 %v11762_v55  ;;  %v11837_v37 = vld [vmem:[%s13252_s12 + $0x55c] ss:$48 sps:$4 sm:$0xff]   ;;  %v11832_v55 = vld [vmem:[%s13252_s12 + $0x550] ss:$48 sps:$4 sm:$0xff]  }
 0xee4   : > { %6328 = vmatprep.subr.bf16.mxu1 %v11765_v34  ;;  %v11835_v34 = vld [vmem:[%s13252_s12 + $0x558] ss:$48 sps:$4 sm:$0xff]  }
 0xee6   : > { %6243 = vmatpush1.bf16.msra.mxu0 %v11760_v60  ;;  %v11840_v60 = vld [vmem:[%s13252_s12 + $0x5b4] ss:$48 sps:$4 sm:$0xff]  }
 0xee7   : > { %6329 = vmatpush1.bf16.msra.mxu1 %v11763_v35  ;;  %6244 = vmatprep.subr.bf16.mxu0 %v11768_v36  ;;  %v11843_v35 = vld [vmem:[%s13252_s12 + $0x5bc] ss:$48 sps:$4 sm:$0xff]   ;;  %v11838_v36 = vld [vmem:[%s13252_s12 + $0x5b0] ss:$48 sps:$4 sm:$0xff]  }
 0xee8   : > { %6330 = vmatprep.subr.bf16.mxu1 %v11771_v39  ;;  %v11841_v39 = vld [vmem:[%s13252_s12 + $0x5b8] ss:$48 sps:$4 sm:$0xff]  }
 0xeea   : > { %6245 = vmatpush1.bf16.msra.mxu0 %v11766_v41  ;;  %v11846_v41 = vld [vmem:[%s13252_s12 + $0x614] ss:$48 sps:$4 sm:$0xff]  }
 0xeeb   : > { %6331 = vmatpush1.bf16.msra.mxu1 %v11769_v7  ;;  %6246 = vmatprep.subr.bf16.mxu0 %v11774_v44  ;;  %v11849_v7 = vld [vmem:[%s13252_s12 + $0x61c] ss:$48 sps:$4 sm:$0xff]   ;;  %v11844_v44 = vld [vmem:[%s13252_s12 + $0x610] ss:$48 sps:$4 sm:$0xff]  }
 0xeec   : > { %6332 = vmatprep.subr.bf16.mxu1 %v11777_v47  ;;  %v11847_v47 = vld [vmem:[%s13252_s12 + $0x618] ss:$48 sps:$4 sm:$0xff]  }
 0xeee   : > { %6247 = vmatpush1.bf16.msra.mxu0 %v11772_v48  ;;  %v11852_v48 = vld [vmem:[%s13252_s12 + $0x674] ss:$48 sps:$4 sm:$0xff]  }
 0xeef   : > { %6333 = vmatpush1.bf16.msra.mxu1 %v11775_v49  ;;  %6248 = vmatprep.subr.bf16.mxu0 %v11780_v51  ;;  %v11855_v49 = vld [vmem:[%s13252_s12 + $0x67c] ss:$48 sps:$4 sm:$0xff]   ;;  %v11850_v51 = vld [vmem:[%s13252_s12 + $0x670] ss:$48 sps:$4 sm:$0xff]  }
 0xef0   : > { %6334 = vmatprep.subr.bf16.mxu1 %v11783_v52  ;;  %v11853_v52 = vld [vmem:[%s13252_s12 + $0x678] ss:$48 sps:$4 sm:$0xff]  }
 0xef2   : > { %6249 = vmatpush1.bf16.msra.mxu0 %v11778_v54  ;;  %v11858_v54 = vld [vmem:[%s13252_s12 + $0x6d4] ss:$48 sps:$4 sm:$0xff]  }
 0xef3   : > { %6335 = vmatpush1.bf16.msra.mxu1 %v11781_v57  ;;  %6250 = vmatprep.subr.bf16.mxu0 %v11786_v59  ;;  %v11861_v57 = vld [vmem:[%s13252_s12 + $0x6dc] ss:$48 sps:$4 sm:$0xff]   ;;  %v11856_v59 = vld [vmem:[%s13252_s12 + $0x6d0] ss:$48 sps:$4 sm:$0xff]  }
 0xef4   : > { %6336 = vmatprep.subr.bf16.mxu1 %v11789_v18  ;;  %v11859_v18 = vld [vmem:[%s13252_s12 + $0x6d8] ss:$48 sps:$4 sm:$0xff]  }
 0xef6   : > { %6251 = vmatpush1.bf16.msra.mxu0 %v11784_v56  ;;  %v11864_v56 = vld [vmem:[%s13252_s12 + $0x734] ss:$48 sps:$4 sm:$0xff]  }
 0xef7   : > { %6337 = vmatpush1.bf16.msra.mxu1 %v11787_v1  ;;  %6252 = vmatprep.subr.bf16.mxu0 %v11792_v4  ;;  %v11867_v1 = vld [vmem:[%s13252_s12 + $0x73c] ss:$48 sps:$4 sm:$0xff]   ;;  %v11862_v4 = vld [vmem:[%s13252_s12 + $0x730] ss:$48 sps:$4 sm:$0xff]  }
 0xef8   : > { %6338 = vmatprep.subr.bf16.mxu1 %v11795_v5  ;;  %v11865_v5 = vld [vmem:[%s13252_s12 + $0x738] ss:$48 sps:$4 sm:$0xff]  }
 0xefa   : > { %6253 = vmatpush1.bf16.msra.mxu0 %v11790_v6  ;;  %v11870_v6 = vld [vmem:[%s13252_s12 + $0x794] ss:$48 sps:$4 sm:$0xff]  }
 0xefb   : > { %6339 = vmatpush1.bf16.msra.mxu1 %v11793_v22  ;;  %6254 = vmatprep.subr.bf16.mxu0 %v11798_v9  ;;  %v11873_v22 = vld [vmem:[%s13252_s12 + $0x79c] ss:$48 sps:$4 sm:$0xff]   ;;  %v11868_v9 = vld [vmem:[%s13252_s12 + $0x790] ss:$48 sps:$4 sm:$0xff]  }
 0xefc   : > { %6340 = vmatprep.subr.bf16.mxu1 %v11801_v10  ;;  %v11871_v10 = vld [vmem:[%s13252_s12 + $0x798] ss:$48 sps:$4 sm:$0xff]  }
 0xefe   : > { %6255 = vmatpush1.bf16.msra.mxu0 %v11796_v11  ;;  %v11876_v11 = vld [vmem:[%s13252_s12 + $0x7f4] ss:$48 sps:$4 sm:$0xff]  }
 0xeff   : > { %6341 = vmatpush1.bf16.msra.mxu1 %v11799_v12  ;;  %6256 = vmatprep.subr.bf16.mxu0 %v11804_v50  ;;  %v11879_v12 = vld [vmem:[%s13252_s12 + $0x7fc] ss:$48 sps:$4 sm:$0xff]   ;;  %v11874_v50 = vld [vmem:[%s13252_s12 + $0x7f0] ss:$48 sps:$4 sm:$0xff]  }
 0xf00   : > { %6342 = vmatprep.subr.bf16.mxu1 %v11807_v15  ;;  %v11877_v15 = vld [vmem:[%s13252_s12 + $0x7f8] ss:$48 sps:$4 sm:$0xff]  }
 0xf02   : > { %6257 = vmatpush1.bf16.msra.mxu0 %v11802_v16  ;;  %v11882_v16 = vld [vmem:[%s13252_s12 + $0x854] ss:$48 sps:$4 sm:$0xff]  }
 0xf03   : > { %6343 = vmatpush1.bf16.msra.mxu1 %v11805_v8  ;;  %6258 = vmatprep.subr.bf16.mxu0 %v11810_v19  ;;  %v11885_v8 = vld [vmem:[%s13252_s12 + $0x85c] ss:$48 sps:$4 sm:$0xff]   ;;  %v11880_v19 = vld [vmem:[%s13252_s12 + $0x850] ss:$48 sps:$4 sm:$0xff]  }
 0xf04   : > { %6344 = vmatprep.subr.bf16.mxu1 %v11813_v14  ;;  %v11883_v14 = vld [vmem:[%s13252_s12 + $0x858] ss:$48 sps:$4 sm:$0xff]  }
 0xf06   : > { %6259 = vmatpush1.bf16.msra.mxu0 %v11808_v53  ;;  %v11888_v53 = vld [vmem:[%s13252_s12 + $0x8b4] ss:$48 sps:$4 sm:$0xff]  }
 0xf07   : > { %6345 = vmatpush1.bf16.msra.mxu1 %v11811_v13  ;;  %6260 = vmatprep.subr.bf16.mxu0 %v11816_v20  ;;  %v11891_v13 = vld [vmem:[%s13252_s12 + $0x8bc] ss:$48 sps:$4 sm:$0xff]   ;;  %v11886_v20 = vld [vmem:[%s13252_s12 + $0x8b0] ss:$48 sps:$4 sm:$0xff]  }
 0xf08   : > { %6346 = vmatprep.subr.bf16.mxu1 %v11819_v21  ;;  %v11889_v21 = vld [vmem:[%s13252_s12 + $0x8b8] ss:$48 sps:$4 sm:$0xff]  }
 0xf0a   : > { %6261 = vmatpush1.bf16.msra.mxu0 %v11814_v23  ;;  %v11894_v23 = vld [vmem:[%s13252_s12 + $0x24] ss:$48 sps:$4 sm:$0xff]  }
 0xf0b   : > { %6347 = vmatpush1.bf16.msra.mxu1 %v11817_v3  ;;  %6262 = vmatprep.subr.bf16.mxu0 %v11822_v24  ;;  %v11897_v3 = vld [vmem:[%s13252_s12 + $0x2c] ss:$48 sps:$4 sm:$0xff]   ;;  %v11892_v24 = vld [vmem:[%s13252_s12 + $0x20] ss:$48 sps:$4 sm:$0xff]  }
 0xf0c   : > { %6348 = vmatprep.subr.bf16.mxu1 %v11825_v61  ;;  %v11895_v61 = vld [vmem:[%s13252_s12 + $0x28] ss:$48 sps:$4 sm:$0xff]  }
 0xf0e   : > { %6263 = vmatpush1.bf16.msra.mxu0 %v11820_v63  ;;  %v11900_v63 = vld [vmem:[%s13252_s12 + $0x84] ss:$48 sps:$4 sm:$0xff]  }
 0xf0f   : > { %6349 = vmatpush1.bf16.msra.mxu1 %v11823_v17  ;;  %6264 = vmatprep.subr.bf16.mxu0 %v11828_v33  ;;  %v11903_v17 = vld [vmem:[%s13252_s12 + $0x8c] ss:$48 sps:$4 sm:$0xff]   ;;  %v11898_v33 = vld [vmem:[%s13252_s12 + $0x80] ss:$48 sps:$4 sm:$0xff]  }
 0xf10   : > { %6350 = vmatprep.subr.bf16.mxu1 %v11831_v29  ;;  %v11901_v29 = vld [vmem:[%s13252_s12 + $0x88] ss:$48 sps:$4 sm:$0xff]  }
 0xf12   : > { %6265 = vmatpush1.bf16.msra.mxu0 %v11826_v32  ;;  %v11906_v32 = vld [vmem:[%s13252_s12 + $0xe4] ss:$48 sps:$4 sm:$0xff]  }
 0xf13   : > { %6351 = vmatpush1.bf16.msra.mxu1 %v11829_v30  ;;  %6266 = vmatprep.subr.bf16.mxu0 %v11834_v31  ;;  %v11909_v30 = vld [vmem:[%s13252_s12 + $0xec] ss:$48 sps:$4 sm:$0xff]   ;;  %v11904_v31 = vld [vmem:[%s13252_s12 + $0xe0] ss:$48 sps:$4 sm:$0xff]  }
 0xf14   : > { %6352 = vmatprep.subr.bf16.mxu1 %v11837_v37  ;;  %v11907_v37 = vld [vmem:[%s13252_s12 + $0xe8] ss:$48 sps:$4 sm:$0xff]  }
 0xf16   : > { %6267 = vmatpush1.bf16.msra.mxu0 %v11832_v55  ;;  %v11912_v55 = vld [vmem:[%s13252_s12 + $0x144] ss:$48 sps:$4 sm:$0xff]  }
 0xf17   : > { %6353 = vmatpush1.bf16.msra.mxu1 %v11835_v34  ;;  %6268 = vmatprep.subr.bf16.mxu0 %v11840_v60  ;;  %v11915_v34 = vld [vmem:[%s13252_s12 + $0x14c] ss:$48 sps:$4 sm:$0xff]   ;;  %v11913_v60 = vld [vmem:[%s13252_s12 + $0x148] ss:$48 sps:$4 sm:$0xff]  }
 0xf18   : > { %6354 = vmatprep.subr.bf16.mxu1 %v11843_v35  ;;  %v11918_v35 = vld [vmem:[%s13252_s12 + $0x1a4] ss:$48 sps:$4 sm:$0xff]  }
 0xf1a   : > { %6269 = vmatpush1.bf16.msra.mxu0 %v11838_v36  ;;  %v11921_v36 = vld [vmem:[%s13252_s12 + $0x1ac] ss:$48 sps:$4 sm:$0xff]  }
 0xf1b   : > { %6355 = vmatpush1.bf16.msra.mxu1 %v11841_v39  ;;  %6281 = vmatprep.subr.bf16.mxu0 %v11846_v41  ;;  %v11916_v39 = vld [vmem:[%s13252_s12 + $0x1a0] ss:$48 sps:$4 sm:$0xff]   ;;  %v11919_v41 = vld [vmem:[%s13252_s12 + $0x1a8] ss:$48 sps:$4 sm:$0xff]  }
 0xf1c   : > { %6367 = vmatprep.subr.bf16.mxu1 %v11849_v7  ;;  %v11924_v7 = vld [vmem:[%s13252_s12 + $0x204] ss:$48 sps:$4 sm:$0xff]  }
 0xf1d   : > { %6271 = vmatmul.mubr.bf16.vlgmr.msra.gmra.mrb[48].mxu0 %v14021_v46 }
 0xf1e   : > { %6357 = vmatmul.mubr.bf16.vlgmr.msra.gmra.mrb[68].mxu1 %v14021_v46  ;;  %6282 = vmatpush1.bf16.msra.mxu0 %v11844_v44  ;;  %v11927_v44 = vld [vmem:[%s13252_s12 + $0x20c] ss:$48 sps:$4 sm:$0xff]  }
 0xf1f   : > { %6368 = vmatpush1.bf16.msra.mxu1 %v11847_v47  ;;  %6283 = vmatprep.subr.bf16.mxu0 %v11852_v48  ;;  %v11922_v47 = vld [vmem:[%s13252_s12 + $0x200] ss:$48 sps:$4 sm:$0xff]   ;;  %v11925_v48 = vld [vmem:[%s13252_s12 + $0x208] ss:$48 sps:$4 sm:$0xff]  }
 0xf20   : > { %6369 = vmatprep.subr.bf16.mxu1 %v11855_v49  ;;  %6313 = vmatprep.mubr.bf16.mxu0 %v12817_v2  ;;  %v11930_v49 = vld [vmem:[%s13252_s12 + $0x264] ss:$48 sps:$4 sm:$0xff]  }
 0xf21   : > { %6399 = vmatprep.mubr.bf16.mxu1 %v12817_v2 }
 0xf22   : > { %6284 = vmatpush1.bf16.msra.mxu0 %v11850_v51  ;;  %v11933_v51 = vld [vmem:[%s13252_s12 + $0x26c] ss:$48 sps:$4 sm:$0xff]  }
 0xf23   : > { %6370 = vmatpush1.bf16.msra.mxu1 %v11853_v52  ;;  %6285 = vmatprep.subr.bf16.mxu0 %v11858_v54  ;;  %v11928_v52 = vld [vmem:[%s13252_s12 + $0x260] ss:$48 sps:$4 sm:$0xff]   ;;  %v11931_v54 = vld [vmem:[%s13252_s12 + $0x268] ss:$48 sps:$4 sm:$0xff]  }
 0xf24   : > { %6371 = vmatprep.subr.bf16.mxu1 %v11861_v57  ;;  %v11936_v57 = vld [vmem:[%s13252_s12 + $0x2c4] ss:$48 sps:$4 sm:$0xff]  }
 0xf26   : > { %6286 = vmatpush1.bf16.msra.mxu0 %v11856_v59  ;;  %v11939_v59 = vld [vmem:[%s13252_s12 + $0x2cc] ss:$48 sps:$4 sm:$0xff]  }
 0xf27   : > { %6372 = vmatpush1.bf16.msra.mxu1 %v11859_v18  ;;  %6287 = vmatprep.subr.bf16.mxu0 %v11864_v56  ;;  %v11934_v18 = vld [vmem:[%s13252_s12 + $0x2c0] ss:$48 sps:$4 sm:$0xff]   ;;  %v11937_v56 = vld [vmem:[%s13252_s12 + $0x2c8] ss:$48 sps:$4 sm:$0xff]  }
 0xf28   : > { %6373 = vmatprep.subr.bf16.mxu1 %v11867_v1  ;;  %v11942_v1 = vld [vmem:[%s13252_s12 + $0x324] ss:$48 sps:$4 sm:$0xff]  }
 0xf2a   : > { %6288 = vmatpush1.bf16.msra.mxu0 %v11862_v4  ;;  %v11945_v4 = vld [vmem:[%s13252_s12 + $0x32c] ss:$48 sps:$4 sm:$0xff]  }
 0xf2b   : > { %6374 = vmatpush1.bf16.msra.mxu1 %v11865_v5  ;;  %6289 = vmatprep.subr.bf16.mxu0 %v11870_v6  ;;  %v11940_v5 = vld [vmem:[%s13252_s12 + $0x320] ss:$48 sps:$4 sm:$0xff]   ;;  %v11943_v6 = vld [vmem:[%s13252_s12 + $0x328] ss:$48 sps:$4 sm:$0xff]  }
 0xf2c   : > { %6375 = vmatprep.subr.bf16.mxu1 %v11873_v22  ;;  %v11948_v22 = vld [vmem:[%s13252_s12 + $0x384] ss:$48 sps:$4 sm:$0xff]  }
 0xf2e   : > { %6290 = vmatpush1.bf16.msra.mxu0 %v11868_v9  ;;  %v11951_v9 = vld [vmem:[%s13252_s12 + $0x38c] ss:$48 sps:$4 sm:$0xff]  }
 0xf2f   : > { %6376 = vmatpush1.bf16.msra.mxu1 %v11871_v10  ;;  %6291 = vmatprep.subr.bf16.mxu0 %v11876_v11  ;;  %v11946_v10 = vld [vmem:[%s13252_s12 + $0x380] ss:$48 sps:$4 sm:$0xff]   ;;  %v11949_v11 = vld [vmem:[%s13252_s12 + $0x388] ss:$48 sps:$4 sm:$0xff]  }
 0xf30   : > { %6377 = vmatprep.subr.bf16.mxu1 %v11879_v12  ;;  %v11954_v12 = vld [vmem:[%s13252_s12 + $0x3e4] ss:$48 sps:$4 sm:$0xff]  }
 0xf32   : > { %6292 = vmatpush1.bf16.msra.mxu0 %v11874_v50  ;;  %v11957_v50 = vld [vmem:[%s13252_s12 + $0x3ec] ss:$48 sps:$4 sm:$0xff]  }
 0xf33   : > { %6378 = vmatpush1.bf16.msra.mxu1 %v11877_v15  ;;  %6293 = vmatprep.subr.bf16.mxu0 %v11882_v16  ;;  %v11952_v15 = vld [vmem:[%s13252_s12 + $0x3e0] ss:$48 sps:$4 sm:$0xff]   ;;  %v11955_v16 = vld [vmem:[%s13252_s12 + $0x3e8] ss:$48 sps:$4 sm:$0xff]  }
 0xf34   : > { %6379 = vmatprep.subr.bf16.mxu1 %v11885_v8  ;;  %v11960_v8 = vld [vmem:[%s13252_s12 + $0x444] ss:$48 sps:$4 sm:$0xff]  }
 0xf36   : > { %6294 = vmatpush1.bf16.msra.mxu0 %v11880_v19  ;;  %v11963_v19 = vld [vmem:[%s13252_s12 + $0x44c] ss:$48 sps:$4 sm:$0xff]  }
 0xf37   : > { %6380 = vmatpush1.bf16.msra.mxu1 %v11883_v14  ;;  %6295 = vmatprep.subr.bf16.mxu0 %v11888_v53  ;;  %v11958_v14 = vld [vmem:[%s13252_s12 + $0x440] ss:$48 sps:$4 sm:$0xff]   ;;  %v11961_v53 = vld [vmem:[%s13252_s12 + $0x448] ss:$48 sps:$4 sm:$0xff]  }
 0xf38   : > { %6381 = vmatprep.subr.bf16.mxu1 %v11891_v13  ;;  %v11966_v13 = vld [vmem:[%s13252_s12 + $0x4a4] ss:$48 sps:$4 sm:$0xff]  }
 0xf3a   : > { %6296 = vmatpush1.bf16.msra.mxu0 %v11886_v20  ;;  %v11969_v20 = vld [vmem:[%s13252_s12 + $0x4ac] ss:$48 sps:$4 sm:$0xff]  }
 0xf3b   : > { %6382 = vmatpush1.bf16.msra.mxu1 %v11889_v21  ;;  %6410 = vmatprep.subr.bf16.mxu0 %v11894_v23  ;;  %v11964_v21 = vld [vmem:[%s13252_s12 + $0x4a0] ss:$48 sps:$4 sm:$0xff]   ;;  %v11967_v23 = vld [vmem:[%s13252_s12 + $0x4a8] ss:$48 sps:$4 sm:$0xff]  }
 0xf3c   : > { %6496 = vmatprep.subr.bf16.mxu1 %v11897_v3  ;;  %v11972_v3 = vld [vmem:[%s13252_s12 + $0x504] ss:$48 sps:$4 sm:$0xff]  }
 0xf3d   : > { %6314 = vmatmul.mubr.bf16.vlgmr.msra.gmra.mrb[48].mxu0 %v14073_v27 }
 0xf3e   : > { %6400 = vmatmul.mubr.bf16.vlgmr.msra.gmra.mrb[68].mxu1 %v14073_v27  ;;  %6411 = vmatpush1.bf16.msra.mxu0 %v11892_v24  ;;  %v11975_v24 = vld [vmem:[%s13252_s12 + $0x50c] ss:$48 sps:$4 sm:$0xff]  }
 0xf3f   : > { %6442 = vmatprep.mubr.bf16.mxu0 %v14015_v25  ;;  %6497 = vmatpush1.bf16.msra.mxu1 %v11895_v61  ;;  %v11970_v61 = vld [vmem:[%s13252_s12 + $0x500] ss:$48 sps:$4 sm:$0xff]  }
 0xf40   : > { %6528 = vmatprep.mubr.bf16.mxu1 %v14015_v25  ;;  %6412 = vmatprep.subr.bf16.mxu0 %v11900_v63  ;;  %v11910_v25 = vld [vmem:[%s13252_s12 + $0x140] ss:$48 sps:$4 sm:$0xff]   ;;  %v11973_v63 = vld [vmem:[%s13252_s12 + $0x508] ss:$48 sps:$4 sm:$0xff]  }
 0xf41   : > { %6498 = vmatprep.subr.bf16.mxu1 %v11903_v17  ;;  %v11978_v17 = vld [vmem:[%s13252_s12 + $0x564] ss:$48 sps:$4 sm:$0xff]  }
 0xf42   : > { %6413 = vmatpush1.bf16.msra.mxu0 %v11898_v33  ;;  %v11981_v33 = vld [vmem:[%s13252_s12 + $0x56c] ss:$48 sps:$4 sm:$0xff]  }
 0xf43   : > { %6499 = vmatpush1.bf16.msra.mxu1 %v11901_v29  ;;  %6414 = vmatprep.subr.bf16.mxu0 %v11906_v32  ;;  %v11976_v29 = vld [vmem:[%s13252_s12 + $0x560] ss:$48 sps:$4 sm:$0xff]   ;;  %v11979_v32 = vld [vmem:[%s13252_s12 + $0x568] ss:$48 sps:$4 sm:$0xff]  }
 0xf44   : > { %6500 = vmatprep.subr.bf16.mxu1 %v11909_v30  ;;  %v11984_v30 = vld [vmem:[%s13252_s12 + $0x5c4] ss:$48 sps:$4 sm:$0xff]  }
 0xf46   : > { %6415 = vmatpush1.bf16.msra.mxu0 %v11904_v31  ;;  %v11987_v31 = vld [vmem:[%s13252_s12 + $0x5cc] ss:$48 sps:$4 sm:$0xff]  }
 0xf47   : > { %6501 = vmatpush1.bf16.msra.mxu1 %v11907_v37  ;;  %6416 = vmatprep.subr.bf16.mxu0 %v11912_v55  ;;  %v11982_v37 = vld [vmem:[%s13252_s12 + $0x5c0] ss:$48 sps:$4 sm:$0xff]   ;;  %v11985_v55 = vld [vmem:[%s13252_s12 + $0x5c8] ss:$48 sps:$4 sm:$0xff]  }
 0xf48   : > { %6502 = vmatprep.subr.bf16.mxu1 %v11915_v34  ;;  %v11990_v34 = vld [vmem:[%s13252_s12 + $0x624] ss:$48 sps:$4 sm:$0xff]  }
 0xf4a   : > { %6417 = vmatpush1.bf16.msra.mxu0 %v11910_v25  ;;  %v11993_v25 = vld [vmem:[%s13252_s12 + $0x62c] ss:$48 sps:$4 sm:$0xff]  }
 0xf4b   : > { %6503 = vmatpush1.bf16.msra.mxu1 %v11913_v60  ;;  %6418 = vmatprep.subr.bf16.mxu0 %v11918_v35  ;;  %v11988_v60 = vld [vmem:[%s13252_s12 + $0x620] ss:$48 sps:$4 sm:$0xff]   ;;  %v11991_v35 = vld [vmem:[%s13252_s12 + $0x628] ss:$48 sps:$4 sm:$0xff]  }
 0xf4c   : > { %6504 = vmatprep.subr.bf16.mxu1 %v11921_v36  ;;  %v11996_v36 = vld [vmem:[%s13252_s12 + $0x684] ss:$48 sps:$4 sm:$0xff]  }
 0xf4e   : > { %6419 = vmatpush1.bf16.msra.mxu0 %v11916_v39  ;;  %v11999_v39 = vld [vmem:[%s13252_s12 + $0x68c] ss:$48 sps:$4 sm:$0xff]  }
 0xf4f   : > { %6505 = vmatpush1.bf16.msra.mxu1 %v11919_v41  ;;  %6420 = vmatprep.subr.bf16.mxu0 %v11924_v7  ;;  %v11994_v41 = vld [vmem:[%s13252_s12 + $0x680] ss:$48 sps:$4 sm:$0xff]   ;;  %v11997_v7 = vld [vmem:[%s13252_s12 + $0x688] ss:$48 sps:$4 sm:$0xff]  }
 0xf50   : > { %6506 = vmatprep.subr.bf16.mxu1 %v11927_v44  ;;  %v12002_v44 = vld [vmem:[%s13252_s12 + $0x6e4] ss:$48 sps:$4 sm:$0xff]  }
 0xf52   : > { %6421 = vmatpush1.bf16.msra.mxu0 %v11922_v47  ;;  %v12005_v47 = vld [vmem:[%s13252_s12 + $0x6ec] ss:$48 sps:$4 sm:$0xff]  }
 0xf53   : > { %6507 = vmatpush1.bf16.msra.mxu1 %v11925_v48  ;;  %6422 = vmatprep.subr.bf16.mxu0 %v11930_v49  ;;  %v12003_v48 = vld [vmem:[%s13252_s12 + $0x6e8] ss:$48 sps:$4 sm:$0xff]   ;;  %v12008_v49 = vld [vmem:[%s13252_s12 + $0x744] ss:$48 sps:$4 sm:$0xff]  }
 0xf54   : > { %6508 = vmatprep.subr.bf16.mxu1 %v11933_v51  ;;  %v12011_v51 = vld [vmem:[%s13252_s12 + $0x74c] ss:$48 sps:$4 sm:$0xff]  }
 0xf56   : > { %6423 = vmatpush1.bf16.msra.mxu0 %v11928_v52  ;;  %v12006_v52 = vld [vmem:[%s13252_s12 + $0x740] ss:$48 sps:$4 sm:$0xff]  }
 0xf57   : > { %6509 = vmatpush1.bf16.msra.mxu1 %v11931_v54  ;;  %6424 = vmatprep.subr.bf16.mxu0 %v11936_v57  ;;  %v12009_v54 = vld [vmem:[%s13252_s12 + $0x748] ss:$48 sps:$4 sm:$0xff]   ;;  %v12017_v57 = vld [vmem:[%s13252_s12 + $0x7ac] ss:$48 sps:$4 sm:$0xff]  }
 0xf58   : > { %6510 = vmatprep.subr.bf16.mxu1 %v11939_v59  ;;  %v12012_v59 = vld [vmem:[%s13252_s12 + $0x7a0] ss:$48 sps:$4 sm:$0xff]  }
 0xf5a   : > { %6425 = vmatpush1.bf16.msra.mxu0 %v11934_v18  ;;  %v12015_v18 = vld [vmem:[%s13252_s12 + $0x7a8] ss:$48 sps:$4 sm:$0xff]  }
 0xf5b   : > { %6511 = vmatpush1.bf16.msra.mxu1 %v11937_v56  ;;  %6426 = vmatprep.subr.bf16.mxu0 %v11942_v1  ;;  %v12020_v56 = vld [vmem:[%s13252_s12 + $0x804] ss:$48 sps:$4 sm:$0xff]   ;;  %v12023_v1 = vld [vmem:[%s13252_s12 + $0x80c] ss:$48 sps:$4 sm:$0xff]  }
 0xf5c   : > { %6512 = vmatprep.subr.bf16.mxu1 %v11945_v4  ;;  %v12018_v4 = vld [vmem:[%s13252_s12 + $0x800] ss:$48 sps:$4 sm:$0xff]  }
 0xf5e   : > { %6427 = vmatpush1.bf16.msra.mxu0 %v11940_v5  ;;  %v12021_v5 = vld [vmem:[%s13252_s12 + $0x808] ss:$48 sps:$4 sm:$0xff]  }
 0xf5f   : > { %6513 = vmatpush1.bf16.msra.mxu1 %v11943_v6  ;;  %6428 = vmatprep.subr.bf16.mxu0 %v11948_v22  ;;  %v12026_v6 = vld [vmem:[%s13252_s12 + $0x864] ss:$48 sps:$4 sm:$0xff]   ;;  %v12029_v22 = vld [vmem:[%s13252_s12 + $0x86c] ss:$48 sps:$4 sm:$0xff]  }
 0xf60   : > { %6514 = vmatprep.subr.bf16.mxu1 %v11951_v9  ;;  %v12024_v9 = vld [vmem:[%s13252_s12 + $0x860] ss:$48 sps:$4 sm:$0xff]  }
 0xf62   : > { %6429 = vmatpush1.bf16.msra.mxu0 %v11946_v10  ;;  %v12027_v10 = vld [vmem:[%s13252_s12 + $0x868] ss:$48 sps:$4 sm:$0xff]  }
 0xf63   : > { %6515 = vmatpush1.bf16.msra.mxu1 %v11949_v11  ;;  %6430 = vmatprep.subr.bf16.mxu0 %v11954_v12  ;;  %v12032_v11 = vld [vmem:[%s13252_s12 + $0x8c4] ss:$48 sps:$4 sm:$0xff]   ;;  %v12035_v12 = vld [vmem:[%s13252_s12 + $0x8cc] ss:$48 sps:$4 sm:$0xff]  }
 0xf64   : > { %6516 = vmatprep.subr.bf16.mxu1 %v11957_v50  ;;  %v12030_v50 = vld [vmem:[%s13252_s12 + $0x8c0] ss:$48 sps:$4 sm:$0xff]  }
 0xf66   : > { %6431 = vmatpush1.bf16.msra.mxu0 %v11952_v15  ;;  %v12033_v15 = vld [vmem:[%s13252_s12 + $0x8c8] ss:$48 sps:$4 sm:$0xff]  }
 0xf67   : > { %6517 = vmatpush1.bf16.msra.mxu1 %v11955_v16  ;;  %6432 = vmatprep.subr.bf16.mxu0 %v11960_v8  ;;  %v12038_v16 = vld [vmem:[%s13260_s21 + $0x4] ss:$12 sps:$4 sm:$0xff]   ;;  %v12039_v8 = vld [vmem:[%s13260_s21 + $0xc8] ss:$12 sps:$4 sm:$0xff]  }
 0xf68   : > { %6518 = vmatprep.subr.bf16.mxu1 %v11963_v19  ;;  %v12036_v19 = vld [vmem:[%s13260_s21] ss:$12 sps:$4 sm:$0xff]  }
 0xf6a   : > { %6433 = vmatpush1.bf16.msra.mxu0 %v11958_v14  ;;  %v12040_v14 = vld [vmem:[%s13260_s21 + $0x8] ss:$12 sps:$4 sm:$0xff]  }
 0xf6b   : > { %6519 = vmatpush1.bf16.msra.mxu1 %v11961_v53  ;;  %6434 = vmatprep.subr.bf16.mxu0 %v11966_v13  ;;  %v12043_v53 = vld [vmem:[%s13260_s21 + $0x1c] ss:$12 sps:$4 sm:$0xff]   ;;  %v12044_v13 = vld [vmem:[%s13260_s21 + $0xe0] ss:$12 sps:$4 sm:$0xff]  }
 0xf6c   : > { %6520 = vmatprep.subr.bf16.mxu1 %v11969_v20  ;;  %v12041_v20 = vld [vmem:[%s13260_s21 + $0x18] ss:$12 sps:$4 sm:$0xff]  }
 0xf6e   : > { %6435 = vmatpush1.bf16.msra.mxu0 %v11964_v21  ;;  %v12045_v21 = vld [vmem:[%s13260_s21 + $0x20] ss:$12 sps:$4 sm:$0xff]  }
 0xf6f   : > { %6521 = vmatpush1.bf16.msra.mxu1 %v11967_v23  ;;  %6436 = vmatprep.subr.bf16.mxu0 %v11972_v3  ;;  %v12048_v23 = vld [vmem:[%s13260_s21 + $0x34] ss:$12 sps:$4 sm:$0xff]   ;;  %v12049_v3 = vld [vmem:[%s13260_s21 + $0xf8] ss:$12 sps:$4 sm:$0xff]  }
 0xf70   : > { %6522 = vmatprep.subr.bf16.mxu1 %v11975_v24  ;;  %v12046_v24 = vld [vmem:[%s13260_s21 + $0x30] ss:$12 sps:$4 sm:$0xff]  }
 0xf72   : > { %6437 = vmatpush1.bf16.msra.mxu0 %v11970_v61  ;;  %v12053_v61 = vld [vmem:[%s13260_s21 + $0x4c] ss:$12 sps:$4 sm:$0xff]  }
 0xf73   : > { %6523 = vmatpush1.bf16.msra.mxu1 %v11973_v63  ;;  %6438 = vmatprep.subr.bf16.mxu0 %v11978_v17  ;;  %v12054_v63 = vld [vmem:[%s13260_s21 + $0x110] ss:$12 sps:$4 sm:$0xff]   ;;  %v12051_v17 = vld [vmem:[%s13260_s21 + $0x48] ss:$12 sps:$4 sm:$0xff]  }
 0xf74   : > { %6524 = vmatprep.subr.bf16.mxu1 %v11981_v33  ;;  %v12055_v33 = vld [vmem:[%s13260_s21 + $0x50] ss:$12 sps:$4 sm:$0xff]  }
 0xf76   : > { %6439 = vmatpush1.bf16.msra.mxu0 %v11976_v29  ;;  %v12058_v29 = vld [vmem:[%s13260_s21 + $0x64] ss:$12 sps:$4 sm:$0xff]  }
 0xf77   : > { %6525 = vmatpush1.bf16.msra.mxu1 %v11979_v32  ;;  %6440 = vmatprep.subr.bf16.mxu0 %v11984_v30  ;;  %v12059_v32 = vld [vmem:[%s13260_s21 + $0x128] ss:$12 sps:$4 sm:$0xff]   ;;  %v12056_v30 = vld [vmem:[%s13260_s21 + $0x60] ss:$12 sps:$4 sm:$0xff]  }
 0xf78   : > { %6526 = vmatprep.subr.bf16.mxu1 %v11987_v31  ;;  %v14302_v31 = vld [vmem:[%s13258_s13] sm:$0xff] }
 0xf7a   : > { %6441 = vmatpush1.bf16.msra.mxu0 %v11982_v37  ;;  %v4580_v37 = vsub.s32 3, %v13603_v28 }
 0xf7b   : > { %6527 = vmatpush1.bf16.msra.mxu1 %v11985_v55  ;;  %6453 = vmatprep.subr.bf16.mxu0 %v11990_v34  ;;  %v12060_v55 = vld [vmem:[%s13260_s21 + $0x68] ss:$12 sps:$4 sm:$0xff]  }
 0xf7c   : > { %6539 = vmatprep.subr.bf16.mxu1 %v11993_v25  ;;  %v12063_v34 = vld [vmem:[%s13260_s21 + $0x7c] ss:$12 sps:$4 sm:$0xff]   ;;  %v12064_v25 = vld [vmem:[%s13260_s21 + $0x140] ss:$12 sps:$4 sm:$0xff]  }
 0xf7d   : > { %6443 = vmatmul.mubr.bf16.vlgmr.msra.gmra.mrb[52].mxu0 %v14021_v46 }
 0xf7e   : > { %6529 = vmatmul.mubr.bf16.vlgmr.msra.gmra.mrb[72].mxu1 %v14021_v46  ;;  %6454 = vmatpush1.bf16.msra.mxu0 %v11988_v60  ;;  %v12000_v46 = vld [vmem:[%s13252_s12 + $0x6e0] ss:$48 sps:$4 sm:$0xff]   ;;  %v4569_v60 = vrot.slane %v14302_v31, %v13993_v42 }
 0xf7f   : > { %6540 = vmatpush1.bf16.msra.mxu1 %v11991_v35  ;;  %6455 = vmatprep.subr.bf16.mxu0 %v11996_v36  ;;  %v4577_v35 = vrot.slane %v14302_v31, %v14048_v62  ;;  %v4573_v36 = vrot.slane %v14302_v31, %v13987_v0 }
 0xf80   : > { %6541 = vmatprep.subr.bf16.mxu1 %v11999_v39  ;;  %6485 = vmatprep.mubr.bf16.mxu0 %v12817_v2  ;;  %v4581_v39 = vrot.slane %v14302_v31, %v4580_v37 }
 0xf81   : > { %6571 = vmatprep.mubr.bf16.mxu1 %v12817_v2  ;;  %v12014_v2 = vld [vmem:[%s13252_s12 + $0x7a4] ss:$48 sps:$4 sm:$0xff]  }
 0xf82   : > { %6456 = vmatpush1.bf16.msra.mxu0 %v11994_v41  ;;  %v12061_v41 = vld [vmem:[%s13260_s21 + $0x78] ss:$12 sps:$4 sm:$0xff]  }
 0xf83   : > { %6542 = vmatpush1.bf16.msra.mxu1 %v11997_v7  ;;  %6457 = vmatprep.subr.bf16.mxu0 %v12002_v44  ;;  %v12065_v7 = vld [vmem:[%s13260_s21 + $0x80] ss:$12 sps:$4 sm:$0xff]  }
 0xf84   : > { %6543 = vmatprep.subr.bf16.mxu1 %v12005_v47  ;;  %v12068_v44 = vld [vmem:[%s13260_s21 + $0x94] ss:$12 sps:$4 sm:$0xff]  }
 0xf86   : > { %6458 = vmatpush1.bf16.msra.mxu0 %v12000_v46 }
 0xf87   : > { %6544 = vmatpush1.bf16.msra.mxu1 %v12003_v48  ;;  %6459 = vmatprep.subr.bf16.mxu0 %v12008_v49  ;;  %v12069_v48 = vld [vmem:[%s13260_s21 + $0x158] ss:$12 sps:$4 sm:$0xff]  }
 0xf88   : > { %6545 = vmatprep.subr.bf16.mxu1 %v12011_v51 }
 0xf8a   : > { %6460 = vmatpush1.bf16.msra.mxu0 %v12006_v52 }
 0xf8b   : > { %6546 = vmatpush1.bf16.msra.mxu1 %v12009_v54  ;;  %6461 = vmatprep.subr.bf16.mxu0 %v12014_v2 }
 0xf8c   : > { %6547 = vmatprep.subr.bf16.mxu1 %v12017_v57 }
 0xf8e   : > { %6462 = vmatpush1.bf16.msra.mxu0 %v12012_v59 }
 0xf8f   : > { %6548 = vmatpush1.bf16.msra.mxu1 %v12015_v18  ;;  %6463 = vmatprep.subr.bf16.mxu0 %v12020_v56  ;;  %v12066_v56 = vld [vmem:[%s13260_s21 + $0x90] ss:$12 sps:$4 sm:$0xff]  }
 0xf90   : > { %6549 = vmatprep.subr.bf16.mxu1 %v12023_v1 }
 0xf92   : > { %6464 = vmatpush1.bf16.msra.mxu0 %v12018_v4 }
 0xf93   : > { %6550 = vmatpush1.bf16.msra.mxu1 %v12021_v5  ;;  %6465 = vmatprep.subr.bf16.mxu0 %v12026_v6 }
 0xf94   : > { %6551 = vmatprep.subr.bf16.mxu1 %v12029_v22  ;;  %v12070_v22 = vld [vmem:[%s13260_s21 + $0x98] ss:$12 sps:$4 sm:$0xff]  }
 0xf96   : > { %6466 = vmatpush1.bf16.msra.mxu0 %v12024_v9  ;;  %v12073_v9 = vld [vmem:[%s13260_s21 + $0xac] ss:$12 sps:$4 sm:$0xff]  }
 0xf97   : > { %6552 = vmatpush1.bf16.msra.mxu1 %v12027_v10  ;;  %6467 = vmatprep.subr.bf16.mxu0 %v12032_v11 }
 0xf98   : > { %6553 = vmatprep.subr.bf16.mxu1 %v12035_v12  ;;  %v12074_v12 = vld [vmem:[%s13260_s21 + $0x170] ss:$12 sps:$4 sm:$0xff]  }
 0xf9a   : > { %6468 = vmatpush1.bf16.msra.mxu0 %v12030_v50 }
 0xf9b   : > { %6554 = vmatpush1.bf16.msra.mxu1 %v12033_v15  ;;  %8555 = vmatprep.subr.bf16.mxu0 %v12038_v16 }
 0xf9c   : > { %10607 = vmatprep.subr.bf16.mxu1 %v12039_v8 }
 0xf9d   : > { %6486 = vmatmul.mubr.bf16.vlgmr.msra.gmra.mrb[52].mxu0 %v14073_v27 }
 0xf9e   : > { %6572 = vmatmul.mubr.bf16.vlgmr.msra.gmra.mrb[72].mxu1 %v14073_v27  ;;  %8556 = vmatpush1.bf16.msra.mxu0 %v12036_v19  ;;  %v12050_v27 = vld [vmem:[%s13260_s21 + $0x38] ss:$12 sps:$4 sm:$0xff]  }
 0xf9f   : > { %10608 = vmatpush3.bf16.msra.mxu1 %v12040_v14  ;;  %8557 = vmatprep.subr.bf16.mxu0 %v12043_v53 }
 0xfa0   : > { %10609 = vmatprep.subr.bf16.mxu1 %v12044_v13 }
 0xfa2   : > { %8558 = vmatpush1.bf16.msra.mxu0 %v12041_v20  ;;  %v12071_v20 = vld [vmem:[%s13260_s21 + $0xa8] ss:$12 sps:$4 sm:$0xff]  }
 0xfa3   : > { %10610 = vmatpush3.bf16.msra.mxu1 %v12045_v21  ;;  %8559 = vmatprep.subr.bf16.mxu0 %v12048_v23 }
 0xfa4   : > { %10611 = vmatprep.subr.bf16.mxu1 %v12049_v3  ;;  %v12075_v3 = vld [vmem:[%s13260_s21 + $0xb0] ss:$12 sps:$4 sm:$0xff]  }
 0xfa6   : > { %8560 = vmatpush1.bf16.msra.mxu0 %v12046_v24 }
 0xfa7   : > { %10612 = vmatpush3.bf16.msra.mxu1 %v12050_v27  ;;  %8561 = vmatprep.subr.bf16.mxu0 %v12053_v61  ;;  %v12078_v61 = vld [vmem:[%s13260_s21 + $0xc4] ss:$12 sps:$4 sm:$0xff]  }
 0xfa8   : > { %10613 = vmatprep.subr.bf16.mxu1 %v12054_v63  ;;  %v12079_v63 = vld [vmem:[%s13260_s21 + $0x248] ss:$12 sps:$4 sm:$0xff]  }
 0xfaa   : > { %8562 = vmatpush1.bf16.msra.mxu0 %v12051_v17  ;;  %v12076_v17 = vld [vmem:[%s13260_s21 + $0xc0] ss:$12 sps:$4 sm:$0xff]  }
 0xfab   : > { %10614 = vmatpush3.bf16.msra.mxu1 %v12055_v33  ;;  %8563 = vmatprep.subr.bf16.mxu0 %v12058_v29  ;;  %v12080_v33 = vld [vmem:[%s13260_s21 + $0x188] ss:$12 sps:$4 sm:$0xff]  }
 0xfac   : > { %10615 = vmatprep.subr.bf16.mxu1 %v12059_v32  ;;  %v12083_v29 = vld [vmem:[%s13260_s21 + $0xdc] ss:$12 sps:$4 sm:$0xff]   ;;  %v12084_v32 = vld [vmem:[%s13260_s21 + $0x260] ss:$12 sps:$4 sm:$0xff]  }
 0xfae   : > { %8564 = vmatpush1.bf16.msra.mxu0 %v12056_v30  ;;  %v12081_v30 = vld [vmem:[%s13260_s21 + $0xd8] ss:$12 sps:$4 sm:$0xff]  }
 0xfaf   : > { %10616 = vmatpush3.bf16.msra.mxu1 %v12060_v55  ;;  %8565 = vmatprep.subr.bf16.mxu0 %v12063_v34  ;;  %v12085_v55 = vld [vmem:[%s13260_s21 + $0x1a0] ss:$12 sps:$4 sm:$0xff]  }
 0xfb0   : > { %v6143_v47 = vpop.f32.mrb[44].mxu0  ;;  %v6229_v46 = vpop.f32.mrb[64].mxu1  ;;  %10617 = vmatprep.subr.bf16.mxu1 %v12064_v25  ;;  %v12088_v34 = vld [vmem:[%s13260_s21 + $0xf4] ss:$12 sps:$4 sm:$0xff]   ;;  %v12089_v25 = vld [vmem:[%s13260_s21 + $0x278] ss:$12 sps:$4 sm:$0xff]  }
 0xfb1   : > { %v10970_v49 = vadd.f32 %v6143_v47, %v4569_v60  ;;  %v10974_v51 = vadd.f32 %v6229_v46, %v4577_v35  ;;  %v6145_v52 = vpop.f32.mrb[45].mxu0  ;;  %v6231_v54 = vpop.f32.mrb[65].mxu1  ;;  %v12099_v47 = vld [vmem:[%s13260_s21 + $0x2a8] ss:$12 sps:$4 sm:$0xff]   ;;  %v12096_v46 = vld [vmem:[%s13260_s21 + $0x120] ss:$12 sps:$4 sm:$0xff]  }
 0xfb2   : > { %v10971_v2 = vadd.f32 %v6145_v52, %v4573_v36  ;;  %v10975_v57 = vadd.f32 %v6231_v54, %v4581_v39  ;;  %v6147_v59 = vpop.f32.mrb[46].mxu0  ;;  %v6233_v18 = vpop.f32.mrb[66].mxu1  ;;  %8566 = vmatpush1.bf16.msra.mxu0 %v12061_v41  ;;  %v12091_v41 = vld [vmem:[%s13260_s21 + $0x108] ss:$12 sps:$4 sm:$0xff]   ;;  %v12101_v52 = vld [vmem:[%s13260_s21 + $0x138] ss:$12 sps:$4 sm:$0xff]  }
 0xfb3   : > { %v10972_v1 = vadd.f32 %v6147_v59, %v4569_v60  ;;  %v10976_v4 = vadd.f32 %v6233_v18, %v4577_v35  ;;  %10618 = vmatpush3.bf16.msra.mxu1 %v12065_v7  ;;  %v6149_v5 = vpop.f32.mrb[47].mxu0  ;;  %v6235_v6 = vpop.f32.mrb[67].mxu1  ;;  %8567 = vmatprep.subr.bf16.mxu0 %v12068_v44  ;;  %v6582_v50 = vmax.f32 %v10970_v49, 0.0  ;;  %v6584_v15 = vmax.f32 %v10974_v51, 0.0  ;;  %v12086_v60 = vld [vmem:[%s13260_s21 + $0xf0] ss:$12 sps:$4 sm:$0xff]  }
 0xfb4   : > { %v10973_v10 = vadd.f32 %v6149_v5, %v4573_v36  ;;  %v10977_v11 = vadd.f32 %v6235_v6, %v4581_v39  ;;  %10619 = vmatprep.subr.bf16.mxu1 %v12069_v48  ;;  %v6583_v19 = vmax.f32 %v10971_v2, 0.0  ;;  %v6585_v14 = vmax.f32 %v10975_v57, 0.0  ;;  %v12090_v35 = vld [vmem:[%s13260_s21 + $0x1b8] ss:$12 sps:$4 sm:$0xff]   ;;  %v12094_v39 = vld [vmem:[%s13260_s21 + $0x290] ss:$12 sps:$4 sm:$0xff]  }
 0xfb5   : > { %v6594_v16 = vmax.f32 %v10972_v1, 0.0  ;;  %v6596_v8 = vmax.f32 %v10976_v4, 0.0  ;;  %v12093_v36 = vld [vmem:[%s13260_s21 + $0x10c] ss:$12 sps:$4 sm:$0xff]   ;;  %v12095_v7 = vld [vmem:[%s13260_s21 + $0x1d0] ss:$12 sps:$4 sm:$0xff]  }
 0xfb6   : > { %v6595_v53 = vmax.f32 %v10973_v10, 0.0  ;;  %v6597_v13 = vmax.f32 %v10977_v11, 0.0  ;;  %8568 = vmatpush1.bf16.msra.mxu0 %v12066_v56  ;;  %v12098_v44 = vld [vmem:[%s13260_s21 + $0x124] ss:$12 sps:$4 sm:$0xff]   ;;  %v12100_v48 = vld [vmem:[%s13260_s21 + $0x1e8] ss:$12 sps:$4 sm:$0xff]  }
 0xfb7   : > { %v14326_v21 = vpack.c.bf16 %v6594_v16, %v6582_v50  ;;  %v14328_v23 = vpack.c.bf16 %v6596_v8, %v6584_v15  ;;  %10620 = vmatpush3.bf16.msra.mxu1 %v12070_v22  ;;  %8569 = vmatprep.subr.bf16.mxu0 %v12073_v9  ;;  %v12103_v49 = vld [vmem:[%s13260_s21 + $0x13c] ss:$12 sps:$4 sm:$0xff]   ;;  %v12104_v51 = vld [vmem:[%s13260_s21 + $0x2c0] ss:$12 sps:$4 sm:$0xff]   ;;  %v12109_v57 = vld [vmem:[%s13260_s21 + $0x2d8] ss:$12 sps:$4 sm:$0xff]  }
 0xfb8   : > { %v6607_v24 = vpack.c.bf16 %v6595_v53, %v6583_v19  ;;  %v14331_v27 = vpack.c.bf16 %v6597_v13, %v6585_v14  ;;  %10621 = vmatprep.subr.bf16.mxu1 %v12074_v12  ;;  %v12105_v54 = vld [vmem:[%s13260_s21 + $0x200] ss:$12 sps:$4 sm:$0xff]   ;;  %v12106_v59 = vld [vmem:[%s13260_s21 + $0x150] ss:$12 sps:$4 sm:$0xff]   ;;  %v12110_v18 = vld [vmem:[%s13260_s21 + $0x218] ss:$12 sps:$4 sm:$0xff]  }
 0xfb9   : > { %v12108_v2 = vld [vmem:[%s13260_s21 + $0x154] ss:$12 sps:$4 sm:$0xff]   ;;  %v12113_v56 = vld [vmem:[%s13260_s21 + $0x16c] ss:$12 sps:$4 sm:$0xff]   ;;  %v12114_v1 = vld [vmem:[%s13260_s21 + $0x2f0] ss:$12 sps:$4 sm:$0xff]  }
 0xfba   : > { %8570 = vmatpush1.bf16.msra.mxu0 %v12071_v20  ;;  %8587 = vmatprep.mubr.bf16.mxu0 %v6607_v24  ;;  %v12111_v4 = vld [vmem:[%s13260_s21 + $0x168] ss:$12 sps:$4 sm:$0xff]   ;;  %v12115_v5 = vld [vmem:[%s13260_s21 + $0x230] ss:$12 sps:$4 sm:$0xff]   ;;  %v12116_v9 = vld [vmem:[%s13260_s21 + $0x180] ss:$12 sps:$4 sm:$0xff]  }
 0xfbb   : > { %10622 = vmatpush3.bf16.msra.mxu1 %v12075_v3  ;;  %8845 = vmatprep.mubr.bf16.mxu1 %v6607_v24  ;;  %v12118_v6 = vld [vmem:[%s13260_s21 + $0x184] ss:$12 sps:$4 sm:$0xff]   ;;  %v12140_v22 = vld [vmem:[%s13260_s21 + $0x3c8] ss:$12 sps:$4 sm:$0xff]   ;;  %v12145_v12 = vld [vmem:[%s13260_s21 + $0x3e0] ss:$12 sps:$4 sm:$0xff]  }
 0xfbc   : > { %8571 = vmatprep.subr.bf16.mxu0 %v12078_v61  ;;  %10629 = vmatprep.subr.bf16.mxu1 %v12079_v63  ;;  %v12121_v10 = vld [vmem:[%s13260_s21 + $0x19c] ss:$12 sps:$4 sm:$0xff]   ;;  %v12119_v50 = vld [vmem:[%s13260_s21 + $0x198] ss:$12 sps:$4 sm:$0xff]   ;;  %v12124_v15 = vld [vmem:[%s13260_s21 + $0x1b4] ss:$12 sps:$4 sm:$0xff]  }
 0xfbd   : > { %v12141_v11 = vld [vmem:[%s13260_s21 + $0x308] ss:$12 sps:$4 sm:$0xff]   ;;  %v12146_v16 = vld [vmem:[%s13260_s21 + $0x320] ss:$12 sps:$4 sm:$0xff]   ;;  %v12150_v8 = vld [vmem:[%s13260_s21 + $0x3f8] ss:$12 sps:$4 sm:$0xff]  }
 0xfbe   : > { %8846 = vmatmul.mubr.bf16.vlgmr.msra.gmra.mrb[76].mxu1 %v14326_v21  ;;  %8572 = vmatpush1.bf16.msra.mxu0 %v12076_v17  ;;  %v12122_v19 = vld [vmem:[%s13260_s21 + $0x1b0] ss:$12 sps:$4 sm:$0xff]   ;;  %v12127_v14 = vld [vmem:[%s13260_s21 + $0x1cc] ss:$12 sps:$4 sm:$0xff]   ;;  %v12125_v20 = vld [vmem:[%s13260_s21 + $0x1c8] ss:$12 sps:$4 sm:$0xff]  }
 0xfbf   : > { %10630 = vmatpush3.bf16.msra.mxu1 %v12080_v33  ;;  %8886 = vmatprep.mubr.bf16.mxu1 %v14331_v27  ;;  %v12151_v53 = vld [vmem:[%s13260_s21 + $0x338] ss:$12 sps:$4 sm:$0xff]   ;;  %v12155_v13 = vld [vmem:[%s13260_s21 + $0x410] ss:$12 sps:$4 sm:$0xff]   ;;  %v12160_v24 = vld [vmem:[%s13260_s21 + $0x428] ss:$12 sps:$4 sm:$0xff]  }
 0xfc0   : > { %8573 = vmatprep.subr.bf16.mxu0 %v12083_v29  ;;  %10631 = vmatprep.subr.bf16.mxu1 %v12084_v32  ;;  %v12156_v3 = vld [vmem:[%s13260_s21 + $0x350] ss:$12 sps:$4 sm:$0xff]   ;;  %v12161_v63 = vld [vmem:[%s13260_s21 + $0x368] ss:$12 sps:$4 sm:$0xff]   ;;  %v12165_v17 = vld [vmem:[%s13260_s21 + $0x440] ss:$12 sps:$4 sm:$0xff]  }
 0xfc1   : > { %v12133_v61 = vld [vmem:[%s13260_s21 + $0x1fc] ss:$12 sps:$4 sm:$0xff]   ;;  %v12131_v33 = vld [vmem:[%s13260_s21 + $0x1f8] ss:$12 sps:$4 sm:$0xff]   ;;  %v12136_v29 = vld [vmem:[%s13260_s21 + $0x214] ss:$12 sps:$4 sm:$0xff]  }
 0xfc2   : > { %8574 = vmatpush1.bf16.msra.mxu0 %v12081_v30  ;;  %v12166_v32 = vld [vmem:[%s13260_s21 + $0x380] ss:$12 sps:$4 sm:$0xff]   ;;  %v12170_v30 = vld [vmem:[%s13260_s21 + $0x458] ss:$12 sps:$4 sm:$0xff]  }
 0xfc3   : > { %10632 = vmatpush3.bf16.msra.mxu1 %v12085_v55  ;;  %8575 = vmatprep.subr.bf16.mxu0 %v12088_v34  ;;  %v12134_v55 = vld [vmem:[%s13260_s21 + $0x210] ss:$12 sps:$4 sm:$0xff]   ;;  %v12139_v34 = vld [vmem:[%s13260_s21 + $0x22c] ss:$12 sps:$4 sm:$0xff]  }
 0xfc4   : > { %10633 = vmatprep.subr.bf16.mxu1 %v12089_v25  ;;  %v12171_v25 = vld [vmem:[%s13260_s21 + $0x398] ss:$12 sps:$4 sm:$0xff]  }
 0xfc6   : > { %8576 = vmatpush1.bf16.msra.mxu0 %v12086_v60  ;;  %v12175_v60 = vld [vmem:[%s13260_s21 + $0x470] ss:$12 sps:$4 sm:$0xff]  }
 0xfc7   : > { %10634 = vmatpush3.bf16.msra.mxu1 %v12090_v35  ;;  %8577 = vmatprep.subr.bf16.mxu0 %v12093_v36  ;;  %v12137_v35 = vld [vmem:[%s13260_s21 + $0x228] ss:$12 sps:$4 sm:$0xff]   ;;  %v12144_v36 = vld [vmem:[%s13260_s21 + $0x244] ss:$12 sps:$4 sm:$0xff]  }
 0xfc8   : > { %10635 = vmatprep.subr.bf16.mxu1 %v12094_v39  ;;  %v12176_v39 = vld [vmem:[%s13260_s21 + $0x3b0] ss:$12 sps:$4 sm:$0xff]  }
 0xfca   : > { %8578 = vmatpush1.bf16.msra.mxu0 %v12091_v41  ;;  %v12180_v41 = vld [vmem:[%s13260_s21 + $0x548] ss:$12 sps:$4 sm:$0xff]  }
 0xfcb   : > { %10636 = vmatpush3.bf16.msra.mxu1 %v12095_v7  ;;  %8579 = vmatprep.subr.bf16.mxu0 %v12098_v44  ;;  %v12142_v7 = vld [vmem:[%s13260_s21 + $0x240] ss:$12 sps:$4 sm:$0xff]   ;;  %v12149_v44 = vld [vmem:[%s13260_s21 + $0x25c] ss:$12 sps:$4 sm:$0xff]  }
 0xfcc   : > { %10637 = vmatprep.subr.bf16.mxu1 %v12099_v47  ;;  %v12147_v47 = vld [vmem:[%s13260_s21 + $0x258] ss:$12 sps:$4 sm:$0xff]  }
 0xfce   : > { %8580 = vmatpush1.bf16.msra.mxu0 %v12096_v46  ;;  %v12154_v46 = vld [vmem:[%s13260_s21 + $0x274] ss:$12 sps:$4 sm:$0xff]  }
 0xfcf   : > { %10638 = vmatpush3.bf16.msra.mxu1 %v12100_v48  ;;  %8581 = vmatprep.subr.bf16.mxu0 %v12103_v49  ;;  %v12152_v48 = vld [vmem:[%s13260_s21 + $0x270] ss:$12 sps:$4 sm:$0xff]   ;;  %v12159_v49 = vld [vmem:[%s13260_s21 + $0x28c] ss:$12 sps:$4 sm:$0xff]  }
 0xfd0   : > { %10639 = vmatprep.subr.bf16.mxu1 %v12104_v51  ;;  %v12157_v51 = vld [vmem:[%s13260_s21 + $0x288] ss:$12 sps:$4 sm:$0xff]  }
 0xfd2   : > { %8582 = vmatpush1.bf16.msra.mxu0 %v12101_v52  ;;  %v12164_v52 = vld [vmem:[%s13260_s21 + $0x2a4] ss:$12 sps:$4 sm:$0xff]  }
 0xfd3   : > { %10640 = vmatpush3.bf16.msra.mxu1 %v12105_v54  ;;  %8583 = vmatprep.subr.bf16.mxu0 %v12108_v2  ;;  %v4584_v54 = vsub.s32 4, %v13603_v28  ;;  %v12162_v2 = vld [vmem:[%s13260_s21 + $0x2a0] ss:$12 sps:$4 sm:$0xff]  }
 0xfd4   : > { %10641 = vmatprep.subr.bf16.mxu1 %v12109_v57  ;;  %v4592_v57 = vsub.s32 6, %v13603_v28 }
 0xfd6   : > { %8584 = vmatpush1.bf16.msra.mxu0 %v12106_v59  ;;  %v4588_v59 = vsub.s32 5, %v13603_v28 }
 0xfd7   : > { %10642 = vmatpush3.bf16.msra.mxu1 %v12110_v18  ;;  %8585 = vmatprep.subr.bf16.mxu0 %v12113_v56  ;;  %v4596_v18 = vsub.s32 7, %v13603_v28  ;;  %v12169_v56 = vld [vmem:[%s13260_s21 + $0x2bc] ss:$12 sps:$4 sm:$0xff]   ;;  %v12283_v28 = vld [vmem:[%s13260_s21 + $0x52c] ss:$12 sps:$4 sm:$0xff]  }
 0xfd8   : > { %10643 = vmatprep.subr.bf16.mxu1 %v12114_v1  ;;  %v4585_v1 = vrot.slane %v14302_v31, %v4584_v54  ;;  %v12191_v54 = vld [vmem:[%s13260_s21 + $0x4b8] ss:$12 sps:$4 sm:$0xff]  }
 0xfda   : > { %8586 = vmatpush1.bf16.msra.mxu0 %v12111_v4  ;;  %v4593_v4 = vrot.slane %v14302_v31, %v4592_v57  ;;  %v12192_v57 = vld [vmem:[%s13260_s21 + $0x330] ss:$12 sps:$4 sm:$0xff]  }
 0xfdb   : > { %10644 = vmatpush3.bf16.msra.mxu1 %v12115_v5  ;;  %8598 = vmatprep.subr.bf16.mxu0 %v12118_v6  ;;  %v4589_v5 = vrot.slane %v14302_v31, %v4588_v59  ;;  %v12167_v6 = vld [vmem:[%s13260_s21 + $0x2b8] ss:$12 sps:$4 sm:$0xff]   ;;  %v12196_v59 = vld [vmem:[%s13260_s21 + $0x4d0] ss:$12 sps:$4 sm:$0xff]  }
 0xfdc   : > { %10651 = vmatprep.subr.bf16.mxu1 %v12140_v22  ;;  %v4597_v22 = vrot.slane %v14302_v31, %v4596_v18  ;;  %v12179_v31 = vld [vmem:[%s13260_s21 + $0x2ec] ss:$12 sps:$4 sm:$0xff]   ;;  %v12200_v18 = vld [vmem:[%s13260_s21 + $0x5a8] ss:$12 sps:$4 sm:$0xff]  }
 0xfdd   : > { %8588 = vmatmul.mubr.bf16.vlgmr.msra.gmra.mrb[56].mxu0 %v14326_v21  ;;  %v12130_v21 = vld [vmem:[%s13260_s21 + $0x1e4] ss:$12 sps:$4 sm:$0xff]  }
 0xfde   : > { %8887 = vmatmul.mubr.bf16.vlgmr.msra.gmra.mrb[80].mxu1 %v14328_v23  ;;  %8599 = vmatpush1.bf16.msra.mxu0 %v12116_v9  ;;  %v12174_v9 = vld [vmem:[%s13260_s21 + $0x2d4] ss:$12 sps:$4 sm:$0xff]  }
 0xfdf   : > { %8630 = vmatprep.mubr.bf16.mxu0 %v14331_v27  ;;  %8600 = vmatprep.subr.bf16.mxu0 %v12121_v10  ;;  %v12128_v27 = vld [vmem:[%s13260_s21 + $0x1e0] ss:$12 sps:$4 sm:$0xff]  }
 0xfe0   : > { %10652 = vmatpush3.bf16.msra.mxu1 %v12141_v11 }
 0xfe1   : > { %10653 = vmatprep.subr.bf16.mxu1 %v12145_v12 }
 0xfe2   : > { %8601 = vmatpush1.bf16.msra.mxu0 %v12119_v50 }
 0xfe3   : > { %8602 = vmatprep.subr.bf16.mxu0 %v12124_v15 }
 0xfe4   : > { %10654 = vmatpush3.bf16.msra.mxu1 %v12146_v16 }
 0xfe5   : > { %10655 = vmatprep.subr.bf16.mxu1 %v12150_v8 }
 0xfe6   : > { %8603 = vmatpush1.bf16.msra.mxu0 %v12122_v19 }
 0xfe7   : > { %8604 = vmatprep.subr.bf16.mxu0 %v12127_v14  ;;  %v12172_v14 = vld [vmem:[%s13260_s21 + $0x2d0] ss:$12 sps:$4 sm:$0xff]  }
 0xfe8   : > { %10656 = vmatpush3.bf16.msra.mxu1 %v12151_v53 }
 0xfe9   : > { %10657 = vmatprep.subr.bf16.mxu1 %v12155_v13 }
 0xfea   : > { %8605 = vmatpush1.bf16.msra.mxu0 %v12125_v20 }
 0xfeb   : > { %8606 = vmatprep.subr.bf16.mxu0 %v12130_v21 }
 0xfec   : > { %10658 = vmatpush3.bf16.msra.mxu1 %v12156_v3 }
 0xfed   : > { %10659 = vmatprep.subr.bf16.mxu1 %v12160_v24 }
 0xfee   : > { %8607 = vmatpush1.bf16.msra.mxu0 %v12128_v27 }
 0xfef   : > { %8608 = vmatprep.subr.bf16.mxu0 %v12133_v61 }
 0xff0   : > { %10660 = vmatpush3.bf16.msra.mxu1 %v12161_v63 }
 0xff1   : > { %10661 = vmatprep.subr.bf16.mxu1 %v12165_v17 }
 0xff2   : > { %8609 = vmatpush1.bf16.msra.mxu0 %v12131_v33 }
 0xff3   : > { %8610 = vmatprep.subr.bf16.mxu0 %v12136_v29 }
 0xff4   : > { %10662 = vmatpush3.bf16.msra.mxu1 %v12166_v32 }
 0xff5   : > { %10663 = vmatprep.subr.bf16.mxu1 %v12170_v30 }
 0xff6   : > { %8611 = vmatpush1.bf16.msra.mxu0 %v12134_v55  ;;  %v12177_v55 = vld [vmem:[%s13260_s21 + $0x2e8] ss:$12 sps:$4 sm:$0xff]  }
 0xff7   : > { %8612 = vmatprep.subr.bf16.mxu0 %v12139_v34 }
 0xff8   : > { %10664 = vmatpush3.bf16.msra.mxu1 %v12171_v25 }
 0xff9   : > { %10665 = vmatprep.subr.bf16.mxu1 %v12175_v60 }
 0xffa   : > { %8613 = vmatpush1.bf16.msra.mxu0 %v12137_v35  ;;  %v12184_v35 = vld [vmem:[%s13260_s21 + $0x304] ss:$12 sps:$4 sm:$0xff]  }
 0xffb   : > { %8614 = vmatprep.subr.bf16.mxu0 %v12144_v36 }
 0xffc   : > { %10666 = vmatpush3.bf16.msra.mxu1 %v12176_v39 }
 0xffd   : > { %10673 = vmatprep.subr.bf16.mxu1 %v12180_v41  ;;  %v12181_v41 = vld [vmem:[%s13260_s21 + $0x488] ss:$12 sps:$4 sm:$0xff]  }
 0xffe   : > { %8615 = vmatpush1.bf16.msra.mxu0 %v12142_v7 }
 0xfff   : > { %8616 = vmatprep.subr.bf16.mxu0 %v12149_v44  ;;  %v12185_v44 = vld [vmem:[%s13260_s21 + $0x560] ss:$12 sps:$4 sm:$0xff]  }
0x1002   : > { %8617 = vmatpush1.bf16.msra.mxu0 %v12147_v47  ;;  %v12182_v47 = vld [vmem:[%s13260_s21 + $0x300] ss:$12 sps:$4 sm:$0xff]  }
0x1003   : > { %8618 = vmatprep.subr.bf16.mxu0 %v12154_v46  ;;  %v12189_v46 = vld [vmem:[%s13260_s21 + $0x31c] ss:$12 sps:$4 sm:$0xff]  }
0x1006   : > { %8619 = vmatpush1.bf16.msra.mxu0 %v12152_v48  ;;  %v12186_v48 = vld [vmem:[%s13260_s21 + $0x4a0] ss:$12 sps:$4 sm:$0xff]  }
0x1007   : > { %8620 = vmatprep.subr.bf16.mxu0 %v12159_v49  ;;  %v12190_v49 = vld [vmem:[%s13260_s21 + $0x578] ss:$12 sps:$4 sm:$0xff]  }
0x100a   : > { %8621 = vmatpush1.bf16.msra.mxu0 %v12157_v51  ;;  %v12187_v51 = vld [vmem:[%s13260_s21 + $0x318] ss:$12 sps:$4 sm:$0xff]  }
0x100b   : > { %8622 = vmatprep.subr.bf16.mxu0 %v12164_v52  ;;  %v12194_v52 = vld [vmem:[%s13260_s21 + $0x334] ss:$12 sps:$4 sm:$0xff]  }
0x100e   : > { %8623 = vmatpush1.bf16.msra.mxu0 %v12162_v2  ;;  %v12195_v2 = vld [vmem:[%s13260_s21 + $0x590] ss:$12 sps:$4 sm:$0xff]  }
0x100f   : > { %8624 = vmatprep.subr.bf16.mxu0 %v12169_v56  ;;  %v12197_v56 = vld [vmem:[%s13260_s21 + $0x348] ss:$12 sps:$4 sm:$0xff]  }
0x1010   : > { %v6315_v10 = vpop.f32.mrb[48].mxu0 }
0x1011   : > { %v10978_v11 = vadd.f32 %v6315_v10, %v4585_v1  ;;  %v6401_v12 = vpop.f32.mrb[68].mxu1  ;;  %v6317_v50 = vpop.f32.mrb[49].mxu0  ;;  %v12210_v10 = vld [vmem:[%s13260_s21 + $0x5d8] ss:$12 sps:$4 sm:$0xff]  }
0x1012   : > { %v10982_v15 = vadd.f32 %v6401_v12, %v4593_v4  ;;  %v10979_v16 = vadd.f32 %v6317_v50, %v4589_v5  ;;  %v6403_v8 = vpop.f32.mrb[69].mxu1  ;;  %v6319_v19 = vpop.f32.mrb[50].mxu0  ;;  %8625 = vmatpush1.bf16.msra.mxu0 %v12167_v6  ;;  %v12202_v6 = vld [vmem:[%s13260_s21 + $0x360] ss:$12 sps:$4 sm:$0xff]   ;;  %v12211_v50 = vld [vmem:[%s13260_s21 + $0x518] ss:$12 sps:$4 sm:$0xff]  }
0x1013   : > { %v10983_v53 = vadd.f32 %v6403_v8, %v4597_v22  ;;  %v10980_v13 = vadd.f32 %v6319_v19, %v4585_v1  ;;  %v6405_v20 = vpop.f32.mrb[70].mxu1  ;;  %v6321_v21 = vpop.f32.mrb[51].mxu0  ;;  %8626 = vmatprep.subr.bf16.mxu0 %v12174_v9  ;;  %v6586_v61 = vmax.f32 %v10978_v11, 0.0  ;;  %v12204_v1 = vld [vmem:[%s13260_s21 + $0x364] ss:$12 sps:$4 sm:$0xff]  }
0x1014   : > { %v10984_v3 = vadd.f32 %v6405_v20, %v4593_v4  ;;  %v10981_v24 = vadd.f32 %v6321_v21, %v4589_v5  ;;  %v6407_v27 = vpop.f32.mrb[71].mxu1  ;;  %v6588_v33 = vmax.f32 %v10982_v15, 0.0  ;;  %v6587_v29 = vmax.f32 %v10979_v16, 0.0  ;;  %v12201_v4 = vld [vmem:[%s13260_s21 + $0x4e8] ss:$12 sps:$4 sm:$0xff]  }
0x1015   : > { %v6598_v63 = vmax.f32 %v10980_v13, 0.0  ;;  %v10985_v17 = vadd.f32 %v6407_v27, %v4597_v22  ;;  %v6589_v34 = vmax.f32 %v10983_v53, 0.0  ;;  %v12205_v5 = vld [vmem:[%s13260_s21 + $0x5c0] ss:$12 sps:$4 sm:$0xff]   ;;  %v12209_v22 = vld [vmem:[%s13260_s21 + $0x37c] ss:$12 sps:$4 sm:$0xff]  }
0x1016   : > { %v6600_v32 = vmax.f32 %v10984_v3, 0.0  ;;  %v6599_v30 = vmax.f32 %v10981_v24, 0.0  ;;  %8627 = vmatpush1.bf16.msra.mxu0 %v12172_v14  ;;  %v12206_v9 = vld [vmem:[%s13260_s21 + $0x500] ss:$12 sps:$4 sm:$0xff]   ;;  %v12207_v11 = vld [vmem:[%s13260_s21 + $0x378] ss:$12 sps:$4 sm:$0xff]  }
0x1017   : > { %v14427_v25 = vpack.c.bf16 %v6598_v63, %v6586_v61  ;;  %v6601_v60 = vmax.f32 %v10985_v17, 0.0  ;;  %8628 = vmatprep.subr.bf16.mxu0 %v12179_v31  ;;  %v12214_v12 = vld [vmem:[%s13260_s21 + $0x394] ss:$12 sps:$4 sm:$0xff]   ;;  %v12215_v15 = vld [vmem:[%s13260_s21 + $0x5f0] ss:$12 sps:$4 sm:$0xff]  }
0x1018   : > { %v14430_v36 = vpack.c.bf16 %v6600_v32, %v6588_v33  ;;  %v6611_v39 = vpack.c.bf16 %v6599_v30, %v6587_v29  ;;  %v12212_v16 = vld [vmem:[%s13260_s21 + $0x390] ss:$12 sps:$4 sm:$0xff]   ;;  %v12219_v8 = vld [vmem:[%s13260_s21 + $0x3ac] ss:$12 sps:$4 sm:$0xff]   ;;  %v12244_v14 = vld [vmem:[%s13260_s21 + $0x6c8] ss:$12 sps:$4 sm:$0xff]  }
0x1019   : > { %v14433_v7 = vpack.c.bf16 %v6601_v60, %v6589_v34  ;;  %v12216_v19 = vld [vmem:[%s13260_s21 + $0x530] ss:$12 sps:$4 sm:$0xff]   ;;  %v12217_v53 = vld [vmem:[%s13260_s21 + $0x3a8] ss:$12 sps:$4 sm:$0xff]   ;;  %v12249_v21 = vld [vmem:[%s13260_s21 + $0x6e0] ss:$12 sps:$4 sm:$0xff]  }
0x101a   : > { %8629 = vmatpush1.bf16.msra.mxu0 %v12177_v55  ;;  %8927 = vmatprep.mubr.bf16.mxu1 %v6611_v39  ;;  %v12222_v13 = vld [vmem:[%s13260_s21 + $0x3c4] ss:$12 sps:$4 sm:$0xff]   ;;  %v12245_v20 = vld [vmem:[%s13260_s21 + $0x608] ss:$12 sps:$4 sm:$0xff]   ;;  %v12220_v31 = vld [vmem:[%s13260_s21 + $0x3c0] ss:$12 sps:$4 sm:$0xff]  }
0x101b   : > { %8928 = vmatmul.mubr.bf16.vlgmr.msra.gmra.mrb[84].mxu1 %v14427_v25  ;;  %8641 = vmatprep.subr.bf16.mxu0 %v12184_v35  ;;  %v12225_v3 = vld [vmem:[%s13260_s21 + $0x3dc] ss:$12 sps:$4 sm:$0xff]   ;;  %v12250_v24 = vld [vmem:[%s13260_s21 + $0x620] ss:$12 sps:$4 sm:$0xff]   ;;  %v12254_v27 = vld [vmem:[%s13260_s21 + $0x6f8] ss:$12 sps:$4 sm:$0xff]  }
0x101c   : > { %10674 = vmatpush3.bf16.msra.mxu1 %v12181_v41  ;;  %8968 = vmatprep.mubr.bf16.mxu1 %v14433_v7  ;;  %v12223_v61 = vld [vmem:[%s13260_s21 + $0x3d8] ss:$12 sps:$4 sm:$0xff]   ;;  %v12228_v63 = vld [vmem:[%s13260_s21 + $0x3f4] ss:$12 sps:$4 sm:$0xff]   ;;  %v12259_v33 = vld [vmem:[%s13260_s21 + $0x710] ss:$12 sps:$4 sm:$0xff]  }
0x101d   : > { %8631 = vmatmul.mubr.bf16.vlgmr.msra.gmra.mrb[56].mxu0 %v14328_v23  ;;  %10675 = vmatprep.subr.bf16.mxu1 %v12185_v44  ;;  %v12199_v23 = vld [vmem:[%s13260_s21 + $0x34c] ss:$12 sps:$4 sm:$0xff]   ;;  %v12226_v29 = vld [vmem:[%s13260_s21 + $0x3f0] ss:$12 sps:$4 sm:$0xff]   ;;  %v12264_v55 = vld [vmem:[%s13260_s21 + $0x728] ss:$12 sps:$4 sm:$0xff]  }
0x101e   : > { %8642 = vmatpush1.bf16.msra.mxu0 %v12182_v47  ;;  %8673 = vmatprep.mubr.bf16.mxu0 %v6611_v39  ;;  %v12255_v17 = vld [vmem:[%s13260_s21 + $0x638] ss:$12 sps:$4 sm:$0xff]   ;;  %v12260_v30 = vld [vmem:[%s13260_s21 + $0x650] ss:$12 sps:$4 sm:$0xff]   ;;  %v12229_v34 = vld [vmem:[%s13260_s21 + $0x408] ss:$12 sps:$4 sm:$0xff]  }
0x101f   : > { %8643 = vmatprep.subr.bf16.mxu0 %v12189_v46  ;;  %v12231_v32 = vld [vmem:[%s13260_s21 + $0x40c] ss:$12 sps:$4 sm:$0xff]   ;;  %v12234_v60 = vld [vmem:[%s13260_s21 + $0x424] ss:$12 sps:$4 sm:$0xff]   ;;  %v12265_v35 = vld [vmem:[%s13260_s21 + $0x668] ss:$12 sps:$4 sm:$0xff]  }
0x1020   : > { %10676 = vmatpush3.bf16.msra.mxu1 %v12186_v48  ;;  %v12269_v39 = vld [vmem:[%s13260_s21 + $0x740] ss:$12 sps:$4 sm:$0xff]   ;;  %v12237_v44 = vld [vmem:[%s13260_s21 + $0x43c] ss:$12 sps:$4 sm:$0xff]   ;;  %v12274_v46 = vld [vmem:[%s13260_s21 + $0x758] ss:$12 sps:$4 sm:$0xff]  }
0x1021   : > { %10677 = vmatprep.subr.bf16.mxu1 %v12190_v49  ;;  %v12232_v41 = vld [vmem:[%s13260_s21 + $0x420] ss:$12 sps:$4 sm:$0xff]   ;;  %v12235_v48 = vld [vmem:[%s13260_s21 + $0x438] ss:$12 sps:$4 sm:$0xff]  }
0x1022   : > { %8644 = vmatpush1.bf16.msra.mxu0 %v12187_v51  ;;  %v12270_v47 = vld [vmem:[%s13260_s21 + $0x680] ss:$12 sps:$4 sm:$0xff]   ;;  %v12275_v51 = vld [vmem:[%s13260_s21 + $0x698] ss:$12 sps:$4 sm:$0xff]  }
0x1023   : > { %8645 = vmatprep.subr.bf16.mxu0 %v12194_v52  ;;  %v12240_v49 = vld [vmem:[%s13260_s21 + $0x454] ss:$12 sps:$4 sm:$0xff]   ;;  %v12279_v52 = vld [vmem:[%s13260_s21 + $0x770] ss:$12 sps:$4 sm:$0xff]  }
0x1024   : > { %10678 = vmatpush3.bf16.msra.mxu1 %v12191_v54  ;;  %v12238_v54 = vld [vmem:[%s13260_s21 + $0x450] ss:$12 sps:$4 sm:$0xff]  }
0x1025   : > { %10679 = vmatprep.subr.bf16.mxu1 %v12195_v2  ;;  %v12243_v2 = vld [vmem:[%s13260_s21 + $0x46c] ss:$12 sps:$4 sm:$0xff]  }
0x1026   : > { %8646 = vmatpush1.bf16.msra.mxu0 %v12192_v57  ;;  %v12280_v57 = vld [vmem:[%s13260_s21 + $0x6b0] ss:$12 sps:$4 sm:$0xff]  }
0x1027   : > { %8647 = vmatprep.subr.bf16.mxu0 %v12199_v23  ;;  %v12284_v23 = vld [vmem:[%s13260_s21 + $0x848] ss:$12 sps:$4 sm:$0xff]  }
0x1028   : > { %10680 = vmatpush3.bf16.msra.mxu1 %v12196_v59  ;;  %v12241_v59 = vld [vmem:[%s13260_s21 + $0x468] ss:$12 sps:$4 sm:$0xff]  }
0x1029   : > { %10681 = vmatprep.subr.bf16.mxu1 %v12200_v18  ;;  %v12248_v18 = vld [vmem:[%s13260_s21 + $0x484] ss:$12 sps:$4 sm:$0xff]  }
0x102a   : > { %8648 = vmatpush1.bf16.msra.mxu0 %v12197_v56  ;;  %v12246_v56 = vld [vmem:[%s13260_s21 + $0x480] ss:$12 sps:$4 sm:$0xff]  }
0x102b   : > { %8649 = vmatprep.subr.bf16.mxu0 %v12204_v1  ;;  %v12253_v1 = vld [vmem:[%s13260_s21 + $0x49c] ss:$12 sps:$4 sm:$0xff]  }
0x102c   : > { %10682 = vmatpush3.bf16.msra.mxu1 %v12201_v4  ;;  %v12251_v4 = vld [vmem:[%s13260_s21 + $0x498] ss:$12 sps:$4 sm:$0xff]  }
0x102d   : > { %10683 = vmatprep.subr.bf16.mxu1 %v12205_v5  ;;  %v12258_v5 = vld [vmem:[%s13260_s21 + $0x4b4] ss:$12 sps:$4 sm:$0xff]  }
0x102e   : > { %8650 = vmatpush1.bf16.msra.mxu0 %v12202_v6  ;;  %v12256_v6 = vld [vmem:[%s13260_s21 + $0x4b0] ss:$12 sps:$4 sm:$0xff]  }
0x102f   : > { %8651 = vmatprep.subr.bf16.mxu0 %v12209_v22  ;;  %v12263_v22 = vld [vmem:[%s13260_s21 + $0x4cc] ss:$12 sps:$4 sm:$0xff]  }
0x1030   : > { %10684 = vmatpush3.bf16.msra.mxu1 %v12206_v9  ;;  %v12261_v9 = vld [vmem:[%s13260_s21 + $0x4c8] ss:$12 sps:$4 sm:$0xff]  }
0x1031   : > { %10685 = vmatprep.subr.bf16.mxu1 %v12210_v10  ;;  %v12268_v10 = vld [vmem:[%s13260_s21 + $0x4e4] ss:$12 sps:$4 sm:$0xff]  }
0x1032   : > { %8652 = vmatpush1.bf16.msra.mxu0 %v12207_v11  ;;  %v4563_v11 = vld [vmem:[%s13258_s13 + $0x8] sm:$0xf]  ;;  %s14767_s13 = sld [smem:[#allocation29_spill]] (!%p10470_p4) }
0x1033   : > { %8653 = vmatprep.subr.bf16.mxu0 %v12214_v12  ;;  %v12273_v12 = vld [vmem:[%s13260_s21 + $0x4fc] ss:$12 sps:$4 sm:$0xff]  }
0x1034   : > { %10686 = vmatpush3.bf16.msra.mxu1 %v12211_v50  ;;  %v4609_v50 = vrot.slane %v4563_v11, %v14048_v62 }
0x1035   : > { %10687 = vmatprep.subr.bf16.mxu1 %v12215_v15  ;;  %v4605_v15 = vrot.slane %v4563_v11, %v13987_v0 }
0x1036   : > { %8654 = vmatpush1.bf16.msra.mxu0 %v12212_v16  ;;  %v12271_v16 = vld [vmem:[%s13260_s21 + $0x4f8] ss:$12 sps:$4 sm:$0xff]  }
0x1037   : > { %8655 = vmatprep.subr.bf16.mxu0 %v12219_v8  ;;  %v4613_v8 = vrot.slane %v4563_v11, %v4580_v37 }
0x1038   : > { %10688 = vmatpush3.bf16.msra.mxu1 %v12216_v19  ;;  %v12278_v19 = vld [vmem:[%s13260_s21 + $0x514] ss:$12 sps:$4 sm:$0xff]  }
0x1039   : > { %10695 = vmatprep.subr.bf16.mxu1 %v12244_v14 }
0x103a   : > { %8656 = vmatpush1.bf16.msra.mxu0 %v12217_v53 }
0x103b   : > { %8969 = vmatmul.mubr.bf16.vlgmr.msra.gmra.mrb[88].mxu1 %v14430_v36  ;;  %8657 = vmatprep.subr.bf16.mxu0 %v12222_v13 }
0x103c   : > { %10696 = vmatpush3.bf16.msra.mxu1 %v12245_v20 }
0x103d   : > { %10697 = vmatprep.subr.bf16.mxu1 %v12249_v21 }
0x103e   : > { %8658 = vmatpush1.bf16.msra.mxu0 %v12220_v31 }
0x103f   : > { %8659 = vmatprep.subr.bf16.mxu0 %v12225_v3 }
0x1040   : > { %10698 = vmatpush3.bf16.msra.mxu1 %v12250_v24 }
0x1041   : > { %10699 = vmatprep.subr.bf16.mxu1 %v12254_v27  ;;  %v12276_v27 = vld [vmem:[%s13260_s21 + $0x510] ss:$12 sps:$4 sm:$0xff]  }
0x1042   : > { %8660 = vmatpush1.bf16.msra.mxu0 %v12223_v61 }
0x1043   : > { %8661 = vmatprep.subr.bf16.mxu0 %v12228_v63 }
0x1044   : > { %10700 = vmatpush3.bf16.msra.mxu1 %v12255_v17 }
0x1045   : > { %10701 = vmatprep.subr.bf16.mxu1 %v12259_v33 }
0x1046   : > { %8662 = vmatpush1.bf16.msra.mxu0 %v12226_v29 }
0x1047   : > { %8663 = vmatprep.subr.bf16.mxu0 %v12231_v32 }
0x1048   : > { %10702 = vmatpush3.bf16.msra.mxu1 %v12260_v30 }
0x1049   : > { %10703 = vmatprep.subr.bf16.mxu1 %v12264_v55 }
0x104a   : > { %8664 = vmatpush1.bf16.msra.mxu0 %v12229_v34 }
0x104b   : > { %8665 = vmatprep.subr.bf16.mxu0 %v12234_v60 }
0x104c   : > { %10704 = vmatpush3.bf16.msra.mxu1 %v12265_v35 }
0x104d   : > { %10705 = vmatprep.subr.bf16.mxu1 %v12269_v39 }
0x104e   : > { %8666 = vmatpush1.bf16.msra.mxu0 %v12232_v41 }
0x104f   : > { %8667 = vmatprep.subr.bf16.mxu0 %v12237_v44  ;;  %v12281_v44 = vld [vmem:[%s13260_s21 + $0x528] ss:$12 sps:$4 sm:$0xff]  }
0x1050   : > { %10706 = vmatpush3.bf16.msra.mxu1 %v12270_v47 }
0x1051   : > { %10707 = vmatprep.subr.bf16.mxu1 %v12274_v46 }
0x1052   : > { %8668 = vmatpush1.bf16.msra.mxu0 %v12235_v48 }
0x1053   : > { %8669 = vmatprep.subr.bf16.mxu0 %v12240_v49  ;;  %v12288_v49 = vld [vmem:[%s13260_s21 + $0x544] ss:$12 sps:$4 sm:$0xff]  }
0x1054   : > { %10708 = vmatpush3.bf16.msra.mxu1 %v12275_v51 }
0x1055   : > { %10709 = vmatprep.subr.bf16.mxu1 %v12279_v52 }
0x1056   : > { %8670 = vmatpush1.bf16.msra.mxu0 %v12238_v54  ;;  %v12285_v54 = vld [vmem:[%s13260_s21 + $0x788] ss:$12 sps:$4 sm:$0xff]  }
0x1057   : > { %8671 = vmatprep.subr.bf16.mxu0 %v12243_v2 }
0x1058   : > { %10710 = vmatpush3.bf16.msra.mxu1 %v12280_v57  ;;  %v12289_v57 = vld [vmem:[%s13260_s21 + $0x860] ss:$12 sps:$4 sm:$0xff]  }
0x1059   : > { %10717 = vmatprep.subr.bf16.mxu1 %v12284_v23  ;;  %v12286_v23 = vld [vmem:[%s13260_s21 + $0x540] ss:$12 sps:$4 sm:$0xff]  }
0x105a   : > { %8672 = vmatpush1.bf16.msra.mxu0 %v12241_v59  ;;  %v12293_v59 = vld [vmem:[%s13260_s21 + $0x55c] ss:$12 sps:$4 sm:$0xff]  }
0x105b   : > { %8684 = vmatprep.subr.bf16.mxu0 %v12248_v18  ;;  %v12290_v18 = vld [vmem:[%s13260_s21 + $0x7a0] ss:$12 sps:$4 sm:$0xff]  }
0x105d   : > { %8674 = vmatmul.mubr.bf16.vlgmr.msra.gmra.mrb[56].mxu0 %v14427_v25  ;;  %v12266_v25 = vld [vmem:[%s13260_s21 + $0x4e0] ss:$12 sps:$4 sm:$0xff]  }
0x105e   : > { %8685 = vmatpush1.bf16.msra.mxu0 %v12246_v56  ;;  %8716 = vmatprep.mubr.bf16.mxu0 %v14433_v7  ;;  %v4601_v7 = vrot.slane %v4563_v11, %v13993_v42  ;;  %v12294_v56 = vld [vmem:[%s13260_s21 + $0x878] ss:$12 sps:$4 sm:$0xff]   ;;  %v12301_v11 = vld [vmem:[%s13260_s21 + $0x588] ss:$12 sps:$4 sm:$0xff]  }
0x105f   : > { %8686 = vmatprep.subr.bf16.mxu0 %v12253_v1  ;;  %v12291_v1 = vld [vmem:[%s13260_s21 + $0x558] ss:$12 sps:$4 sm:$0xff]  }
0x1062   : > { %8687 = vmatpush1.bf16.msra.mxu0 %v12251_v4  ;;  %v12298_v4 = vld [vmem:[%s13260_s21 + $0x574] ss:$12 sps:$4 sm:$0xff]  }
0x1063   : > { %8688 = vmatprep.subr.bf16.mxu0 %v12258_v5  ;;  %v12295_v5 = vld [vmem:[%s13260_s21 + $0x7b8] ss:$12 sps:$4 sm:$0xff]  }
0x1066   : > { %8689 = vmatpush1.bf16.msra.mxu0 %v12256_v6  ;;  %v12299_v6 = vld [vmem:[%s13260_s21 + $0x890] ss:$12 sps:$4 sm:$0xff]  }
0x1067   : > { %8690 = vmatprep.subr.bf16.mxu0 %v12263_v22  ;;  %v12296_v22 = vld [vmem:[%s13260_s21 + $0x570] ss:$12 sps:$4 sm:$0xff]  }
0x106a   : > { %8691 = vmatpush1.bf16.msra.mxu0 %v12261_v9  ;;  %v12303_v9 = vld [vmem:[%s13260_s21 + $0x58c] ss:$12 sps:$4 sm:$0xff]  }
0x106b   : > { %8692 = vmatprep.subr.bf16.mxu0 %v12268_v10  ;;  %v12300_v10 = vld [vmem:[%s13260_s21 + $0x7d0] ss:$12 sps:$4 sm:$0xff]  }
0x106e   : > { %8693 = vmatpush1.bf16.msra.mxu0 %v12266_v25  ;;  %v12304_v25 = vld [vmem:[%s13260_s21 + $0x8a8] ss:$12 sps:$4 sm:$0xff]  }
0x106f   : > { %8694 = vmatprep.subr.bf16.mxu0 %v12273_v12  ;;  %v12308_v12 = vld [vmem:[%s13260_s21 + $0x5a4] ss:$12 sps:$4 sm:$0xff]  }
0x1070   : > { %v6487_v14 = vpop.f32.mrb[52].mxu0 }
0x1071   : > { %v10986_v53 = vadd.f32 %v6487_v14, %v4601_v7  ;;  %v6573_v13 = vpop.f32.mrb[72].mxu1  ;;  %v6489_v20 = vpop.f32.mrb[53].mxu0  ;;  %v12311_v14 = vld [vmem:[%s13260_s21 + $0x5b8] ss:$12 sps:$4 sm:$0xff]  }
0x1072   : > { %v10990_v21 = vadd.f32 %v6573_v13, %v4609_v50  ;;  %v10987_v31 = vadd.f32 %v6489_v20, %v4605_v15  ;;  %v6575_v3 = vpop.f32.mrb[73].mxu1  ;;  %v6491_v24 = vpop.f32.mrb[54].mxu0  ;;  %8695 = vmatpush1.bf16.msra.mxu0 %v12271_v16  ;;  %v12313_v16 = vld [vmem:[%s13260_s21 + $0x5bc] ss:$12 sps:$4 sm:$0xff]   ;;  %v12315_v13 = vld [vmem:[%s13260_s21 + $0x818] ss:$12 sps:$4 sm:$0xff]  }
0x1073   : > { %v10991_v61 = vadd.f32 %v6575_v3, %v4613_v8  ;;  %v10988_v63 = vadd.f32 %v6491_v24, %v4601_v7  ;;  %v6577_v17 = vpop.f32.mrb[74].mxu1  ;;  %v6493_v33 = vpop.f32.mrb[55].mxu0  ;;  %8696 = vmatprep.subr.bf16.mxu0 %v12278_v19  ;;  %v6590_v30 = vmax.f32 %v10986_v53, 0.0  ;;  %v12305_v7 = vld [vmem:[%s13260_s21 + $0x7e8] ss:$12 sps:$4 sm:$0xff]  }
0x1074   : > { %v10992_v37 = vadd.f32 %v6577_v17, %v4609_v50  ;;  %v10989_v29 = vadd.f32 %v6493_v33, %v4605_v15  ;;  %v6579_v32 = vpop.f32.mrb[75].mxu1  ;;  %v6592_v60 = vmax.f32 %v10990_v21, 0.0  ;;  %v6591_v35 = vmax.f32 %v10987_v31, 0.0  ;;  %v12309_v50 = vld [vmem:[%s13260_s21 + $0x8c0] ss:$12 sps:$4 sm:$0xff]  }
0x1075   : > { %v6602_v55 = vmax.f32 %v10988_v63, 0.0  ;;  %v10993_v34 = vadd.f32 %v6579_v32, %v4613_v8  ;;  %v6593_v47 = vmax.f32 %v10991_v61, 0.0  ;;  %v12306_v15 = vld [vmem:[%s13260_s21 + $0x5a0] ss:$12 sps:$4 sm:$0xff]   ;;  %v12314_v19 = vld [vmem:[%s13260_s21 + $0x8d8] ss:$12 sps:$4 sm:$0xff]  }
0x1076   : > { %v6604_v39 = vmax.f32 %v10992_v37, 0.0  ;;  %v6603_v41 = vmax.f32 %v10989_v29, 0.0  ;;  %8697 = vmatpush1.bf16.msra.mxu0 %v12276_v27  ;;  %v12310_v8 = vld [vmem:[%s13260_s21 + $0x800] ss:$12 sps:$4 sm:$0xff]   ;;  %v12319_v21 = vld [vmem:[%s13260_s21 + $0x8f0] ss:$12 sps:$4 sm:$0xff]  }
0x1077   : > { %v14525_v46 = vpack.c.bf16 %v6602_v55, %v6590_v30  ;;  %v6605_v48 = vmax.f32 %v10993_v34, 0.0  ;;  %8698 = vmatprep.subr.bf16.mxu0 %v12283_v28  ;;  %v12318_v53 = vld [vmem:[%s13260_s21 + $0x5d4] ss:$12 sps:$4 sm:$0xff]   ;;  %v12316_v3 = vld [vmem:[%s13260_s21 + $0x5d0] ss:$12 sps:$4 sm:$0xff]  }
0x1078   : > { %v14528_v51 = vpack.c.bf16 %v6604_v39, %v6592_v60  ;;  %v14530_v52 = vpack.c.bf16 %v6603_v41, %v6591_v35  ;;  %v12323_v61 = vld [vmem:[%s13260_s21 + $0x5ec] ss:$12 sps:$4 sm:$0xff]   ;;  %v12320_v17 = vld [vmem:[%s13260_s21 + $0x830] ss:$12 sps:$4 sm:$0xff]   ;;  %v12321_v28 = vld [vmem:[%s13260_s21 + $0x5e8] ss:$12 sps:$4 sm:$0xff]  }
0x1079   : > { %v14533_v2 = vpack.c.bf16 %v6605_v48, %v6593_v47  ;;  %v12326_v37 = vld [vmem:[%s13260_s21 + $0x604] ss:$12 sps:$4 sm:$0xff]   ;;  %v12324_v29 = vld [vmem:[%s13260_s21 + $0x600] ss:$12 sps:$4 sm:$0xff]   ;;  %v12329_v32 = vld [vmem:[%s13260_s21 + $0x61c] ss:$12 sps:$4 sm:$0xff]  }
0x107a   : > { %8699 = vmatpush1.bf16.msra.mxu0 %v12281_v44  ;;  %9009 = vmatprep.mubr.bf16.mxu1 %v14530_v52  ;;  %v12327_v30 = vld [vmem:[%s13260_s21 + $0x618] ss:$12 sps:$4 sm:$0xff]   ;;  %v12332_v55 = vld [vmem:[%s13260_s21 + $0x634] ss:$12 sps:$4 sm:$0xff]   ;;  %v12330_v34 = vld [vmem:[%s13260_s21 + $0x630] ss:$12 sps:$4 sm:$0xff]  }
0x107b   : > { %9010 = vmatmul.mubr.bf16.vlgmr.msra.gmra.mrb[92].mxu1 %v14525_v46  ;;  %8700 = vmatprep.subr.bf16.mxu0 %v12288_v49  ;;  %v12335_v60 = vld [vmem:[%s13260_s21 + $0x64c] ss:$12 sps:$4 sm:$0xff]   ;;  %v12333_v35 = vld [vmem:[%s13260_s21 + $0x648] ss:$12 sps:$4 sm:$0xff]   ;;  %v12338_v39 = vld [vmem:[%s13260_s21 + $0x664] ss:$12 sps:$4 sm:$0xff]  }
0x107c   : > { %10718 = vmatpush3.bf16.msra.mxu1 %v12285_v54  ;;  %9050 = vmatprep.mubr.bf16.mxu1 %v14533_v2  ;;  %v12341_v41 = vld [vmem:[%s13260_s21 + $0x67c] ss:$12 sps:$4 sm:$0xff]   ;;  %v14582_v44 = vld [vmem:[%s13266_s23] sm:$0x7] }
0x107d   : > { %10719 = vmatprep.subr.bf16.mxu1 %v12289_v57  ;;  %v12339_v47 = vld [vmem:[%s13260_s21 + $0x678] ss:$12 sps:$4 sm:$0xff]   ;;  %v7015_v48 = vrot.slane %v14582_v44, %v14048_v62  ;;  %v12344_v49 = vld [vmem:[%s13260_s21 + $0x694] ss:$12 sps:$4 sm:$0xff]   ;;  %v12342_v57 = vld [vmem:[%s13260_s21 + $0x690] ss:$12 sps:$4 sm:$0xff]  }
0x107e   : > { %8701 = vmatpush1.bf16.msra.mxu0 %v12286_v23 }
0x107f   : > { %8702 = vmatprep.subr.bf16.mxu0 %v12293_v59 }
0x1080   : > { %10720 = vmatpush3.bf16.msra.mxu1 %v12290_v18 }
0x1081   : > { %10721 = vmatprep.subr.bf16.mxu1 %v12294_v56  ;;  %v12347_v56 = vld [vmem:[%s13260_s21 + $0x6ac] ss:$12 sps:$4 sm:$0xff]  }
0x1082   : > { %8703 = vmatpush1.bf16.msra.mxu0 %v12291_v1 }
0x1083   : > { %8704 = vmatprep.subr.bf16.mxu0 %v12298_v4 }
0x1084   : > { %10722 = vmatpush3.bf16.msra.mxu1 %v12295_v5 }
0x1085   : > { %10723 = vmatprep.subr.bf16.mxu1 %v12299_v6  ;;  %v12345_v6 = vld [vmem:[%s13260_s21 + $0x6a8] ss:$12 sps:$4 sm:$0xff]  }
0x1086   : > { %8705 = vmatpush1.bf16.msra.mxu0 %v12296_v22 }
0x1087   : > { %8706 = vmatprep.subr.bf16.mxu0 %v12303_v9  ;;  %v12350_v9 = vld [vmem:[%s13260_s21 + $0x6c4] ss:$12 sps:$4 sm:$0xff]  }
0x1088   : > { %10724 = vmatpush3.bf16.msra.mxu1 %v12300_v10  ;;  %v12348_v10 = vld [vmem:[%s13260_s21 + $0x6c0] ss:$12 sps:$4 sm:$0xff]  }
0x1089   : > { %10725 = vmatprep.subr.bf16.mxu1 %v12304_v25  ;;  %v12353_v25 = vld [vmem:[%s13260_s21 + $0x6dc] ss:$12 sps:$4 sm:$0xff]  }
0x108a   : > { %8707 = vmatpush1.bf16.msra.mxu0 %v12301_v11  ;;  %v12351_v11 = vld [vmem:[%s13260_s21 + $0x6d8] ss:$12 sps:$4 sm:$0xff]  }
0x108b   : > { %8708 = vmatprep.subr.bf16.mxu0 %v12308_v12  ;;  %v12356_v12 = vld [vmem:[%s13260_s21 + $0x6f4] ss:$12 sps:$4 sm:$0xff]  }
0x108c   : > { %10726 = vmatpush3.bf16.msra.mxu1 %v12305_v7  ;;  %v12354_v7 = vld [vmem:[%s13260_s21 + $0x6f0] ss:$12 sps:$4 sm:$0xff]  }
0x108d   : > { %10727 = vmatprep.subr.bf16.mxu1 %v12309_v50  ;;  %v12359_v50 = vld [vmem:[%s13260_s21 + $0x70c] ss:$12 sps:$4 sm:$0xff]  }
0x108e   : > { %8709 = vmatpush1.bf16.msra.mxu0 %v12306_v15  ;;  %v12357_v15 = vld [vmem:[%s13260_s21 + $0x708] ss:$12 sps:$4 sm:$0xff]  }
0x108f   : > { %8710 = vmatprep.subr.bf16.mxu0 %v12313_v16  ;;  %v12362_v16 = vld [vmem:[%s13260_s21 + $0x724] ss:$12 sps:$4 sm:$0xff]  }
0x1090   : > { %10728 = vmatpush3.bf16.msra.mxu1 %v12310_v8  ;;  %v12360_v8 = vld [vmem:[%s13260_s21 + $0x720] ss:$12 sps:$4 sm:$0xff]  }
0x1091   : > { %v10623_v20 = vpop.f32.mrb[76].mxu1  ;;  %10729 = vmatprep.subr.bf16.mxu1 %v12314_v19  ;;  %v12365_v19 = vld [vmem:[%s13260_s21 + $0x73c] ss:$12 sps:$4 sm:$0xff]  }
0x1092   : > { %v10624_v31 = vpop.f32.mrb[77].mxu1  ;;  %8711 = vmatpush1.bf16.msra.mxu0 %v12311_v14  ;;  %v12363_v14 = vld [vmem:[%s13260_s21 + $0x738] ss:$12 sps:$4 sm:$0xff]  }
0x1093   : > { %v10625_v24 = vadd.f32 %v10624_v31, %v10623_v20  ;;  %v10626_v27 = vpop.f32.mrb[78].mxu1  ;;  %8712 = vmatprep.subr.bf16.mxu0 %v12318_v53  ;;  %v12368_v53 = vld [vmem:[%s13260_s21 + $0x754] ss:$12 sps:$4 sm:$0xff]   ;;  %v12371_v20 = vld [vmem:[%s13260_s21 + $0x76c] ss:$12 sps:$4 sm:$0xff]  }
0x1094   : > { %v10627_v63 = vpop.f32.mrb[79].mxu1  ;;  %10730 = vmatpush3.bf16.msra.mxu1 %v12315_v13  ;;  %v12366_v13 = vld [vmem:[%s13260_s21 + $0x750] ss:$12 sps:$4 sm:$0xff]  }
0x1095   : > { %v10628_v33 = vadd.f32 %v10627_v63, %v10626_v27  ;;  %10731 = vmatprep.subr.bf16.mxu1 %v12319_v21  ;;  %v8848_v23 = vadd.f32 %v10625_v24, %v7015_v48  ;;  %v12369_v21 = vld [vmem:[%s13260_s21 + $0x768] ss:$12 sps:$4 sm:$0xff]   ;;  %v12374_v31 = vld [vmem:[%s13260_s21 + $0x784] ss:$12 sps:$4 sm:$0xff]  }
0x1096   : > { %8713 = vmatpush1.bf16.msra.mxu0 %v12316_v3  ;;  %v12372_v3 = vld [vmem:[%s13260_s21 + $0x780] ss:$12 sps:$4 sm:$0xff]   ;;  %v12377_v24 = vld [vmem:[%s13260_s21 + $0x79c] ss:$12 sps:$4 sm:$0xff]   ;;  %v12375_v27 = vld [vmem:[%s13260_s21 + $0x798] ss:$12 sps:$4 sm:$0xff]  }
0x1097   : > { %8714 = vmatprep.subr.bf16.mxu0 %v12323_v61  ;;  %v8851_v4 = vadd.f32 %v10628_v33, %v7015_v48  ;;  %v12380_v61 = vld [vmem:[%s13260_s21 + $0x7b4] ss:$12 sps:$4 sm:$0xff]   ;;  %v12378_v63 = vld [vmem:[%s13260_s21 + $0x7b0] ss:$12 sps:$4 sm:$0xff]  }
0x1098   : > { %10732 = vmatpush3.bf16.msra.mxu1 %v12320_v17  ;;  %v12383_v17 = vld [vmem:[%s13260_s21 + $0x7cc] ss:$12 sps:$4 sm:$0xff]   ;;  %v12381_v33 = vld [vmem:[%s13260_s21 + $0x7c8] ss:$12 sps:$4 sm:$0xff]  }
0x1099   : > { %v12393_v48 = vld [vmem:[%s13260_s21 + $0x828] ss:$12 sps:$4 sm:$0xff]  }
0x109a   : > { %8715 = vmatpush1.bf16.msra.mxu0 %v12321_v28  ;;  %v12386_v28 = vld [vmem:[%s13260_s21 + $0x7e4] ss:$12 sps:$4 sm:$0xff]  }
0x109b   : > { %9051 = vmatmul.mubr.bf16.vlgmr.msra.gmra.mrb[96].mxu1 %v14528_v51  ;;  %8727 = vmatprep.subr.bf16.mxu0 %v12326_v37  ;;  %v12389_v37 = vld [vmem:[%s13260_s21 + $0x7fc] ss:$12 sps:$4 sm:$0xff]  }
0x109d   : > { %8717 = vmatmul.mubr.bf16.vlgmr.msra.gmra.mrb[56].mxu0 %v14430_v36  ;;  %v12336_v36 = vld [vmem:[%s13260_s21 + $0x660] ss:$12 sps:$4 sm:$0xff]  }
0x109e   : > { %8728 = vmatpush1.bf16.msra.mxu0 %v12324_v29  ;;  %8759 = vmatprep.mubr.bf16.mxu0 %v14530_v52  ;;  %v12387_v29 = vld [vmem:[%s13260_s21 + $0x7f8] ss:$12 sps:$4 sm:$0xff]  }
0x109f   : > { %8729 = vmatprep.subr.bf16.mxu0 %v12329_v32 }
0x10a2   : > { %8730 = vmatpush1.bf16.msra.mxu0 %v12327_v30  ;;  %v12392_v30 = vld [vmem:[%s13260_s21 + $0x814] ss:$12 sps:$4 sm:$0xff]  }
0x10a3   : > { %8731 = vmatprep.subr.bf16.mxu0 %v12332_v55 }
0x10a6   : > { %8732 = vmatpush1.bf16.msra.mxu0 %v12330_v34 }
0x10a7   : > { %8733 = vmatprep.subr.bf16.mxu0 %v12335_v60 }
0x10aa   : > { %8734 = vmatpush1.bf16.msra.mxu0 %v12333_v35 }
0x10ab   : > { %8735 = vmatprep.subr.bf16.mxu0 %v12338_v39 }
0x10ae   : > { %8736 = vmatpush1.bf16.msra.mxu0 %v12336_v36  ;;  %v12390_v36 = vld [vmem:[%s13260_s21 + $0x810] ss:$12 sps:$4 sm:$0xff]  }
0x10af   : > { %8737 = vmatprep.subr.bf16.mxu0 %v12341_v41  ;;  %v12395_v41 = vld [vmem:[%s13260_s21 + $0x82c] ss:$12 sps:$4 sm:$0xff]  }
0x10b1   : > { %v10645_v52 = vpop.f32.mrb[80].mxu1 }
0x10b2   : > { %v10646_v54 = vpop.f32.mrb[81].mxu1  ;;  %8738 = vmatpush1.bf16.msra.mxu0 %v12339_v47 }
0x10b3   : > { %v10647_v59 = vadd.f32 %v10646_v54, %v10645_v52  ;;  %v10648_v18 = vpop.f32.mrb[82].mxu1  ;;  %8739 = vmatprep.subr.bf16.mxu0 %v12344_v49  ;;  %v12398_v49 = vld [vmem:[%s13260_s21 + $0x844] ss:$12 sps:$4 sm:$0xff]   ;;  %v12396_v52 = vld [vmem:[%s13260_s21 + $0x840] ss:$12 sps:$4 sm:$0xff]  }
0x10b4   : > { %v10649_v1 = vpop.f32.mrb[83].mxu1  ;;  %v12401_v54 = vld [vmem:[%s13260_s21 + $0x85c] ss:$12 sps:$4 sm:$0xff]  }
0x10b5   : > { %v14590_v62 = vadd.f32 %v10647_v59, %v8848_v23  ;;  %v10650_v5 = vadd.f32 %v10649_v1, %v10648_v18  ;;  %v12404_v23 = vld [vmem:[%s13260_s21 + $0x874] ss:$12 sps:$4 sm:$0xff]   ;;  %v12402_v59 = vld [vmem:[%s13260_s21 + $0x870] ss:$12 sps:$4 sm:$0xff]   ;;  %v12407_v18 = vld [vmem:[%s13260_s21 + $0x88c] ss:$12 sps:$4 sm:$0xff]  }
0x10b6   : > { %8740 = vmatpush1.bf16.msra.mxu0 %v12342_v57  ;;  %v12399_v57 = vld [vmem:[%s13260_s21 + $0x858] ss:$12 sps:$4 sm:$0xff]  }
0x10b7   : > { %v14593_v22 = vadd.f32 %v10650_v5, %v8851_v4  ;;  %8741 = vmatprep.subr.bf16.mxu0 %v12347_v56  ;;  %v12405_v56 = vld [vmem:[%s13260_s21 + $0x888] ss:$12 sps:$4 sm:$0xff]   ;;  %v12410_v1 = vld [vmem:[%s13260_s21 + $0x8a4] ss:$12 sps:$4 sm:$0xff]   ;;  %v12408_v4 = vld [vmem:[%s13260_s21 + $0x8a0] ss:$12 sps:$4 sm:$0xff]  }
0x10ba   : > { %8742 = vmatpush1.bf16.msra.mxu0 %v12345_v6  ;;  %v12411_v6 = vld [vmem:[%s13260_s21 + $0x8b8] ss:$12 sps:$4 sm:$0xff]  }
0x10bb   : > { %8743 = vmatprep.subr.bf16.mxu0 %v12350_v9  ;;  %v12416_v9 = vld [vmem:[%s13260_s21 + $0x8d4] ss:$12 sps:$4 sm:$0xff]  }
0x10be   : > { %8744 = vmatpush1.bf16.msra.mxu0 %v12348_v10 }
0x10bf   : > { %8745 = vmatprep.subr.bf16.mxu0 %v12353_v25 }
0x10c2   : > { %8746 = vmatpush1.bf16.msra.mxu0 %v12351_v11 }
0x10c3   : > { %8747 = vmatprep.subr.bf16.mxu0 %v12356_v12 }
0x10c6   : > { %8748 = vmatpush1.bf16.msra.mxu0 %v12354_v7 }
0x10c7   : > { %8749 = vmatprep.subr.bf16.mxu0 %v12359_v50  ;;  %v12414_v50 = vld [vmem:[%s13260_s21 + $0x8d0] ss:$12 sps:$4 sm:$0xff]  }
0x10ca   : > { %8750 = vmatpush1.bf16.msra.mxu0 %v12357_v15  ;;  %v12419_v15 = vld [vmem:[%s13260_s21 + $0x8ec] ss:$12 sps:$4 sm:$0xff]  }
0x10cb   : > { %8751 = vmatprep.subr.bf16.mxu0 %v12362_v16 }
0x10ce   : > { %8752 = vmatpush1.bf16.msra.mxu0 %v12360_v8  ;;  %v12417_v8 = vld [vmem:[%s13260_s21 + $0x8e8] ss:$12 sps:$4 sm:$0xff]  }
0x10cf   : > { %8753 = vmatprep.subr.bf16.mxu0 %v12365_v19 }
0x10d2   : > { %8754 = vmatpush1.bf16.msra.mxu0 %v12363_v14 }
0x10d3   : > { %8755 = vmatprep.subr.bf16.mxu0 %v12368_v53 }
0x10d6   : > { %8756 = vmatpush1.bf16.msra.mxu0 %v12366_v13 }
0x10d7   : > { %8757 = vmatprep.subr.bf16.mxu0 %v12371_v20 }
0x10da   : > { %8758 = vmatpush1.bf16.msra.mxu0 %v12369_v21 }
0x10db   : > { %8770 = vmatprep.subr.bf16.mxu0 %v12374_v31 }
0x10dd   : > { %8760 = vmatmul.mubr.bf16.vlgmr.msra.gmra.mrb[56].mxu0 %v14525_v46  ;;  %v12384_v46 = vld [vmem:[%s13260_s21 + $0x7e0] ss:$12 sps:$4 sm:$0xff]  }
0x10de   : > { %8771 = vmatpush1.bf16.msra.mxu0 %v12372_v3  ;;  %8802 = vmatprep.mubr.bf16.mxu0 %v14533_v2 }
0x10df   : > { %8772 = vmatprep.subr.bf16.mxu0 %v12377_v24 }
0x10e2   : > { %8773 = vmatpush1.bf16.msra.mxu0 %v12375_v27 }
0x10e3   : > { %8774 = vmatprep.subr.bf16.mxu0 %v12380_v61 }
0x10e6   : > { %8775 = vmatpush1.bf16.msra.mxu0 %v12378_v63 }
0x10e7   : > { %8776 = vmatprep.subr.bf16.mxu0 %v12383_v17 }
0x10ea   : > { %8777 = vmatpush1.bf16.msra.mxu0 %v12381_v33 }
0x10eb   : > { %8778 = vmatprep.subr.bf16.mxu0 %v12386_v28 }
0x10ee   : > { %8779 = vmatpush1.bf16.msra.mxu0 %v12384_v46  ;;  %v10667_v2 = vpop.f32.mrb[84].mxu1 }
0x10ef   : > { %v10668_v32 = vpop.f32.mrb[85].mxu1  ;;  %8780 = vmatprep.subr.bf16.mxu0 %v12389_v37 }
0x10f0   : > { %v10669_v55 = vadd.f32 %v10668_v32, %v10667_v2  ;;  %v10670_v34 = vpop.f32.mrb[86].mxu1  ;;  %v7007_v2 = vrot.slane %v14582_v44, %v13993_v42 }
0x10f1   : > { %v10671_v60 = vpop.f32.mrb[87].mxu1 }
0x10f2   : > { %v8930_v35 = vadd.f32 %v10669_v55, %v14590_v62  ;;  %v10672_v39 = vadd.f32 %v10671_v60, %v10670_v34  ;;  %8781 = vmatpush1.bf16.msra.mxu0 %v12387_v29  ;;  %v12413_v62 = vld [vmem:[%s13260_s21 + $0x8bc] ss:$12 sps:$4 sm:$0xff]   ;;  %v7011_v29 = vrot.slane %v14582_v44, %v13987_v0  ;;  %s14768_s21 = smov (!%p10470_p4), %s14767_s13 }
0x10f3   : > { %8782 = vmatprep.subr.bf16.mxu0 %v12392_v30 }
0x10f4   : > { %v8933_v47 = vadd.f32 %v10672_v39, %v14593_v22 }
0x10f6   : > { %8783 = vmatpush1.bf16.msra.mxu0 %v12390_v36 }
0x10f7   : > { %8784 = vmatprep.subr.bf16.mxu0 %v12395_v41  ;;  %v12459_v41 = vld [vmem:[#allocation14] sm:$0xff] (!%p10470_p4)  }
0x10fa   : > { %8785 = vmatpush1.bf16.msra.mxu0 %v12393_v48  ;;  %v12463_v48 = vld [vmem:[#allocation14 + $0x88] sm:$0xff] (!%p10470_p4)  }
0x10fb   : > { %8786 = vmatprep.subr.bf16.mxu0 %v12398_v49  ;;  %v12464_v49 = vld [vmem:[#allocation14 + $0x50] sm:$0xff] (!%p10470_p4)  }
0x10fe   : > { %8787 = vmatpush1.bf16.msra.mxu0 %v12396_v52  ;;  %v12465_v52 = vld [vmem:[#allocation14 + $0x10] sm:$0xff] (!%p10470_p4)  }
0x10ff   : > { %8788 = vmatprep.subr.bf16.mxu0 %v12401_v54  ;;  %v12466_v54 = vld [vmem:[#allocation14 + $0x90] sm:$0xff] (!%p10470_p4)  }
0x1102   : > { %8789 = vmatpush1.bf16.msra.mxu0 %v12399_v57  ;;  %v12467_v57 = vld [vmem:[#allocation14 + $0x58] sm:$0xff] (!%p10470_p4)  }
0x1103   : > { %8790 = vmatprep.subr.bf16.mxu0 %v12404_v23  ;;  %v12468_v23 = vld [vmem:[#allocation14 + $0x18] sm:$0xff] (!%p10470_p4)  }
0x1106   : > { %8791 = vmatpush1.bf16.msra.mxu0 %v12402_v59  ;;  %v12469_v59 = vld [vmem:[#allocation14 + $0x98] sm:$0xff] (!%p10470_p4)  }
0x1107   : > { %8792 = vmatprep.subr.bf16.mxu0 %v12407_v18  ;;  %v12470_v18 = vld [vmem:[#allocation14 + $0x60] sm:$0xff] (!%p10470_p4)  }
0x110a   : > { %8793 = vmatpush1.bf16.msra.mxu0 %v12405_v56  ;;  %v12471_v56 = vld [vmem:[#allocation14 + $0x20] sm:$0xff] (!%p10470_p4)  }
0x110b   : > { %8794 = vmatprep.subr.bf16.mxu0 %v12410_v1  ;;  %v12472_v1 = vld [vmem:[#allocation14 + $0xa0] sm:$0xff] (!%p10470_p4)  }
0x110e   : > { %v10689_v5 = vpop.f32.mrb[88].mxu1  ;;  %8795 = vmatpush1.bf16.msra.mxu0 %v12408_v4  ;;  %v12473_v4 = vld [vmem:[#allocation14 + $0x68] sm:$0xff] (!%p10470_p4)  }
0x110f   : > { %v10690_v22 = vpop.f32.mrb[89].mxu1  ;;  %8796 = vmatprep.subr.bf16.mxu0 %v12413_v62  ;;  %v12474_v62 = vld [vmem:[#allocation14 + $0x28] sm:$0xff] (!%p10470_p4)  }
0x1110   : > { %v10691_v10 = vadd.f32 %v10690_v22, %v10689_v5  ;;  %v10692_v25 = vpop.f32.mrb[90].mxu1  ;;  %v12475_v5 = vld [vmem:[#allocation14 + $0xa8] sm:$0xff] (!%p10470_p4)   ;;  %v12477_v22 = vld [vmem:[#allocation14 + $0x30] sm:$0xff] (!%p10470_p4)  }
0x1111   : > { %v10693_v11 = vpop.f32.mrb[91].mxu1 }
0x1112   : > { %v8971_v12 = vadd.f32 %v10691_v10, %v8930_v35  ;;  %v10694_v7 = vadd.f32 %v10693_v11, %v10692_v25  ;;  %8797 = vmatpush1.bf16.msra.mxu0 %v12411_v6  ;;  %v12476_v6 = vld [vmem:[#allocation14 + $0x70] sm:$0xff] (!%p10470_p4)   ;;  %v12479_v10 = vld [vmem:[#allocation14 + $0x78] sm:$0xff] (!%p10470_p4)  }
0x1113   : > { %8798 = vmatprep.subr.bf16.mxu0 %v12416_v9  ;;  %v12478_v9 = vld [vmem:[#allocation14 + $0xb0] sm:$0xff] (!%p10470_p4)   ;;  %v12480_v25 = vld [vmem:[#allocation14 + $0x38] sm:$0xff] (!%p10470_p4)  }
0x1114   : > { %v8974_v16 = vadd.f32 %v10694_v7, %v8933_v47  ;;  %v12824_v47 = vmov (!%p10470_p4), 0.0   ;;  %v12481_v11 = vld [vmem:[#allocation14 + $0xb8] sm:$0xff] (!%p10470_p4)  }
0x1115   : > { %10950 = vmatprep.subr.bf16.mxu1 (!%p10470_p4), %v12824_v47  ;;  %10966 = vmatprep.mubr.msk.bf16.mxu1 (!%p10470_p4), %vm12825_vm7, %v12824_v47 }
0x1116   : > { %8799 = vmatpush1.bf16.msra.mxu0 %v12414_v50 }
0x1117   : > { %8800 = vmatprep.subr.bf16.mxu0 %v12419_v15 }
0x111a   : > { %8801 = vmatpush1.bf16.msra.mxu0 %v12417_v8 }
0x111d   : > { %8803 = vmatmul.mubr.bf16.vlgmr.msra.gmra.mrb[56].mxu0 %v14528_v51 }
0x114e   : > { %v10711_v19 = vpop.f32.mrb[92].mxu1 }
0x114f   : > { %v10712_v14 = vpop.f32.mrb[93].mxu1 }
0x1150   : > { %v10713_v53 = vadd.f32 %v10712_v14, %v10711_v19  ;;  %v10714_v13 = vpop.f32.mrb[94].mxu1 }
0x1151   : > { %v10715_v20 = vpop.f32.mrb[95].mxu1 }
0x1152   : > { %v9012_v21 = vadd.f32 %v10713_v53, %v8971_v12  ;;  %v10716_v31 = vadd.f32 %v10715_v20, %v10714_v13 }
0x1154   : > { %v9015_v3 = vadd.f32 %v10716_v31, %v8974_v16  ;;  %v10471_v16 = vld [vmem:[#allocation16] ss:$0 sm:$0xff] (!%p10470_p4) }
0x116e   : > { %v10733_v24 = vpop.f32.mrb[96].mxu1 }
0x116f   : > { %v10734_v27 = vpop.f32.mrb[97].mxu1 }
0x1170   : > { %v10735_v61 = vadd.f32 %v10734_v27, %v10733_v24  ;;  %v10736_v63 = vpop.f32.mrb[98].mxu1 }
0x1171   : > { %v10737_v17 = vpop.f32.mrb[99].mxu1 }
0x1172   : > { %v9053_v33 = vadd.f32 %v10735_v61, %v9012_v21  ;;  %v10738_v28 = vadd.f32 %v10737_v17, %v10736_v63 }
0x1174   : > { %v14649_v46 = vadd.f32 %v9053_v33, %v14068_v26  ;;  %v9056_v37 = vadd.f32 %v10738_v28, %v9015_v3 }
0x1176   : > { %9067 = vst [vmem:[#allocation2 + $0x10] sm:$0xff] %v14649_v46  ;;  %v14653_v51 = vadd.f32 %v9056_v37, %v14064_v45 }
0x1178   : > { %9070 = vst [vmem:[#allocation2 + $0x28] sm:$0xff] %v14653_v51  ;;  %v9077_v7 = vpack.c.bf16 (!%p10470_p4), %v14653_v51, %v14649_v46 }
0x11f0   : > { %v8804_v32 = vpop.f32.mrb[56].mxu0 }
0x11f1   : > { %v10994_v30 = vadd.f32 %v8804_v32, %v7007_v2  ;;  %v8806_v55 = vpop.f32.mrb[57].mxu0 }
0x11f2   : > { %v10995_v34 = vadd.f32 %v8806_v55, %v7011_v29  ;;  %v8808_v26 = vpop.f32.mrb[58].mxu0  ;;  %9074 = sbr.rel (%p10470_p4) target bundleno = 4850 (0x12f2), region = 104 }
0x11f3   : > { %v14661_v60 = vadd.f32 %v10994_v30, %v14011_v43  ;;  %v10996_v35 = vadd.f32 %v8808_v26, %v7007_v2  ;;  %v8810_v39 = vpop.f32.mrb[59].mxu0  ;;  %v12458_v43 = vld [vmem:[#allocation14 + $0x40] sm:$0xff] (!%p10470_p4)  }
0x11f4   : > { %v9060_v45 = vadd.f32 %v10995_v34, %v14007_v38  ;;  %v10997_v36 = vadd.f32 %v8810_v39, %v7011_v29  ;;  %10739 = vmatprep.subr.bf16.mxu0 (!%p10470_p4), %v12458_v43  ;;  %v12460_v38 = vld [vmem:[#allocation14 + $0x80] sm:$0xff] (!%p10470_p4)  }
0x11f5   : > { %9065 = vst [vmem:[#allocation2] sm:$0xff] %v14661_v60  ;;  %v14666_v42 = vadd.f32 %v10996_v35, %v14005_v58  ;;  %10740 = vmatpush3.bf16.msra.mxu0 (!%p10470_p4), %v12459_v41  ;;  %v12461_v58 = vld [vmem:[#allocation14 + $0x48] sm:$0xff] (!%p10470_p4)   ;;  %10951 = vmatpush3.bf16.msra.mxu1 (!%p10470_p4), %v12460_v38 }
0x11f6   : > { %9066 = vst [vmem:[#allocation2 + $0x8] sm:$0xff] %v9060_v45  ;;  %v9063_v0 = vadd.f32 %v10997_v36, %v14009_v40  ;;  %v12462_v40 = vld [vmem:[#allocation14 + $0x8] sm:$0xff] (!%p10470_p4)   ;;  %10741 = vmatprep.subr.bf16.mxu0 (!%p10470_p4), %v12461_v58  ;;  %10952 = vmatprep.subr.bf16.mxu1 (!%p10470_p4), %v12824_v47 }
0x11f7   : > { %9068 = vst [vmem:[#allocation2 + $0x18] sm:$0xff] %v14666_v42  ;;  %v9075_v12 = vpack.c.bf16 (!%p10470_p4), %v14666_v42, %v14661_v60 }
0x11f8   : > { %9069 = vst [vmem:[#allocation2 + $0x20] sm:$0xff] %v9063_v0  ;;  %v9076_v44 = vpack.c.bf16 (!%p10470_p4), %v9063_v0, %v9060_v45 }
0x11f9   : > { %10742 = vmatpush3.bf16.msra.mxu0 %v12462_v40  ;;  %10953 = vmatpush3.bf16.msra.mxu1 %v12463_v48 }
0x11fa   : > { %9309 = vmatprep.mubr.bf16.mxu0 %v9076_v44  ;;  %10743 = vmatprep.subr.bf16.mxu0 %v12464_v49 }
0x11fb   : > { %10954 = vmatprep.subr.bf16.mxu1 %v12824_v47 }
0x11fd   : > { %10744 = vmatpush3.bf16.msra.mxu0 %v12465_v52  ;;  %10955 = vmatpush3.bf16.msra.mxu1 %v12466_v54 }
0x11fe   : > { %10745 = vmatprep.subr.bf16.mxu0 %v12467_v57  ;;  %10956 = vmatprep.subr.bf16.mxu1 %v12824_v47 }
0x1201   : > { %10746 = vmatpush3.bf16.msra.mxu0 %v12468_v23  ;;  %10957 = vmatpush3.bf16.msra.mxu1 %v12469_v59 }
0x1202   : > { %10747 = vmatprep.subr.bf16.mxu0 %v12470_v18  ;;  %10958 = vmatprep.subr.bf16.mxu1 %v12824_v47 }
0x1205   : > { %10748 = vmatpush3.bf16.msra.mxu0 %v12471_v56  ;;  %10959 = vmatpush3.bf16.msra.mxu1 %v12472_v1 }
0x1206   : > { %10749 = vmatprep.subr.bf16.mxu0 %v12473_v4  ;;  %10960 = vmatprep.subr.bf16.mxu1 %v12824_v47 }
0x1209   : > { %10750 = vmatpush3.bf16.msra.mxu0 %v12474_v62  ;;  %10961 = vmatpush3.bf16.msra.mxu1 %v12475_v5 }
0x120a   : > { %10751 = vmatprep.subr.bf16.mxu0 %v12476_v6  ;;  %10962 = vmatprep.subr.bf16.mxu1 %v12824_v47 }
0x120d   : > { %10752 = vmatpush3.bf16.msra.mxu0 %v12477_v22  ;;  %10963 = vmatpush3.bf16.msra.mxu1 %v12478_v9 }
0x120e   : > { %10753 = vmatprep.subr.bf16.mxu0 %v12479_v10  ;;  %10964 = vmatprep.subr.bf16.mxu1 %v12824_v47 }
0x1211   : > { %10754 = vmatpush3.bf16.msra.mxu0 %v12480_v25  ;;  %10965 = vmatpush3.bf16.msra.mxu1 %v12481_v11 }
0x1214   : > { %9310 = vmatmul.mubr.bf16.vlgmr.msra.gmra.mrb[0].mxu0 %v9075_v12  ;;  %10967 = vmatmul.mubr.bf16.vlgmr.msra.gmra.mrb[0].mxu1 %v9077_v7 }
0x12e7   : > { %v10755_v50 = vpop.f32.mrb[0].mxu0  ;;  %v9352_v8 = vpop.f32.mrb[0].mxu1 }
0x12e8   : > { %v10756_v15 = vpop.f32.mrb[1].mxu0  ;;  %v10968_v53 = vpop.f32.mrb[1].mxu1 }
0x12e9   : > { %v10757_v19 = vadd.f32 %v10756_v15, %v10755_v50  ;;  %v10758_v14 = vpop.f32.mrb[2].mxu0  ;;  %v9355_v20 = vpop.f32.mrb[2].mxu1 }
0x12ea   : > { %v10759_v13 = vpop.f32.mrb[3].mxu0  ;;  %v10969_v3 = vpop.f32.mrb[3].mxu1 }
0x12eb   : > { %v9312_v21 = vadd.f32 %v10757_v19, %v10471_v16  ;;  %v10760_v31 = vadd.f32 %v10759_v13, %v10758_v14 }
0x12ed   : > { %v9353_v24 = vadd.f32 %v9352_v8, %v9312_v21  ;;  %v9315_v27 = vadd.f32 %v10760_v31, %v10471_v16 }
0x12ef   : > { %9359 = vst [vmem:[%s14767_s13] sm:$0xff] %v9353_v24  ;;  %v9356_v61 = vadd.f32 %v9355_v20, %v9315_v27 }
0x12f1   : > { %9360 = vst [vmem:[%s14768_s21 + $0x8] sm:$0xff] %v9356_v61 }
0x12f2 PF: > { %s14769_s16 = sld [smem:[#allocation24_spill]]  ;;  %s14770_s25 = sld [smem:[#allocation22_spill]] }
0x12f3   : > { %s14771_s15 = sld [smem:[#allocation25_spill]]  ;;  %s14772_s13 = smov %s12790_s14 }
0x12f8   : > { %p30_p0 = scmp.ge.s32.totalorder %s14769_s16, 5   ;;  %s14773_s14 = smov %s14770_s25 }
0x12fa   :  { %32 = sbr.rel (!%p30_p0) target bundleno = 14 (0xe), region = 184 }
0x1301   :  { %9372 = vsyncpa [#allocation4], 1 }
0x1302   :  { %9374 = vsyncpa [#allocation4 + $0x1], 1 }
0x1303   :  { %9375 = vsyncpa [#allocation6], 1 }
0x1304   :  { %9377 = vsyncpa [#allocation6 + $0x1], 1 }
0x1305   :  { %9378 = vsyncpa [#allocation9], 1 }
0x1306   :  { %9380 = vsyncpa [#allocation9 + $0x1], 1 }
0x1307   :  { %9381 = vsyncpa [#allocation12], 1 }
0x1308   :  { %9383 = vsyncpa [#allocation12 + $0x1], 1 }
0x1309   :  { %9384 = vsyncpa [#allocation15], 1 }

</bundles_post_ra>
